<compile_context>
chip_gen: v7x
topology: tpu7x:2x2x1
jax: 0.10.0
libtpu: 0.0.40
codegen_flags: <defaults>
</compile_context>

<pallas_src>
import jax
import jax.numpy as jnp
from jax.experimental import pallas as pl
from jax.experimental.pallas import tpu as pltpu


def ae_lstm_kernel(maxlen_ref, len_ref, x_ref, wih_ref, whh_ref, b_ref,
                   wd_ref, bd_ref, out_ref, gx_ref, h_ref, c_ref):
    """One (batch block, time chunk) grid step.

    maxlen_ref : [nb]            i32 SMEM  per-block max length (scalar prefetch)
    len_ref    : [TB, 1]         i32       valid length per row of this block
    x_ref      : [1, Tc*TB, Kp]  bf16      time-major rows (row = s*TB + local_b)
    wih_ref    : [Kp, 4Hp]       bf16      input->gate weights (gate order i,f,g,o)
    whh_ref    : [Hp, 4Hp]       bf16      hidden->gate weights
    b_ref      : [1, 4Hp]        f32       b_ih + b_hh
    wd_ref     : [Hp, Pp]        f32       dense weights
    bd_ref     : [1, Pp]         f32       dense bias
    out_ref    : [TB, Pp]        f32       (written only on the last chunk)
    gx_ref     : [Tc*TB, 4Hp]    f32 VMEM  hoisted input-projection gates (chunk)
    h_ref,c_ref: [TB, Hp]        f32 VMEM  recurrent state (persists across chunks)
    """
    Hp = whh_ref.shape[0]
    TB = h_ref.shape[0]
    Tc = gx_ref.shape[0] // TB

    bi = pl.program_id(0)
    ti = pl.program_id(1)

    @pl.when(ti == 0)
    def _():
        h_ref[...] = jnp.zeros_like(h_ref)
        c_ref[...] = jnp.zeros_like(c_ref)

    maxlen = maxlen_ref[bi]
    chunk_start = ti * Tc

    # Skip chunks entirely past this block's longest sequence.
    @pl.when(chunk_start < maxlen)
    def _():
        # Hoisted input projection for this chunk: one large-M bf16 MXU matmul
        # with f32 accumulation, off the serial recurrence path.
        gx_ref[...] = (
            jnp.dot(x_ref[0], wih_ref[...], preferred_element_type=jnp.float32)
            + b_ref[...])

        nsteps = jnp.minimum(Tc, maxlen - chunk_start)

        @pl.loop(0, nsteps)
        def _(s):
            t = chunk_start + s
            # pack_padded semantics: rows stop updating once t >= their length.
            mask = len_ref[...] > t                                 # [TB, 1]
            row = pl.multiple_of(s * TB, TB)
            gates = gx_ref[pl.ds(row, TB), :] + jnp.dot(
                h_ref[...].astype(whh_ref.dtype), whh_ref[...],
                preferred_element_type=jnp.float32)                 # [TB, 4Hp] f32
            # Hp is a multiple of 128 lanes -> each gate slice is a vreg-aligned
            # lane group: dense EUP passes, no lane relayout.
            i = jax.nn.sigmoid(gates[:, 0 * Hp:1 * Hp])
            f = jax.nn.sigmoid(gates[:, 1 * Hp:2 * Hp])
            g = jnp.tanh(gates[:, 2 * Hp:3 * Hp])
            o = jax.nn.sigmoid(gates[:, 3 * Hp:4 * Hp])
            c_new = f * c_ref[...] + i * g
            h_new = o * jnp.tanh(c_new)
            h_ref[...] = jnp.where(mask, h_new, h_ref[...])
            c_ref[...] = jnp.where(mask, c_new, c_ref[...])

    # Final dense layer on the last valid hidden state (lane-dense Pp output).
    @pl.when(ti == pl.num_programs(1) - 1)
    def _():
        out_ref[...] = (
            jnp.dot(h_ref[...], wd_ref[...], preferred_element_type=jnp.float32)
            + bd_ref[...])


def _round_up(v, m):
    return (v + m - 1) // m * m


def _pad_axis(a, axis, size):
    pads = [(0, 0)] * a.ndim
    pads[axis] = (0, size - a.shape[axis])
    return jnp.pad(a, pads)


def ae_lstm_forward(text, aspect_text, params, *, batch_tile=128, time_chunk=8):
    """Embedding/pooling glue in plain JAX; projection + recurrence + dense in Pallas."""
    emb = params["embedding"]          # [V, E]
    w_ih = params["w_ih"]              # [2E, 4H]
    w_hh = params["w_hh"]              # [H, 4H]
    b = params["b"]                    # [4H]  (b_ih + b_hh)
    w_d = params["w_dense"]            # [H, P]
    b_d = params["b_dense"]            # [P]

    B, L = text.shape
    E = emb.shape[1]
    K = 2 * E
    H = w_hh.shape[0]
    P = w_d.shape[1]

    # ---- plain-JAX glue: gathers, aspect mean-pool, concat ----
    # TODO(synk): aspect_len == 0 (all-padding aspect row) yields NaN, exactly
    # like the PyTorch module; no guard added to preserve semantics.
    x_len = jnp.sum(text != 0, axis=-1).astype(jnp.int32)                 # [B]
    aspect_len = jnp.sum(aspect_text != 0, axis=-1).astype(jnp.float32)   # [B]
    x_emb = emb[text]                                                     # [B, L, E]
    pos = jnp.arange(L)[None, :, None]
    # SqueezeEmbedding pack/pad round-trip zeroes padded positions; keeping the
    # static L (vs dynamic x_len_max) is a no-op because the recurrence both
    # masks per-row and stops at the per-block max length.
    x_emb = jnp.where(pos < x_len[:, None, None], x_emb, 0.0)
    aspect_pool = jnp.sum(emb[aspect_text], axis=1) / aspect_len[:, None]  # [B, E]
    x = jnp.concatenate(
        [jnp.broadcast_to(aspect_pool[:, None, :], (B, L, E)), x_emb],
        axis=-1).astype(jnp.float32)                                       # [B, L, 2E]

    # ---- pad to dense TPU tiles (numerically exact) ----
    TB = batch_tile
    assert TB % 8 == 0, "batch tile must be a multiple of 8 sublanes"
    Tc = time_chunk
    assert Tc >= 1
    Bp = _round_up(B, TB)
    nb = Bp // TB
    Lp = _round_up(L, Tc)
    nchunks = Lp // Tc
    Kp = _round_up(K, 128)     # fill the MXU contraction dim of the projection
    Hp = _round_up(H, 128)     # lane-aligned hidden -> vreg-aligned gate slices
    Pp = _round_up(P, 128)     # lane-dense output store
    G = 4 * Hp

    def pad_gate_cols(w):      # [..., 4H] -> [..., 4Hp], per-gate zero padding
        lead = w.shape[:-1]
        w4 = w.reshape(lead + (4, H))
        w4 = jnp.pad(w4, [(0, 0)] * len(lead) + [(0, 0), (0, Hp - H)])
        return w4.reshape(lead + (G,))

    # bf16 matmul operands, f32 accumulation / bias / state / dense.
    w_ih_p = _pad_axis(pad_gate_cols(w_ih), 0, Kp).astype(jnp.bfloat16)   # [Kp, 4Hp]
    w_hh_p = _pad_axis(pad_gate_cols(w_hh), 0, Hp).astype(jnp.bfloat16)   # [Hp, 4Hp]
    b_p = pad_gate_cols(b)[None, :].astype(jnp.float32)                   # [1, 4Hp]
    w_d_p = _pad_axis(_pad_axis(w_d, 1, Pp), 0, Hp).astype(jnp.float32)   # [Hp, Pp]
    b_d_p = _pad_axis(b_d, 0, Pp)[None, :].astype(jnp.float32)            # [1, Pp]

    x = _pad_axis(_pad_axis(_pad_axis(x, 0, Bp), 1, Lp), 2, Kp)           # [Bp, Lp, Kp]
    x = x.astype(jnp.bfloat16)
    lens = _pad_axis(x_len, 0, Bp)                                        # [Bp]
    # Per batch block, time-major rows (row = t*TB + local_b): [nb, Lp*TB, Kp].
    x_blk = x.reshape(nb, TB, Lp, Kp).transpose(0, 2, 1, 3).reshape(nb, Lp * TB, Kp)
    lens2d = lens[:, None].astype(jnp.int32)                              # [Bp, 1]
    maxlen = lens.reshape(nb, TB).max(axis=1).astype(jnp.int32)           # [nb]

    # ---- explicit VMEM budget (buffers + headroom, clamped for v7x 64 MiB) ----
    f32b, bf16b = 4, 2
    buf_bytes = (
        2 * (Tc * TB * Kp) * bf16b          # x chunk, double-buffered
        + (Tc * TB * G) * f32b              # gx scratch
        + (Tc * TB * G) * f32b              # projection intermediate headroom
        + 2 * (TB * Hp) * f32b              # h, c
        + 2 * (Kp * G + Hp * G) * bf16b     # w_ih, w_hh (pipeline-buffered)
        + 2 * (G + Hp * Pp + Pp) * f32b     # b, w_dense, b_dense
        + 2 * (TB * Pp) * f32b              # output block
        + 2 * (TB * 4)                      # lens
    )
    vmem_limit = int(min(64 << 20, max(32 << 20, 2 * buf_bytes)))

    grid_spec = pltpu.PrefetchScalarGridSpec(
        num_scalar_prefetch=1,
        grid=(nb, nchunks),
        in_specs=[
            pl.BlockSpec((TB, 1), lambda bi, ti, ml: (bi, 0)),               # lens
            pl.BlockSpec((1, Tc * TB, Kp), lambda bi, ti, ml: (bi, ti, 0)),  # x chunk
            pl.BlockSpec((Kp, G), lambda bi, ti, ml: (0, 0)),                # w_ih
            pl.BlockSpec((Hp, G), lambda bi, ti, ml: (0, 0)),                # w_hh
            pl.BlockSpec((1, G), lambda bi, ti, ml: (0, 0)),                 # b
            pl.BlockSpec((Hp, Pp), lambda bi, ti, ml: (0, 0)),               # w_dense
            pl.BlockSpec((1, Pp), lambda bi, ti, ml: (0, 0)),                # b_dense
        ],
        out_specs=pl.BlockSpec((TB, Pp), lambda bi, ti, ml: (bi, 0)),
        scratch_shapes=[
            pltpu.VMEM((Tc * TB, G), jnp.float32),   # per-chunk projected gates
            pltpu.VMEM((TB, Hp), jnp.float32),       # h
            pltpu.VMEM((TB, Hp), jnp.float32),       # c
        ],
    )
    out = pl.pallas_call(
        ae_lstm_kernel,
        out_shape=jax.ShapeDtypeStruct((Bp, Pp), jnp.float32),
        grid_spec=grid_spec,
        compiler_params=pltpu.CompilerParams(
            dimension_semantics=("parallel", "arbitrary"),  # batch blocks || time
            vmem_limit_bytes=vmem_limit,
        ),
    )(maxlen, lens2d, x_blk, w_ih_p, w_hh_p, b_p, w_d_p, b_d_p)
    return out[:B, :P]


def ae_lstm_reference(text, aspect_text, params):
    """Pure-JAX f32 reference replicating the PyTorch forward (for verification)."""
    emb = params["embedding"]
    H = params["w_hh"].shape[0]
    B, L = text.shape
    E = emb.shape[1]

    x_len = jnp.sum(text != 0, axis=-1)
    aspect_len = jnp.sum(aspect_text != 0, axis=-1).astype(jnp.float32)
    x_emb = emb[text]
    pos = jnp.arange(L)[None, :, None]
    x_emb = jnp.where(pos < x_len[:, None, None], x_emb, 0.0)
    aspect_pool = jnp.sum(emb[aspect_text], axis=1) / aspect_len[:, None]
    x = jnp.concatenate(
        [jnp.broadcast_to(aspect_pool[:, None, :], (B, L, E)), x_emb], axis=-1)

    h = jnp.zeros((B, H), jnp.float32)
    c = jnp.zeros((B, H), jnp.float32)
    for t in range(L):
        gates = x[:, t, :] @ params["w_ih"] + h @ params["w_hh"] + params["b"]
        i = jax.nn.sigmoid(gates[:, :H])
        f = jax.nn.sigmoid(gates[:, H:2 * H])
        g = jnp.tanh(gates[:, 2 * H:3 * H])
        o = jax.nn.sigmoid(gates[:, 3 * H:])
        c_new = f * c + i * g
        h_new = o * jnp.tanh(c_new)
        m = x_len[:, None] > t
        h = jnp.where(m, h_new, h)
        c = jnp.where(m, c_new, c)
    return h @ params["w_dense"] + params["b_dense"]


def make_params(key, vocab=20, embed_dim=32, hidden_dim=32, polarities=3):
    ks = jax.random.split(key, 7)
    embedding = jax.random.normal(ks[0], (vocab, embed_dim), jnp.float32) * 0.1
    embedding = embedding.at[0].set(0.0)  # padding row
    w_ih = jax.random.normal(ks[1], (2 * embed_dim, 4 * hidden_dim), jnp.float32) * 0.1
    w_hh = jax.random.normal(ks[2], (hidden_dim, 4 * hidden_dim), jnp.float32) * 0.1
    b_ih = jax.random.normal(ks[3], (4 * hidden_dim,), jnp.float32) * 0.1
    b_hh = jax.random.normal(ks[4], (4 * hidden_dim,), jnp.float32) * 0.1
    w_dense = jax.random.normal(ks[5], (hidden_dim, polarities), jnp.float32) * 0.1
    b_dense = jax.random.normal(ks[6], (polarities,), jnp.float32) * 0.1
    return dict(embedding=embedding, w_ih=w_ih, w_hh=w_hh, b=b_ih + b_hh,
                w_dense=w_dense, b_dense=b_dense)


if __name__ == "__main__":
    VOCAB, E, H, P = 20, 32, 32, 3
    key = jax.random.PRNGKey(0)
    k_par, k1, k2, k3, k4, k5, k6 = jax.random.split(key, 7)
    params = make_params(k_par, VOCAB, E, H, P)

    # bf16 matmul operands (f32 accumulation) -> modestly loosened tolerance
    # vs. the f32 reference.
    ATOL = 1e-2

    # --- case 1: tiny batch (B=2, L=8), production-style tiles (TB=128, Tc=8)
    #     -> single batch block, single time chunk ---
    B, L, La = 2, 8, 4
    text = jax.random.randint(k1, (B, L), 1, VOCAB, dtype=jnp.int32)
    text = text.at[1, 5:].set(0)                 # second sequence has length 5
    aspect_text = jax.random.randint(k2, (B, La), 1, VOCAB, dtype=jnp.int32)
    aspect_text = aspect_text.at[1, 2:].set(0)   # second aspect has length 2

    out = jax.block_until_ready(ae_lstm_forward(text, aspect_text, params))
    ref = jax.block_until_ready(ae_lstm_reference(text, aspect_text, params))
    assert out.shape == (B, P)
    assert jnp.allclose(out, ref, atol=ATOL), (out, ref)

    # --- case 2: B=16, L=12 with small tiles (TB=8, Tc=4) to exercise the
    #     multi-block "parallel" batch axis, multi-chunk streaming and the
    #     padded-tail chunk skip (production default stays TB=128) ---
    B2, L2, La2 = 16, 12, 4
    text2 = jax.random.randint(k3, (B2, L2), 1, VOCAB, dtype=jnp.int32)
    tlen = jax.random.randint(k4, (B2,), 1, L2 + 1, dtype=jnp.int32)
    text2 = jnp.where(jnp.arange(L2)[None, :] < tlen[:, None], text2, 0)
    aspect2 = jax.random.randint(k5, (B2, La2), 1, VOCAB, dtype=jnp.int32)
    alen = jax.random.randint(k6, (B2,), 1, La2 + 1, dtype=jnp.int32)
    aspect2 = jnp.where(jnp.arange(La2)[None, :] < alen[:, None], aspect2, 0)

    out2 = jax.block_until_ready(
        ae_lstm_forward(text2, aspect2, params, batch_tile=8, time_chunk=4))
    ref2 = jax.block_until_ready(ae_lstm_reference(text2, aspect2, params))
    assert out2.shape == (B2, P)
    assert jnp.allclose(out2, ref2, atol=ATOL), (out2, ref2)

    print("KERNEL_OK")
</pallas_src>

<mosaic_0001>
module attributes {stable_mosaic.version = 11 : i64} {
  func.func @ae_lstm_kernel(%arg0: i32, %arg1: i32, %arg2: memref<1xi32, #tpu.memory_space<smem>>, %arg3: memref<128x1xi32, #tpu.memory_space<vmem>>, %arg4: memref<1x1024x128xbf16, #tpu.memory_space<vmem>>, %arg5: memref<128x512xbf16, #tpu.memory_space<vmem>>, %arg6: memref<128x512xbf16, #tpu.memory_space<vmem>>, %arg7: memref<1x512xf32, #tpu.memory_space<vmem>>, %arg8: memref<128x128xf32, #tpu.memory_space<vmem>>, %arg9: memref<1x128xf32, #tpu.memory_space<vmem>>, %arg10: memref<128x128xf32, #tpu.memory_space<vmem>>, %arg11: memref<1024x512xf32, #tpu.memory_space<vmem>>, %arg12: memref<128x128xf32, #tpu.memory_space<vmem>>, %arg13: memref<128x128xf32, #tpu.memory_space<vmem>>) attributes {dimension_semantics = [#tpu.dimension_semantics<parallel>, #tpu.dimension_semantics<arbitrary>], iteration_bounds = array<i64: 1, 1>, scalar_prefetch = 1 : i64, scratch_operands = 3 : i64, tpu.core_type = #tpu.core_type<tc>, window_params = [{transform_indices = @transform_0, window_bounds = array<i64: 128, 1>}, {transform_indices = @transform_1, window_bounds = array<i64: 1, 1024, 128>}, {pipeline_mode = #tpu.pipeline_mode<synchronous>, transform_indices = @transform_2, window_bounds = array<i64: 128, 512>}, {pipeline_mode = #tpu.pipeline_mode<synchronous>, transform_indices = @transform_3, window_bounds = array<i64: 128, 512>}, {pipeline_mode = #tpu.pipeline_mode<synchronous>, transform_indices = @transform_4, window_bounds = array<i64: 1, 512>}, {pipeline_mode = #tpu.pipeline_mode<synchronous>, transform_indices = @transform_5, window_bounds = array<i64: 128, 128>}, {pipeline_mode = #tpu.pipeline_mode<synchronous>, transform_indices = @transform_6, window_bounds = array<i64: 1, 128>}, {transform_indices = @transform_7, window_bounds = array<i64: 128, 128>}]} {
    %c0_i32 = arith.constant 0 : i32
    %0 = arith.cmpi eq, %arg1, %c0_i32 : i32
    %1 = arith.extui %0 : i1 to i32
    %c0_i32_0 = arith.constant 0 : i32
    %2 = arith.cmpi ne, %1, %c0_i32_0 : i32
    scf.if %2 {
      %cst = arith.constant 0.000000e+00 : f32
      %12 = vector.broadcast %cst : f32 to vector<128x128xf32>
      %c0 = arith.constant 0 : index
      %c0_4 = arith.constant 0 : index
      %13 = vector.load %arg12[%c0, %c0_4] : memref<128x128xf32, #tpu.memory_space<vmem>>, vector<128x128xf32>
      tpu.vector_store %arg12[%c0, %c0_4], %12 {strides = array<i32>} : memref<128x128xf32, #tpu.memory_space<vmem>>, vector<128x128xf32>,
      %cst_5 = arith.constant 0.000000e+00 : f32
      %14 = vector.broadcast %cst_5 : f32 to vector<128x128xf32>
      %c0_6 = arith.constant 0 : index
      %c0_7 = arith.constant 0 : index
      %15 = vector.load %arg13[%c0_6, %c0_7] : memref<128x128xf32, #tpu.memory_space<vmem>>, vector<128x128xf32>
      tpu.vector_store %arg13[%c0_6, %c0_7], %14 {strides = array<i32>} : memref<128x128xf32, #tpu.memory_space<vmem>>, vector<128x128xf32>,
    } else {
    }
    %3 = arith.index_cast %arg0 : i32 to index
    %4 = memref.load %arg2[%3] : memref<1xi32, #tpu.memory_space<smem>>
    %c8_i32 = arith.constant 8 : i32
    %5 = arith.muli %arg1, %c8_i32 : i32
    %6 = arith.cmpi slt, %5, %4 : i32
    %7 = arith.extui %6 : i1 to i32
    %c0_i32_1 = arith.constant 0 : i32
    %8 = arith.cmpi ne, %7, %c0_i32_1 : i32
    scf.if %8 {
      %c0 = arith.constant 0 : index
      %c0_4 = arith.constant 0 : index
      %c0_5 = arith.constant 0 : index
      %12 = vector.load %arg4[%c0, %c0_4, %c0_5] : memref<1x1024x128xbf16, #tpu.memory_space<vmem>>, vector<1x1024x128xbf16>
      %13 = vector.shape_cast %12 : vector<1x1024x128xbf16> to vector<1024x128xbf16>
      %c0_6 = arith.constant 0 : index
      %c0_7 = arith.constant 0 : index
      %14 = vector.load %arg5[%c0_6, %c0_7] : memref<128x512xbf16, #tpu.memory_space<vmem>>, vector<128x512xbf16>
      %cst = arith.constant dense<0.000000e+00> : vector<1024x512xf32>
      %15 = tpu.matmul %13, %14, %cst {dimension_numbers = #tpu.dot_dimension_numbers<[1], [0], [0], [1], [0, 0, 1, 1], [], []>} : vector<1024x128xbf16>, vector<128x512xbf16>, vector<1024x512xf32> -> vector<1024x512xf32>
      %c0_8 = arith.constant 0 : index
      %c0_9 = arith.constant 0 : index
      %16 = vector.load %arg7[%c0_8, %c0_9] : memref<1x512xf32, #tpu.memory_space<vmem>>, vector<1x512xf32>
      %17 = vector.broadcast %16 : vector<1x512xf32> to vector<1024x512xf32>
      %18 = arith.addf %15, %17 : vector<1024x512xf32>
      %c0_10 = arith.constant 0 : index
      %c0_11 = arith.constant 0 : index
      %19 = vector.load %arg11[%c0_10, %c0_11] : memref<1024x512xf32, #tpu.memory_space<vmem>>, vector<1024x512xf32>
      tpu.vector_store %arg11[%c0_10, %c0_11], %18 {strides = array<i32>} : memref<1024x512xf32, #tpu.memory_space<vmem>>, vector<1024x512xf32>,
      %20 = arith.subi %4, %5 : i32
      %c8_i32_12 = arith.constant 8 : i32
      %21 = arith.minsi %c8_i32_12, %20 : i32
      %c0_i32_13 = arith.constant 0 : i32
      %22 = arith.subi %21, %c0_i32_13 : i32
      %c1_i32 = arith.constant 1 : i32
      %c1_i32_14 = arith.constant 1 : i32
      %23 = arith.subi %c1_i32, %c1_i32_14 : i32
      %24 = arith.addi %22, %23 : i32
      %c1_i32_15 = arith.constant 1 : i32
      %25 = arith.divsi %24, %c1_i32_15 : i32
      %c1_i32_16 = arith.constant 1 : i32
      %c0_i32_17 = arith.constant 0 : i32
      %c0_i32_18 = arith.constant 0 : i32
      %26 = arith.subi %25, %c0_i32_18 : i32
      %27 = arith.addi %c0_i32_18, %26 : i32
      %c1_i32_19 = arith.constant 1 : i32
      scf.for %arg14 = %c0_i32_18 to %27 step %c1_i32_19  : i32 {
        %28 = arith.muli %arg14, %c1_i32_16 : i32
        %29 = arith.addi %c0_i32_17, %28 : i32
        %30 = arith.addi %5, %29 : i32
        %c0_20 = arith.constant 0 : index
        %c0_21 = arith.constant 0 : index
        %31 = vector.load %arg3[%c0_20, %c0_21] : memref<128x1xi32, #tpu.memory_space<vmem>>, vector<128x1xi32>
        %32 = vector.broadcast %30 : i32 to vector<128x1xi32>
        %33 = arith.cmpi sgt, %31, %32 : vector<128x1xi32>
        %c128_i32 = arith.constant 128 : i32
        %34 = arith.muli %29, %c128_i32 : i32
        %35 = tpu.assume_multiple %34, 128 : i32
        %36 = arith.index_cast %35 : i32 to index
        %c0_22 = arith.constant 0 : index
        %37 = vector.load %arg11[%36, %c0_22] : memref<1024x512xf32, #tpu.memory_space<vmem>>, vector<128x512xf32>
        %c0_23 = arith.constant 0 : index
        %c0_24 = arith.constant 0 : index
        %38 = vector.load %arg12[%c0_23, %c0_24] : memref<128x128xf32, #tpu.memory_space<vmem>>, vector<128x128xf32>
        %39 = arith.truncf %38 : vector<128x128xf32> to vector<128x128xbf16>
        %c0_25 = arith.constant 0 : index
        %c0_26 = arith.constant 0 : index
        %40 = vector.load %arg6[%c0_25, %c0_26] : memref<128x512xbf16, #tpu.memory_space<vmem>>, vector<128x512xbf16>
        %cst_27 = arith.constant dense<0.000000e+00> : vector<128x512xf32>
        %41 = tpu.matmul %39, %40, %cst_27 {dimension_numbers = #tpu.dot_dimension_numbers<[1], [0], [0], [1], [0, 0, 1, 1], [], []>} : vector<128x128xbf16>, vector<128x512xbf16>, vector<128x512xf32> -> vector<128x512xf32>
        %42 = arith.addf %37, %41 : vector<128x512xf32>
        %43 = vector.extract_strided_slice %42 {offsets = [0, 0], sizes = [128, 128], strides = [1, 1]} : vector<128x512xf32> to vector<128x128xf32>
        %44 = arith.negf %43 : vector<128x128xf32>
        %45 = math.exp %44 : vector<128x128xf32>
        %cst_28 = arith.constant 1.000000e+00 : f32
        %46 = vector.broadcast %cst_28 : f32 to vector<128x128xf32>
        %47 = arith.addf %46, %45 : vector<128x128xf32>
        %48 = arith.divf %46, %47 : vector<128x128xf32>
        %49 = vector.extract_strided_slice %42 {offsets = [0, 128], sizes = [128, 128], strides = [1, 1]} : vector<128x512xf32> to vector<128x128xf32>
        %50 = arith.negf %49 : vector<128x128xf32>
        %51 = math.exp %50 : vector<128x128xf32>
        %cst_29 = arith.constant 1.000000e+00 : f32
        %52 = vector.broadcast %cst_29 : f32 to vector<128x128xf32>
        %53 = arith.addf %52, %51 : vector<128x128xf32>
        %54 = arith.divf %52, %53 : vector<128x128xf32>
        %55 = vector.extract_strided_slice %42 {offsets = [0, 256], sizes = [128, 128], strides = [1, 1]} : vector<128x512xf32> to vector<128x128xf32>
        %56 = math.tanh %55 : vector<128x128xf32>
        %57 = vector.extract_strided_slice %42 {offsets = [0, 384], sizes = [128, 128], strides = [1, 1]} : vector<128x512xf32> to vector<128x128xf32>
        %58 = arith.negf %57 : vector<128x128xf32>
        %59 = math.exp %58 : vector<128x128xf32>
        %cst_30 = arith.constant 1.000000e+00 : f32
        %60 = vector.broadcast %cst_30 : f32 to vector<128x128xf32>
        %61 = arith.addf %60, %59 : vector<128x128xf32>
        %62 = arith.divf %60, %61 : vector<128x128xf32>
        %c0_31 = arith.constant 0 : index
        %c0_32 = arith.constant 0 : index
        %63 = vector.load %arg13[%c0_31, %c0_32] : memref<128x128xf32, #tpu.memory_space<vmem>>, vector<128x128xf32>
        %64 = arith.mulf %54, %63 : vector<128x128xf32>
        %65 = arith.mulf %48, %56 : vector<128x128xf32>
        %66 = arith.addf %64, %65 : vector<128x128xf32>
        %67 = math.tanh %66 : vector<128x128xf32>
        %68 = arith.mulf %62, %67 : vector<128x128xf32>
        %c0_33 = arith.constant 0 : index
        %c0_34 = arith.constant 0 : index
        %69 = vector.load %arg12[%c0_33, %c0_34] : memref<128x128xf32, #tpu.memory_space<vmem>>, vector<128x128xf32>
        %70 = vector.shape_cast %33 : vector<128x1xi1> to vector<128x1xi1>
        %71 = vector.broadcast %70 : vector<128x1xi1> to vector<128x128xi1>
        %72 = arith.select %71, %68, %69 : vector<128x128xi1>, vector<128x128xf32>
        %c0_35 = arith.constant 0 : index
        %c0_36 = arith.constant 0 : index
        %73 = vector.load %arg12[%c0_35, %c0_36] : memref<128x128xf32, #tpu.memory_space<vmem>>, vector<128x128xf32>
        tpu.vector_store %arg12[%c0_35, %c0_36], %72 {strides = array<i32>} : memref<128x128xf32, #tpu.memory_space<vmem>>, vector<128x128xf32>,
        %c0_37 = arith.constant 0 : index
        %c0_38 = arith.constant 0 : index
        %74 = vector.load %arg13[%c0_37, %c0_38] : memref<128x128xf32, #tpu.memory_space<vmem>>, vector<128x128xf32>
        %75 = vector.shape_cast %33 : vector<128x1xi1> to vector<128x1xi1>
        %76 = vector.broadcast %75 : vector<128x1xi1> to vector<128x128xi1>
        %77 = arith.select %76, %66, %74 : vector<128x128xi1>, vector<128x128xf32>
        %c0_39 = arith.constant 0 : index
        %c0_40 = arith.constant 0 : index
        %78 = vector.load %arg13[%c0_39, %c0_40] : memref<128x128xf32, #tpu.memory_space<vmem>>, vector<128x128xf32>
        tpu.vector_store %arg13[%c0_39, %c0_40], %77 {strides = array<i32>} : memref<128x128xf32, #tpu.memory_space<vmem>>, vector<128x128xf32>,
      }
    } else {
    }
    %c0_i32_2 = arith.constant 0 : i32
    %9 = arith.cmpi eq, %arg1, %c0_i32_2 : i32
    %10 = arith.extui %9 : i1 to i32
    %c0_i32_3 = arith.constant 0 : i32
    %11 = arith.cmpi ne, %10, %c0_i32_3 : i32
    scf.if %11 {
      %c0 = arith.constant 0 : index
      %c0_4 = arith.constant 0 : index
      %12 = vector.load %arg12[%c0, %c0_4] : memref<128x128xf32, #tpu.memory_space<vmem>>, vector<128x128xf32>
      %c0_5 = arith.constant 0 : index
      %c0_6 = arith.constant 0 : index
      %13 = vector.load %arg8[%c0_5, %c0_6] : memref<128x128xf32, #tpu.memory_space<vmem>>, vector<128x128xf32>
      %cst = arith.constant dense<0.000000e+00> : vector<128x128xf32>
      %14 = tpu.matmul %12, %13, %cst {dimension_numbers = #tpu.dot_dimension_numbers<[1], [0], [0], [1], [0, 0, 1, 1], [], []>} : vector<128x128xf32>, vector<128x128xf32>, vector<128x128xf32> -> vector<128x128xf32>
      %c0_7 = arith.constant 0 : index
      %c0_8 = arith.constant 0 : index
      %15 = vector.load %arg9[%c0_7, %c0_8] : memref<1x128xf32, #tpu.memory_space<vmem>>, vector<1x128xf32>
      %16 = vector.broadcast %15 : vector<1x128xf32> to vector<128x128xf32>
      %17 = arith.addf %14, %16 : vector<128x128xf32>
      %c0_9 = arith.constant 0 : index
      %c0_10 = arith.constant 0 : index
      %18 = vector.load %arg10[%c0_9, %c0_10] : memref<128x128xf32, #tpu.memory_space<vmem>>, vector<128x128xf32>
      tpu.vector_store %arg10[%c0_9, %c0_10], %17 {strides = array<i32>} : memref<128x128xf32, #tpu.memory_space<vmem>>, vector<128x128xf32>,
    } else {
    }
    return
  }
  func.func @transform_0(%arg0: i32, %arg1: i32, %arg2: memref<1xi32, #tpu.memory_space<smem>>) -> (i32, i32) {
    %c0_i32 = arith.constant 0 : i32
    %c0_i32_0 = arith.constant 0 : i32
    return %arg0, %c0_i32 : i32, i32
  }
  func.func @transform_1(%arg0: i32, %arg1: i32, %arg2: memref<1xi32, #tpu.memory_space<smem>>) -> (i32, i32, i32) {
    %c0_i32 = arith.constant 0 : i32
    %c0_i32_0 = arith.constant 0 : i32
    return %arg0, %arg1, %c0_i32 : i32, i32, i32
  }
  func.func @transform_2(%arg0: i32, %arg1: i32, %arg2: memref<1xi32, #tpu.memory_space<smem>>) -> (i32, i32) {
    %c0_i32 = arith.constant 0 : i32
    %c0_i32_0 = arith.constant 0 : i32
    %c0_i32_1 = arith.constant 0 : i32
    return %c0_i32, %c0_i32_0 : i32, i32
  }
  func.func @transform_3(%arg0: i32, %arg1: i32, %arg2: memref<1xi32, #tpu.memory_space<smem>>) -> (i32, i32) {
    %c0_i32 = arith.constant 0 : i32
    %c0_i32_0 = arith.constant 0 : i32
    %c0_i32_1 = arith.constant 0 : i32
    return %c0_i32, %c0_i32_0 : i32, i32
  }
  func.func @transform_4(%arg0: i32, %arg1: i32, %arg2: memref<1xi32, #tpu.memory_space<smem>>) -> (i32, i32) {
    %c0_i32 = arith.constant 0 : i32
    %c0_i32_0 = arith.constant 0 : i32
    %c0_i32_1 = arith.constant 0 : i32
    return %c0_i32, %c0_i32_0 : i32, i32
  }
  func.func @transform_5(%arg0: i32, %arg1: i32, %arg2: memref<1xi32, #tpu.memory_space<smem>>) -> (i32, i32) {
    %c0_i32 = arith.constant 0 : i32
    %c0_i32_0 = arith.constant 0 : i32
    %c0_i32_1 = arith.constant 0 : i32
    return %c0_i32, %c0_i32_0 : i32, i32
  }
  func.func @transform_6(%arg0: i32, %arg1: i32, %arg2: memref<1xi32, #tpu.memory_space<smem>>) -> (i32, i32) {
    %c0_i32 = arith.constant 0 : i32
    %c0_i32_0 = arith.constant 0 : i32
    %c0_i32_1 = arith.constant 0 : i32
    return %c0_i32, %c0_i32_0 : i32, i32
  }
  func.func @transform_7(%arg0: i32, %arg1: i32, %arg2: memref<1xi32, #tpu.memory_space<smem>>) -> (i32, i32) {
    %c0_i32 = arith.constant 0 : i32
    %c0_i32_0 = arith.constant 0 : i32
    return %arg0, %c0_i32 : i32, i32
  }
}

</mosaic_0001>

<bundles_post_ra>
// kernel: tpu_custom_call.1
= control target key start
LH: loop header
LB: loop body
LE: loop exit
PB: predicated region body
PF: predicated region fallthrough
CT: control target
= control target key end

     0   :  { %14 = vsyncpa [#allocation8], 0  ;;  %s6314_s0 = inlined_call_operand.<no memory space> [shape: s32[1], index: 0, kind: input, shape index: {}]   ;;  %s6315_s1 = inlined_call_operand.vmem [shape: s32[128,1], index: 1, kind: input, shape index: {}]   ;;  %s6316_s2 = inlined_call_operand.hbm [shape: bf16[1,1024,128], index: 2, kind: input, shape index: {}]   ;;  %s6317_s3 = inlined_call_operand.hbm [shape: bf16[128,512], index: 3, kind: input, shape index: {}]   ;;  %s6318_s4 = inlined_call_operand.hbm [shape: bf16[128,512], index: 4, kind: input, shape index: {}]   ;;  %s6319_s5 = inlined_call_operand.vmem [shape: f32[1,512], index: 5, kind: input, shape index: {}]   ;;  %s6320_s6 = inlined_call_operand.vmem [shape: f32[128,128], index: 6, kind: input, shape index: {}]   ;;  %s6321_s7 = inlined_call_operand.vmem [shape: f32[1,128], index: 7, kind: input, shape index: {}]   ;;  %s6322_s8 = inlined_call_operand.hbm [shape: f32[128,128], index: 8, kind: output, shape index: {}]  }
   0x1   :  { %15 = vsyncpa [#allocation11], 0 }
   0x2   :  { %16 = vsyncpa [#allocation9], 0  ;;  %s4983_s27 = smov [#allocation10]   ;;  %s4881_s9 = scalar_lea.hbm %s6317_s3, 4096 }
   0x3   :  { %s36_s28 = sshll.u32 %s4983_s27, 4  ;;  %p4882_p0 = scmp.ne.s32.totalorder %s6317_s3, %s4881_s9  ;;  %s37_s28 = int_to_ptr.vmem [resolvable:$true] %s36_s28 }
   0x4   :  { %p4885_p1 = scmp.lt.u32.totalorder %s4881_s9, %s6317_s3 }
   0x6   :  { %p4887_p2 = pnand %p4885_p1, %p4882_p0 }
   0x8   :  { %4890 = shalt.err (!%p4887_p2)
}
   0x9   :  { %s4891_s14 = scalar_lea.vmem %s37_s28, 4096  ;;  %p4896_p4 = scmp.lt.s32.totalorder %s37_s28, %s37_s28 }
   0xa   :  { %p4892_p3 = scmp.ne.s32.totalorder %s37_s28, %s4891_s14  ;;  %p4897_p5 = scmp.lt.s32.totalorder %s4891_s14, %s4891_s14 }
   0xc   :  { %p4898_p6 = por %p4897_p5, %p4896_p4 }
   0xe   :  { %p4899_p7 = pnand %p4898_p6, %p4892_p3 }
  0x10   :  { %4902 = shalt.err (!%p4899_p7)
}
  0x11   :  { %s4984_s15 = smov 256   ;;  %s4985_s16 = smov 16  }
  0x12   :  { %42 = dma.hbm_to_vmem [thread:$0]  %s6317_s3, 4096, %s37_s28, [#allocation11], %s4984_s15, %s4984_s15, %s4985_s16  }
  0x13   :  { %s4986_s19 = smov [#allocation7]   ;;  %s4903_s23 = scalar_lea.hbm %s6316_s2, 8192 }
  0x14   :  { %s24_s20 = sshll.u32 %s4986_s19, 4  ;;  %p4904_p8 = scmp.ne.s32.totalorder %s6316_s2, %s4903_s23  ;;  %s25_s20 = int_to_ptr.vmem [resolvable:$true] %s24_s20 }
  0x15   :  { %p4907_p9 = scmp.lt.u32.totalorder %s4903_s23, %s6316_s2 }
  0x17   :  { %p4909_p10 = pnand %p4907_p9, %p4904_p8 }
  0x19   :  { %4912 = shalt.err (!%p4909_p10)
}
  0x1a   :  { %s4913_s29 = scalar_lea.vmem %s25_s20, 8192  ;;  %p4918_p12 = scmp.lt.s32.totalorder %s25_s20, %s25_s20 }
  0x1b   :  { %p4914_p11 = scmp.ne.s32.totalorder %s25_s20, %s4913_s29  ;;  %p4919_p13 = scmp.lt.s32.totalorder %s4913_s29, %s4913_s29 }
  0x1d   :  { %p4920_p0 = por %p4919_p13, %p4918_p12 }
  0x1f   :  { %p4921_p1 = pnand %p4920_p0, %p4914_p11 }
  0x21   :  { %4924 = shalt.err (!%p4921_p1)
}
  0x22   :  { %s4987_s3 = smov 64   ;;  %s4988_s28 = smov 4  }
  0x23   :  { %30 = dma.hbm_to_vmem [thread:$0]  %s6316_s2, 8192, %s25_s20, [#allocation8], %s4987_s3, %s4987_s3, %s4988_s28  }
  0x24   :  { %s4989_s10 = smov [#allocation12]   ;;  %s4925_s14 = scalar_lea.hbm %s6318_s4, 4096 }
  0x25   :  { %s48_s11 = sshll.u32 %s4989_s10, 4  ;;  %p4926_p2 = scmp.ne.s32.totalorder %s6318_s4, %s4925_s14  ;;  %s49_s11 = int_to_ptr.vmem [resolvable:$true] %s48_s11 }
  0x26   :  { %p4929_p3 = scmp.lt.u32.totalorder %s4925_s14, %s6318_s4 }
  0x28   :  { %p4931_p4 = pnand %p4929_p3, %p4926_p2 }
  0x2a   :  { %4934 = shalt.err (!%p4931_p4)
}
  0x2b   :  { %s4935_s22 = scalar_lea.vmem %s49_s11, 4096  ;;  %p4940_p6 = scmp.lt.s32.totalorder %s49_s11, %s49_s11 }
  0x2c   :  { %p4936_p5 = scmp.ne.s32.totalorder %s49_s11, %s4935_s22  ;;  %p4941_p7 = scmp.lt.s32.totalorder %s4935_s22, %s4935_s22 }
  0x2e   :  { %p4942_p8 = por %p4941_p7, %p4940_p6 }
  0x30   :  { %p4943_p9 = pnand %p4942_p8, %p4936_p5 }
  0x32   :  { %4946 = shalt.err (!%p4943_p9)
}
  0x33   :  { %54 = dma.hbm_to_vmem [thread:$0]  %s6318_s4, 4096, %s49_s11, [#allocation11], %s4984_s15, %s4984_s15, %s4985_s16  }
  0x34   :  { %4973 = dma.done.wait [#allocation8], 8192  }
  0x35   :  { %4974 = vsyncadd [#allocation8], 4294959104 }
  0x36   :  { %4975 = dma.done.wait [#allocation11], 8192  }
  0x37   :  { %4976 = vsyncadd [#allocation11], 4294959104  ;;  %v4990_v0 = vmov 0.0   ;;  %p4105_p10 = scmp.le.s32.totalorder %s6314_s0, 0 }
  0x38   :  { %75 = vst [vmem:[#allocation3] sm:$0xff] %v4990_v0  ;;  %76 = vst [vmem:[#allocation3 + $0x8] sm:$0xff] %v4990_v0  ;;  %v4448_v1 = vld [vmem:[#allocation10 + $0x4] ss:$16 sps:$4 sm:$0xff] (!%p4105_p10)   ;;  %v4450_v2 = vld [vmem:[#allocation10 + $0xc] ss:$16 sps:$4 sm:$0xff] (!%p4105_p10)   ;;  %v275_v60 = vlaneseq (!%p4105_p10) }
  0x39   :  { %77 = vst [vmem:[#allocation3 + $0x10] sm:$0xff] %v4990_v0  ;;  %78 = vst [vmem:[#allocation3 + $0x18] sm:$0xff] %v4990_v0  ;;  %v4991_v3 = vmov (!%p4105_p10), 0   ;;  %839 = vmatprep.subr.bf16.mxu0 (!%p4105_p10), %v4448_v1  ;;  %v4452_v4 = vld [vmem:[#allocation10] ss:$16 sps:$4 sm:$0xff] (!%p4105_p10)   ;;  %1512 = vmatprep.subr.bf16.mxu1 (!%p4105_p10), %v4450_v2  ;;  %v4497_v35 = vld [vmem:[#allocation7 + $0x8] sm:$0xff] (!%p4105_p10)  }
  0x3a   :  { %79 = vst [vmem:[#allocation3 + $0x20] sm:$0xff] %v4990_v0  ;;  %80 = vst [vmem:[#allocation3 + $0x28] sm:$0xff] %v4990_v0  ;;  %871 = vmatprep.mubr.bf16.mxu0 (!%p4105_p10), %v4991_v3  ;;  %1544 = vmatprep.mubr.bf16.mxu1 (!%p4105_p10), %v4991_v3  ;;  %v4453_v5 = vld [vmem:[#allocation10 + $0x8] ss:$16 sps:$4 sm:$0xff] (!%p4105_p10)   ;;  %v4454_v6 = vld [vmem:[#allocation10 + $0x24] ss:$16 sps:$4 sm:$0xff] (!%p4105_p10)  }
  0x3b   :  { %81 = vst [vmem:[#allocation3 + $0x30] sm:$0xff] %v4990_v0  ;;  %82 = vst [vmem:[#allocation3 + $0x38] sm:$0xff] %v4990_v0  ;;  %840 = vmatpush1.bf16.msra.mxu0 (!%p4105_p10), %v4452_v4  ;;  %1513 = vmatpush1.bf16.msra.mxu1 (!%p4105_p10), %v4453_v5  ;;  %v4456_v7 = vld [vmem:[#allocation10 + $0x2c] ss:$16 sps:$4 sm:$0xff] (!%p4105_p10)   ;;  %v4458_v8 = vld [vmem:[#allocation10 + $0x20] ss:$16 sps:$4 sm:$0xff] (!%p4105_p10)  }
  0x3c   :  { %83 = vst [vmem:[#allocation3 + $0x40] sm:$0xff] %v4990_v0  ;;  %84 = vst [vmem:[#allocation3 + $0x48] sm:$0xff] %v4990_v0  ;;  %841 = vmatprep.subr.bf16.mxu0 (!%p4105_p10), %v4454_v6  ;;  %v4459_v9 = vld [vmem:[#allocation10 + $0x28] ss:$16 sps:$4 sm:$0xff] (!%p4105_p10)   ;;  %1514 = vmatprep.subr.bf16.mxu1 (!%p4105_p10), %v4456_v7  ;;  %v4460_v10 = vld [vmem:[#allocation10 + $0x44] ss:$16 sps:$4 sm:$0xff] (!%p4105_p10)  }
  0x3d   :  { %85 = vst [vmem:[#allocation3 + $0x50] sm:$0xff] %v4990_v0  ;;  %86 = vst [vmem:[#allocation3 + $0x58] sm:$0xff] %v4990_v0  ;;  %v4462_v11 = vld [vmem:[#allocation10 + $0x4c] ss:$16 sps:$4 sm:$0xff] (!%p4105_p10)   ;;  %v4464_v12 = vld [vmem:[#allocation10 + $0x40] ss:$16 sps:$4 sm:$0xff] (!%p4105_p10)  }
  0x3e   :  { %87 = vst [vmem:[#allocation3 + $0x60] sm:$0xff] %v4990_v0  ;;  %88 = vst [vmem:[#allocation3 + $0x68] sm:$0xff] %v4990_v0  ;;  %v4465_v13 = vld [vmem:[#allocation10 + $0x48] ss:$16 sps:$4 sm:$0xff] (!%p4105_p10)   ;;  %v4466_v14 = vld [vmem:[#allocation10 + $0x64] ss:$16 sps:$4 sm:$0xff] (!%p4105_p10)  }
  0x3f   :  { %89 = vst [vmem:[#allocation3 + $0x70] sm:$0xff] %v4990_v0  ;;  %90 = vst [vmem:[#allocation3 + $0x78] sm:$0xff] %v4990_v0  ;;  %842 = vmatpush1.bf16.msra.mxu0 (!%p4105_p10), %v4458_v8  ;;  %1515 = vmatpush1.bf16.msra.mxu1 (!%p4105_p10), %v4459_v9  ;;  %v4468_v15 = vld [vmem:[#allocation10 + $0x6c] ss:$16 sps:$4 sm:$0xff] (!%p4105_p10)   ;;  %v4470_v16 = vld [vmem:[#allocation10 + $0x60] ss:$16 sps:$4 sm:$0xff] (!%p4105_p10)  }
  0x40   :  { %91 = vst [vmem:[#allocation4] sm:$0xff] %v4990_v0  ;;  %92 = vst [vmem:[#allocation4 + $0x8] sm:$0xff] %v4990_v0  ;;  %843 = vmatprep.subr.bf16.mxu0 (!%p4105_p10), %v4460_v10  ;;  %1516 = vmatprep.subr.bf16.mxu1 (!%p4105_p10), %v4462_v11  ;;  %v4471_v17 = vld [vmem:[#allocation10 + $0x68] ss:$16 sps:$4 sm:$0xff] (!%p4105_p10)   ;;  %v4472_v18 = vld [vmem:[#allocation10 + $0x84] ss:$16 sps:$4 sm:$0xff] (!%p4105_p10)  }
  0x41   :  { %93 = vst [vmem:[#allocation4 + $0x10] sm:$0xff] %v4990_v0  ;;  %94 = vst [vmem:[#allocation4 + $0x18] sm:$0xff] %v4990_v0  ;;  %112 = sbr.rel (%p4105_p10) target bundleno = 1214 (0x4be), region = 49  ;;  %v4474_v19 = vld [vmem:[#allocation10 + $0x8c] ss:$16 sps:$4 sm:$0xff] (!%p4105_p10)   ;;  %v4496_v34 = vld [vmem:[#allocation7] sm:$0xff] (!%p4105_p10)  }
  0x42   :  { %95 = vst [vmem:[#allocation4 + $0x20] sm:$0xff] %v4990_v0  ;;  %96 = vst [vmem:[#allocation4 + $0x28] sm:$0xff] %v4990_v0  ;;  %v4476_v20 = vld [vmem:[#allocation10 + $0x80] ss:$16 sps:$4 sm:$0xff] (!%p4105_p10)   ;;  %v4477_v21 = vld [vmem:[#allocation10 + $0x88] ss:$16 sps:$4 sm:$0xff] (!%p4105_p10)  }
  0x43   :  { %97 = vst [vmem:[#allocation4 + $0x30] sm:$0xff] %v4990_v0  ;;  %98 = vst [vmem:[#allocation4 + $0x38] sm:$0xff] %v4990_v0  ;;  %844 = vmatpush1.bf16.msra.mxu0 (!%p4105_p10), %v4464_v12  ;;  %1517 = vmatpush1.bf16.msra.mxu1 (!%p4105_p10), %v4465_v13  ;;  %v4478_v22 = vld [vmem:[#allocation10 + $0xa4] ss:$16 sps:$4 sm:$0xff] (!%p4105_p10)   ;;  %v4480_v23 = vld [vmem:[#allocation10 + $0xac] ss:$16 sps:$4 sm:$0xff] (!%p4105_p10)  }
  0x44   :  { %99 = vst [vmem:[#allocation4 + $0x40] sm:$0xff] %v4990_v0  ;;  %100 = vst [vmem:[#allocation4 + $0x48] sm:$0xff] %v4990_v0  ;;  %845 = vmatprep.subr.bf16.mxu0 (!%p4105_p10), %v4466_v14  ;;  %1518 = vmatprep.subr.bf16.mxu1 (!%p4105_p10), %v4468_v15  ;;  %v4482_v24 = vld [vmem:[#allocation10 + $0xa0] ss:$16 sps:$4 sm:$0xff] (!%p4105_p10)   ;;  %v4483_v25 = vld [vmem:[#allocation10 + $0xa8] ss:$16 sps:$4 sm:$0xff] (!%p4105_p10)  }
  0x45   :  { %101 = vst [vmem:[#allocation4 + $0x50] sm:$0xff] %v4990_v0  ;;  %102 = vst [vmem:[#allocation4 + $0x58] sm:$0xff] %v4990_v0  ;;  %v4484_v26 = vld [vmem:[#allocation10 + $0xc4] ss:$16 sps:$4 sm:$0xff] (!%p4105_p10)   ;;  %v4486_v27 = vld [vmem:[#allocation10 + $0xcc] ss:$16 sps:$4 sm:$0xff] (!%p4105_p10)  }
  0x46   :  { %103 = vst [vmem:[#allocation4 + $0x60] sm:$0xff] %v4990_v0  ;;  %104 = vst [vmem:[#allocation4 + $0x68] sm:$0xff] %v4990_v0  ;;  %v4488_v28 = vld [vmem:[#allocation10 + $0xc0] ss:$16 sps:$4 sm:$0xff] (!%p4105_p10)   ;;  %v4489_v29 = vld [vmem:[#allocation10 + $0xc8] ss:$16 sps:$4 sm:$0xff] (!%p4105_p10)  }
  0x47   :  { %105 = vst [vmem:[#allocation4 + $0x70] sm:$0xff] %v4990_v0  ;;  %106 = vst [vmem:[#allocation4 + $0x78] sm:$0xff] %v4990_v0  ;;  %846 = vmatpush1.bf16.msra.mxu0 (!%p4105_p10), %v4470_v16  ;;  %1519 = vmatpush1.bf16.msra.mxu1 (!%p4105_p10), %v4471_v17  ;;  %v4490_v30 = vld [vmem:[#allocation10 + $0xe4] ss:$16 sps:$4 sm:$0xff] (!%p4105_p10)   ;;  %v4492_v31 = vld [vmem:[#allocation10 + $0xec] ss:$16 sps:$4 sm:$0xff] (!%p4105_p10)  }
  0x48   :  { %847 = vmatprep.subr.bf16.mxu0 %v4472_v18  ;;  %1520 = vmatprep.subr.bf16.mxu1 %v4474_v19  ;;  %v4494_v32 = vld [vmem:[#allocation10 + $0xe0] ss:$16 sps:$4 sm:$0xff]   ;;  %v4495_v33 = vld [vmem:[#allocation10 + $0xe8] ss:$16 sps:$4 sm:$0xff]   ;;  %v276_v61 = vshrl.u32 %v275_v60, 7  ;;  %p2698_p11 = scmp.lt.s32.totalorder %s6314_s0, 8 }
  0x49   :  { %v4498_v36 = vld [vmem:[#allocation7 + $0x10] sm:$0xff]   ;;  %v4499_v37 = vld [vmem:[#allocation7 + $0x18] sm:$0xff]   ;;  %v4500_v38 = vld [vmem:[#allocation7 + $0x20] sm:$0xff]   ;;  %s5753_s9 = smov (!%p4105_p10), 0  }
  0x4a   :  { %v4501_v39 = vld [vmem:[#allocation7 + $0x28] sm:$0xff]   ;;  %v4502_v40 = vld [vmem:[#allocation7 + $0x30] sm:$0xff]   ;;  %v4503_v41 = vld [vmem:[#allocation7 + $0x38] sm:$0xff]   ;;  %v277_v63 = vsub.s32 0, %v276_v61  ;;  %v285_v0 = vsub.s32 2, %v276_v61  ;;  %v281_v2 = vsub.s32 1, %v276_v61 }
  0x4b   :  { %848 = vmatpush1.bf16.msra.mxu0 %v4476_v20  ;;  %1521 = vmatpush1.bf16.msra.mxu1 %v4477_v21  ;;  %v4504_v42 = vld [vmem:[#allocation7 + $0x40] sm:$0xff]   ;;  %v4505_v43 = vld [vmem:[#allocation7 + $0x48] sm:$0xff]   ;;  %v4506_v44 = vld [vmem:[#allocation7 + $0x50] sm:$0xff]   ;;  %v289_v4 = vsub.s32 3, %v276_v61  ;;  %s5619_s3 = scalar_select %p2698_p11, %s6314_s0, 8 }
  0x4c   :  { %849 = vmatprep.subr.bf16.mxu0 %v4478_v22  ;;  %1522 = vmatprep.subr.bf16.mxu1 %v4480_v23  ;;  %v4507_v45 = vld [vmem:[#allocation7 + $0x58] sm:$0xff]   ;;  %v4508_v46 = vld [vmem:[#allocation7 + $0x60] sm:$0xff]   ;;  %v4509_v47 = vld [vmem:[#allocation7 + $0x68] sm:$0xff]  }
  0x4d   :  { %v4510_v48 = vld [vmem:[#allocation7 + $0x70] sm:$0xff]   ;;  %v4511_v49 = vld [vmem:[#allocation7 + $0x78] sm:$0xff]   ;;  %v4512_v50 = vld [vmem:[#allocation7 + $0x80] sm:$0xff]  }
  0x4e   :  { %v4513_v51 = vld [vmem:[#allocation7 + $0x88] sm:$0xff]   ;;  %v4514_v52 = vld [vmem:[#allocation7 + $0x90] sm:$0xff]   ;;  %v4515_v53 = vld [vmem:[#allocation7 + $0x98] sm:$0xff]  }
  0x4f   :  { %850 = vmatpush1.bf16.msra.mxu0 %v4482_v24  ;;  %1523 = vmatpush1.bf16.msra.mxu1 %v4483_v25  ;;  %v4516_v54 = vld [vmem:[#allocation7 + $0xa0] sm:$0xff]   ;;  %v4517_v55 = vld [vmem:[#allocation7 + $0xa8] sm:$0xff]   ;;  %v4518_v56 = vld [vmem:[#allocation7 + $0xb0] sm:$0xff]  }
  0x50   :  { %851 = vmatprep.subr.bf16.mxu0 %v4484_v26  ;;  %1524 = vmatprep.subr.bf16.mxu1 %v4486_v27  ;;  %v4519_v57 = vld [vmem:[#allocation7 + $0xb8] sm:$0xff]   ;;  %v4520_v58 = vld [vmem:[#allocation7 + $0xc0] sm:$0xff]   ;;  %v4521_v59 = vld [vmem:[#allocation7 + $0xc8] sm:$0xff]  }
  0x51   :  { %v4522_v62 = vld [vmem:[#allocation7 + $0xd0] sm:$0xff]   ;;  %v273_v1 = vld [vmem:[%s6319_s5] sm:$0xf]  ;;  %v4523_v15 = vld [vmem:[#allocation7 + $0xd8] sm:$0xff]  }
  0x52   :  { %v5147_v5 = vrot.slane %v273_v1, %v277_v63  ;;  %v5149_v6 = vrot.slane %v273_v1, %v285_v0  ;;  %v5151_v7 = vrot.slane %v273_v1, %v281_v2  ;;  %v5153_v8 = vrot.slane %v273_v1, %v289_v4  ;;  %v4526_v2 = vld [vmem:[#allocation7 + $0xf0] sm:$0xff]  }
  0x53   :  { %852 = vmatpush1.bf16.msra.mxu0 %v4488_v28  ;;  %1525 = vmatpush1.bf16.msra.mxu1 %v4489_v29 }
  0x54   :  { %853 = vmatprep.subr.bf16.mxu0 %v4490_v30  ;;  %1526 = vmatprep.subr.bf16.mxu1 %v4492_v31 }
  0x57   :  { %854 = vmatpush1.bf16.msra.mxu0 %v4494_v32  ;;  %1527 = vmatpush1.bf16.msra.mxu1 %v4495_v33  ;;  %v4524_v32 = vld [vmem:[#allocation7 + $0xe0] sm:$0xff]  }
  0x5a   :  { %872 = vmatmul.mubr.bf16.vlgmr.msra.gmra.mrb[0].mxu0 %v4496_v34  ;;  %1545 = vmatmul.mubr.bf16.vlgmr.msra.gmra.mrb[0].mxu1 %v4496_v34 }
  0x5b   :  { %881 = vmatprep.mubr.bf16.mxu0 %v4991_v3  ;;  %1554 = vmatprep.mubr.bf16.mxu1 %v4991_v3 }
  0x62   :  { %882 = vmatmul.mubr.bf16.gmra.mrb[4].mxu0 %v4497_v35  ;;  %1555 = vmatmul.mubr.bf16.gmra.mrb[4].mxu1 %v4497_v35 }
  0x63   :  { %891 = vmatprep.mubr.bf16.mxu0 %v4991_v3  ;;  %1564 = vmatprep.mubr.bf16.mxu1 %v4991_v3 }
  0x6a   :  { %892 = vmatmul.mubr.bf16.gmra.mrb[8].mxu0 %v4498_v36  ;;  %1565 = vmatmul.mubr.bf16.gmra.mrb[8].mxu1 %v4498_v36 }
  0x6b   :  { %901 = vmatprep.mubr.bf16.mxu0 %v4991_v3  ;;  %1574 = vmatprep.mubr.bf16.mxu1 %v4991_v3 }
  0x72   :  { %902 = vmatmul.mubr.bf16.gmra.mrb[12].mxu0 %v4499_v37  ;;  %1575 = vmatmul.mubr.bf16.gmra.mrb[12].mxu1 %v4499_v37 }
  0x73   :  { %911 = vmatprep.mubr.bf16.mxu0 %v4991_v3  ;;  %1584 = vmatprep.mubr.bf16.mxu1 %v4991_v3 }
  0x7a   :  { %912 = vmatmul.mubr.bf16.gmra.mrb[16].mxu0 %v4500_v38  ;;  %1585 = vmatmul.mubr.bf16.gmra.mrb[16].mxu1 %v4500_v38 }
  0x7b   :  { %921 = vmatprep.mubr.bf16.mxu0 %v4991_v3  ;;  %1594 = vmatprep.mubr.bf16.mxu1 %v4991_v3 }
  0x82   :  { %922 = vmatmul.mubr.bf16.gmra.mrb[20].mxu0 %v4501_v39  ;;  %1595 = vmatmul.mubr.bf16.gmra.mrb[20].mxu1 %v4501_v39 }
  0x83   :  { %931 = vmatprep.mubr.bf16.mxu0 %v4991_v3  ;;  %1604 = vmatprep.mubr.bf16.mxu1 %v4991_v3 }
  0x8a   :  { %932 = vmatmul.mubr.bf16.gmra.mrb[24].mxu0 %v4502_v40  ;;  %1605 = vmatmul.mubr.bf16.gmra.mrb[24].mxu1 %v4502_v40 }
  0x8b   :  { %941 = vmatprep.mubr.bf16.mxu0 %v4991_v3  ;;  %1614 = vmatprep.mubr.bf16.mxu1 %v4991_v3 }
  0x92   :  { %942 = vmatmul.mubr.bf16.gmra.mrb[28].mxu0 %v4503_v41  ;;  %1615 = vmatmul.mubr.bf16.gmra.mrb[28].mxu1 %v4503_v41 }
  0x93   :  { %951 = vmatprep.mubr.bf16.mxu0 %v4991_v3  ;;  %1624 = vmatprep.mubr.bf16.mxu1 %v4991_v3 }
  0x9a   :  { %952 = vmatmul.mubr.bf16.gmra.mrb[32].mxu0 %v4504_v42  ;;  %1625 = vmatmul.mubr.bf16.gmra.mrb[32].mxu1 %v4504_v42 }
  0x9b   :  { %961 = vmatprep.mubr.bf16.mxu0 %v4991_v3  ;;  %1634 = vmatprep.mubr.bf16.mxu1 %v4991_v3 }
  0xa2   :  { %962 = vmatmul.mubr.bf16.gmra.mrb[36].mxu0 %v4505_v43  ;;  %1635 = vmatmul.mubr.bf16.gmra.mrb[36].mxu1 %v4505_v43 }
  0xa3   :  { %971 = vmatprep.mubr.bf16.mxu0 %v4991_v3  ;;  %1644 = vmatprep.mubr.bf16.mxu1 %v4991_v3 }
  0xaa   :  { %972 = vmatmul.mubr.bf16.gmra.mrb[40].mxu0 %v4506_v44  ;;  %1645 = vmatmul.mubr.bf16.gmra.mrb[40].mxu1 %v4506_v44 }
  0xab   :  { %981 = vmatprep.mubr.bf16.mxu0 %v4991_v3  ;;  %1654 = vmatprep.mubr.bf16.mxu1 %v4991_v3 }
  0xb2   :  { %982 = vmatmul.mubr.bf16.gmra.mrb[44].mxu0 %v4507_v45  ;;  %1655 = vmatmul.mubr.bf16.gmra.mrb[44].mxu1 %v4507_v45 }
  0xb3   :  { %991 = vmatprep.mubr.bf16.mxu0 %v4991_v3  ;;  %1664 = vmatprep.mubr.bf16.mxu1 %v4991_v3 }
  0xba   :  { %992 = vmatmul.mubr.bf16.gmra.mrb[48].mxu0 %v4508_v46  ;;  %1665 = vmatmul.mubr.bf16.gmra.mrb[48].mxu1 %v4508_v46 }
  0xbb   :  { %1001 = vmatprep.mubr.bf16.mxu0 %v4991_v3  ;;  %1674 = vmatprep.mubr.bf16.mxu1 %v4991_v3 }
  0xc2   :  { %1002 = vmatmul.mubr.bf16.gmra.mrb[52].mxu0 %v4509_v47  ;;  %1675 = vmatmul.mubr.bf16.gmra.mrb[52].mxu1 %v4509_v47 }
  0xc3   :  { %1011 = vmatprep.mubr.bf16.mxu0 %v4991_v3  ;;  %1684 = vmatprep.mubr.bf16.mxu1 %v4991_v3 }
  0xca   :  { %1012 = vmatmul.mubr.bf16.gmra.mrb[56].mxu0 %v4510_v48  ;;  %1685 = vmatmul.mubr.bf16.gmra.mrb[56].mxu1 %v4510_v48 }
  0xcb   :  { %1021 = vmatprep.mubr.bf16.mxu0 %v4991_v3  ;;  %1694 = vmatprep.mubr.bf16.mxu1 %v4991_v3 }
  0xd2   :  { %1022 = vmatmul.mubr.bf16.gmra.mrb[60].mxu0 %v4511_v49  ;;  %1695 = vmatmul.mubr.bf16.gmra.mrb[60].mxu1 %v4511_v49  ;;  %v4525_v49 = vld [vmem:[#allocation7 + $0xe8] sm:$0xff]  }
  0xd3   :  { %1031 = vmatprep.mubr.bf16.mxu0 %v4991_v3  ;;  %1704 = vmatprep.mubr.bf16.mxu1 %v4991_v3 }
  0xda   :  { %1032 = vmatmul.mubr.bf16.gmra.mrb[64].mxu0 %v4512_v50  ;;  %1705 = vmatmul.mubr.bf16.gmra.mrb[64].mxu1 %v4512_v50 }
  0xdb   :  { %1041 = vmatprep.mubr.bf16.mxu0 %v4991_v3  ;;  %1714 = vmatprep.mubr.bf16.mxu1 %v4991_v3 }
  0xe2   :  { %1042 = vmatmul.mubr.bf16.gmra.mrb[68].mxu0 %v4513_v51  ;;  %1715 = vmatmul.mubr.bf16.gmra.mrb[68].mxu1 %v4513_v51 }
  0xe3   :  { %1051 = vmatprep.mubr.bf16.mxu0 %v4991_v3  ;;  %1724 = vmatprep.mubr.bf16.mxu1 %v4991_v3 }
  0xea   :  { %1052 = vmatmul.mubr.bf16.gmra.mrb[72].mxu0 %v4514_v52  ;;  %1725 = vmatmul.mubr.bf16.gmra.mrb[72].mxu1 %v4514_v52 }
  0xeb   :  { %1061 = vmatprep.mubr.bf16.mxu0 %v4991_v3  ;;  %1734 = vmatprep.mubr.bf16.mxu1 %v4991_v3 }
  0xf2   :  { %1062 = vmatmul.mubr.bf16.gmra.mrb[76].mxu0 %v4515_v53  ;;  %1735 = vmatmul.mubr.bf16.gmra.mrb[76].mxu1 %v4515_v53 }
  0xf3   :  { %1071 = vmatprep.mubr.bf16.mxu0 %v4991_v3  ;;  %1744 = vmatprep.mubr.bf16.mxu1 %v4991_v3 }
  0xfa   :  { %1072 = vmatmul.mubr.bf16.gmra.mrb[80].mxu0 %v4516_v54  ;;  %1745 = vmatmul.mubr.bf16.gmra.mrb[80].mxu1 %v4516_v54 }
  0xfb   :  { %1081 = vmatprep.mubr.bf16.mxu0 %v4991_v3  ;;  %1754 = vmatprep.mubr.bf16.mxu1 %v4991_v3 }
 0x102   :  { %1082 = vmatmul.mubr.bf16.gmra.mrb[84].mxu0 %v4517_v55  ;;  %1755 = vmatmul.mubr.bf16.gmra.mrb[84].mxu1 %v4517_v55 }
 0x103   :  { %1091 = vmatprep.mubr.bf16.mxu0 %v4991_v3  ;;  %1764 = vmatprep.mubr.bf16.mxu1 %v4991_v3 }
 0x10a   :  { %1092 = vmatmul.mubr.bf16.gmra.mrb[88].mxu0 %v4518_v56  ;;  %1765 = vmatmul.mubr.bf16.gmra.mrb[88].mxu1 %v4518_v56 }
 0x10b   :  { %1101 = vmatprep.mubr.bf16.mxu0 %v4991_v3  ;;  %1774 = vmatprep.mubr.bf16.mxu1 %v4991_v3 }
 0x112   :  { %1102 = vmatmul.mubr.bf16.gmra.mrb[92].mxu0 %v4519_v57  ;;  %1775 = vmatmul.mubr.bf16.gmra.mrb[92].mxu1 %v4519_v57 }
 0x113   :  { %1111 = vmatprep.mubr.bf16.mxu0 %v4991_v3  ;;  %1784 = vmatprep.mubr.bf16.mxu1 %v4991_v3 }
 0x11a   :  { %1112 = vmatmul.mubr.bf16.gmra.mrb[96].mxu0 %v4520_v58  ;;  %1785 = vmatmul.mubr.bf16.gmra.mrb[96].mxu1 %v4520_v58 }
 0x11b   :  { %1121 = vmatprep.mubr.bf16.mxu0 %v4991_v3  ;;  %1794 = vmatprep.mubr.bf16.mxu1 %v4991_v3 }
 0x122   :  { %1122 = vmatmul.mubr.bf16.gmra.mrb[100].mxu0 %v4521_v59  ;;  %1795 = vmatmul.mubr.bf16.gmra.mrb[100].mxu1 %v4521_v59 }
 0x123   :  { %1131 = vmatprep.mubr.bf16.mxu0 %v4991_v3  ;;  %1804 = vmatprep.mubr.bf16.mxu1 %v4991_v3 }
 0x12a   :  { %1132 = vmatmul.mubr.bf16.gmra.mrb[104].mxu0 %v4522_v62  ;;  %1805 = vmatmul.mubr.bf16.gmra.mrb[104].mxu1 %v4522_v62 }
 0x12b   :  { %1141 = vmatprep.mubr.bf16.mxu0 %v4991_v3  ;;  %1814 = vmatprep.mubr.bf16.mxu1 %v4991_v3 }
 0x12d   :  { %v873_v9 = vpop.f32.mrb[0].mxu0  ;;  %v1546_v10 = vpop.f32.mrb[0].mxu1 }
 0x12e   :  { %v874_v11 = vadd.f32 %v873_v9, %v5147_v5  ;;  %v1547_v12 = vadd.f32 %v1546_v10, %v5149_v6  ;;  %v875_v13 = vpop.f32.mrb[1].mxu0  ;;  %v1548_v14 = vpop.f32.mrb[1].mxu1 }
 0x12f   :  { %v876_v16 = vadd.f32 %v875_v13, %v5151_v7  ;;  %v1549_v17 = vadd.f32 %v1548_v14, %v5153_v8  ;;  %v877_v18 = vpop.f32.mrb[2].mxu0  ;;  %v1550_v19 = vpop.f32.mrb[2].mxu1 }
 0x130   :  { %2185 = vst [vmem:[#allocation2] sm:$0xff] %v874_v11  ;;  %2187 = vst [vmem:[#allocation2 + $0x10] sm:$0xff] %v1547_v12  ;;  %v878_v20 = vadd.f32 %v877_v18, %v5147_v5  ;;  %v1551_v21 = vadd.f32 %v1550_v19, %v5149_v6  ;;  %v879_v22 = vpop.f32.mrb[3].mxu0  ;;  %v1552_v23 = vpop.f32.mrb[3].mxu1 }
 0x131   :  { %2186 = vst [vmem:[#allocation2 + $0x8] sm:$0xff] %v876_v16  ;;  %2188 = vst [vmem:[#allocation2 + $0x18] sm:$0xff] %v1549_v17  ;;  %v880_v24 = vadd.f32 %v879_v22, %v5151_v7  ;;  %v1553_v25 = vadd.f32 %v1552_v23, %v5153_v8 }
 0x132   :  { %2189 = vst [vmem:[#allocation2 + $0x20] sm:$0xff] %v878_v20  ;;  %2191 = vst [vmem:[#allocation2 + $0x30] sm:$0xff] %v1551_v21  ;;  %1142 = vmatmul.mubr.bf16.gmra.mrb[108].mxu0 %v4523_v15  ;;  %1815 = vmatmul.mubr.bf16.gmra.mrb[108].mxu1 %v4523_v15 }
 0x133   :  { %2190 = vst [vmem:[#allocation2 + $0x28] sm:$0xff] %v880_v24  ;;  %2192 = vst [vmem:[#allocation2 + $0x38] sm:$0xff] %v1553_v25  ;;  %1151 = vmatprep.mubr.bf16.mxu0 %v4991_v3  ;;  %1824 = vmatprep.mubr.bf16.mxu1 %v4991_v3  ;;  %v4527_v24 = vld [vmem:[#allocation7 + $0xf8] sm:$0xff]  }
 0x135   :  { %v883_v26 = vpop.f32.mrb[4].mxu0  ;;  %v1556_v27 = vpop.f32.mrb[4].mxu1 }
 0x136   :  { %v884_v28 = vadd.f32 %v883_v26, %v5147_v5  ;;  %v1557_v29 = vadd.f32 %v1556_v27, %v5149_v6  ;;  %v885_v30 = vpop.f32.mrb[5].mxu0  ;;  %v1558_v31 = vpop.f32.mrb[5].mxu1 }
 0x137   :  { %v886_v33 = vadd.f32 %v885_v30, %v5151_v7  ;;  %v1559_v34 = vadd.f32 %v1558_v31, %v5153_v8  ;;  %v887_v35 = vpop.f32.mrb[6].mxu0  ;;  %v1560_v36 = vpop.f32.mrb[6].mxu1 }
 0x138   :  { %2193 = vst [vmem:[#allocation2 + $0x40] sm:$0xff] %v884_v28  ;;  %2195 = vst [vmem:[#allocation2 + $0x50] sm:$0xff] %v1557_v29  ;;  %v888_v37 = vadd.f32 %v887_v35, %v5147_v5  ;;  %v1561_v38 = vadd.f32 %v1560_v36, %v5149_v6  ;;  %v889_v39 = vpop.f32.mrb[7].mxu0  ;;  %v1562_v40 = vpop.f32.mrb[7].mxu1 }
 0x139   :  { %2194 = vst [vmem:[#allocation2 + $0x48] sm:$0xff] %v886_v33  ;;  %2196 = vst [vmem:[#allocation2 + $0x58] sm:$0xff] %v1559_v34  ;;  %v890_v41 = vadd.f32 %v889_v39, %v5151_v7  ;;  %v1563_v42 = vadd.f32 %v1562_v40, %v5153_v8 }
 0x13a   :  { %2197 = vst [vmem:[#allocation2 + $0x60] sm:$0xff] %v888_v37  ;;  %2199 = vst [vmem:[#allocation2 + $0x70] sm:$0xff] %v1561_v38  ;;  %1152 = vmatmul.mubr.bf16.gmra.mrb[112].mxu0 %v4524_v32  ;;  %1825 = vmatmul.mubr.bf16.gmra.mrb[112].mxu1 %v4524_v32 }
 0x13b   :  { %2198 = vst [vmem:[#allocation2 + $0x68] sm:$0xff] %v890_v41  ;;  %2200 = vst [vmem:[#allocation2 + $0x78] sm:$0xff] %v1563_v42  ;;  %1161 = vmatprep.mubr.bf16.mxu0 %v4991_v3  ;;  %1834 = vmatprep.mubr.bf16.mxu1 %v4991_v3  ;;  %v4528_v41 = vld [vmem:[#allocation7 + $0x100] sm:$0xff]  }
 0x13d   :  { %v893_v43 = vpop.f32.mrb[8].mxu0  ;;  %v1566_v44 = vpop.f32.mrb[8].mxu1 }
 0x13e   :  { %v894_v45 = vadd.f32 %v893_v43, %v5147_v5  ;;  %v1567_v46 = vadd.f32 %v1566_v44, %v5149_v6  ;;  %v895_v47 = vpop.f32.mrb[9].mxu0  ;;  %v1568_v48 = vpop.f32.mrb[9].mxu1 }
 0x13f   :  { %v896_v50 = vadd.f32 %v895_v47, %v5151_v7  ;;  %v1569_v51 = vadd.f32 %v1568_v48, %v5153_v8  ;;  %v897_v52 = vpop.f32.mrb[10].mxu0  ;;  %v1570_v53 = vpop.f32.mrb[10].mxu1 }
 0x140   :  { %2201 = vst [vmem:[#allocation2 + $0x80] sm:$0xff] %v894_v45  ;;  %2203 = vst [vmem:[#allocation2 + $0x90] sm:$0xff] %v1567_v46  ;;  %v898_v54 = vadd.f32 %v897_v52, %v5147_v5  ;;  %v1571_v55 = vadd.f32 %v1570_v53, %v5149_v6  ;;  %v899_v56 = vpop.f32.mrb[11].mxu0  ;;  %v1572_v57 = vpop.f32.mrb[11].mxu1 }
 0x141   :  { %2202 = vst [vmem:[#allocation2 + $0x88] sm:$0xff] %v896_v50  ;;  %2204 = vst [vmem:[#allocation2 + $0x98] sm:$0xff] %v1569_v51  ;;  %v900_v58 = vadd.f32 %v899_v56, %v5151_v7  ;;  %v1573_v59 = vadd.f32 %v1572_v57, %v5153_v8 }
 0x142   :  { %2205 = vst [vmem:[#allocation2 + $0xa0] sm:$0xff] %v898_v54  ;;  %2207 = vst [vmem:[#allocation2 + $0xb0] sm:$0xff] %v1571_v55  ;;  %1162 = vmatmul.mubr.bf16.gmra.mrb[116].mxu0 %v4525_v49  ;;  %1835 = vmatmul.mubr.bf16.gmra.mrb[116].mxu1 %v4525_v49 }
 0x143   :  { %2206 = vst [vmem:[#allocation2 + $0xa8] sm:$0xff] %v900_v58  ;;  %2208 = vst [vmem:[#allocation2 + $0xb8] sm:$0xff] %v1573_v59  ;;  %1171 = vmatprep.mubr.bf16.mxu0 %v4991_v3  ;;  %1844 = vmatprep.mubr.bf16.mxu1 %v4991_v3  ;;  %v4529_v58 = vld [vmem:[#allocation7 + $0x108] sm:$0xff]  }
 0x145   :  { %v903_v60 = vpop.f32.mrb[12].mxu0  ;;  %v1576_v61 = vpop.f32.mrb[12].mxu1 }
 0x146   :  { %v904_v62 = vadd.f32 %v903_v60, %v5147_v5  ;;  %v1577_v63 = vadd.f32 %v1576_v61, %v5149_v6  ;;  %v905_v0 = vpop.f32.mrb[13].mxu0  ;;  %v1578_v1 = vpop.f32.mrb[13].mxu1 }
 0x147   :  { %v906_v4 = vadd.f32 %v905_v0, %v5151_v7  ;;  %v1579_v9 = vadd.f32 %v1578_v1, %v5153_v8  ;;  %v907_v10 = vpop.f32.mrb[14].mxu0  ;;  %v1580_v11 = vpop.f32.mrb[14].mxu1 }
 0x148   :  { %2209 = vst [vmem:[#allocation2 + $0xc0] sm:$0xff] %v904_v62  ;;  %2211 = vst [vmem:[#allocation2 + $0xd0] sm:$0xff] %v1577_v63  ;;  %v908_v12 = vadd.f32 %v907_v10, %v5147_v5  ;;  %v1581_v13 = vadd.f32 %v1580_v11, %v5149_v6  ;;  %v909_v14 = vpop.f32.mrb[15].mxu0  ;;  %v1582_v15 = vpop.f32.mrb[15].mxu1 }
 0x149   :  { %2210 = vst [vmem:[#allocation2 + $0xc8] sm:$0xff] %v906_v4  ;;  %2212 = vst [vmem:[#allocation2 + $0xd8] sm:$0xff] %v1579_v9  ;;  %v910_v16 = vadd.f32 %v909_v14, %v5151_v7  ;;  %v1583_v17 = vadd.f32 %v1582_v15, %v5153_v8 }
 0x14a   :  { %2213 = vst [vmem:[#allocation2 + $0xe0] sm:$0xff] %v908_v12  ;;  %2215 = vst [vmem:[#allocation2 + $0xf0] sm:$0xff] %v1581_v13  ;;  %1172 = vmatmul.mubr.bf16.gmra.mrb[120].mxu0 %v4526_v2  ;;  %1845 = vmatmul.mubr.bf16.gmra.mrb[120].mxu1 %v4526_v2 }
 0x14b   :  { %2214 = vst [vmem:[#allocation2 + $0xe8] sm:$0xff] %v910_v16  ;;  %2216 = vst [vmem:[#allocation2 + $0xf8] sm:$0xff] %v1583_v17  ;;  %1181 = vmatprep.mubr.bf16.mxu0 %v4991_v3  ;;  %1854 = vmatprep.mubr.bf16.mxu1 %v4991_v3  ;;  %v4530_v16 = vld [vmem:[#allocation7 + $0x110] sm:$0xff]  }
 0x14d   :  { %v913_v18 = vpop.f32.mrb[16].mxu0  ;;  %v1586_v19 = vpop.f32.mrb[16].mxu1 }
 0x14e   :  { %v914_v20 = vadd.f32 %v913_v18, %v5147_v5  ;;  %v1587_v21 = vadd.f32 %v1586_v19, %v5149_v6  ;;  %v915_v22 = vpop.f32.mrb[17].mxu0  ;;  %v1588_v23 = vpop.f32.mrb[17].mxu1 }
 0x14f   :  { %v916_v25 = vadd.f32 %v915_v22, %v5151_v7  ;;  %v1589_v26 = vadd.f32 %v1588_v23, %v5153_v8  ;;  %v917_v27 = vpop.f32.mrb[18].mxu0  ;;  %v1590_v28 = vpop.f32.mrb[18].mxu1 }
 0x150   :  { %2217 = vst [vmem:[#allocation2 + $0x100] sm:$0xff] %v914_v20  ;;  %2219 = vst [vmem:[#allocation2 + $0x110] sm:$0xff] %v1587_v21  ;;  %v918_v29 = vadd.f32 %v917_v27, %v5147_v5  ;;  %v1591_v30 = vadd.f32 %v1590_v28, %v5149_v6  ;;  %v919_v31 = vpop.f32.mrb[19].mxu0  ;;  %v1592_v32 = vpop.f32.mrb[19].mxu1 }
 0x151   :  { %2218 = vst [vmem:[#allocation2 + $0x108] sm:$0xff] %v916_v25  ;;  %2220 = vst [vmem:[#allocation2 + $0x118] sm:$0xff] %v1589_v26  ;;  %v920_v33 = vadd.f32 %v919_v31, %v5151_v7  ;;  %v1593_v34 = vadd.f32 %v1592_v32, %v5153_v8 }
 0x152   :  { %2221 = vst [vmem:[#allocation2 + $0x120] sm:$0xff] %v918_v29  ;;  %2223 = vst [vmem:[#allocation2 + $0x130] sm:$0xff] %v1591_v30  ;;  %1182 = vmatmul.mubr.bf16.gmra.mrb[124].mxu0 %v4527_v24  ;;  %1855 = vmatmul.mubr.bf16.gmra.mrb[124].mxu1 %v4527_v24 }
 0x153   :  { %2222 = vst [vmem:[#allocation2 + $0x128] sm:$0xff] %v920_v33  ;;  %2224 = vst [vmem:[#allocation2 + $0x138] sm:$0xff] %v1593_v34  ;;  %1191 = vmatprep.mubr.bf16.mxu0 %v4991_v3  ;;  %1864 = vmatprep.mubr.bf16.mxu1 %v4991_v3  ;;  %v4531_v33 = vld [vmem:[#allocation7 + $0x118] sm:$0xff]  }
 0x155   :  { %v923_v35 = vpop.f32.mrb[20].mxu0  ;;  %v1596_v36 = vpop.f32.mrb[20].mxu1 }
 0x156   :  { %v924_v37 = vadd.f32 %v923_v35, %v5147_v5  ;;  %v1597_v38 = vadd.f32 %v1596_v36, %v5149_v6  ;;  %v925_v39 = vpop.f32.mrb[21].mxu0  ;;  %v1598_v40 = vpop.f32.mrb[21].mxu1 }
 0x157   :  { %v926_v42 = vadd.f32 %v925_v39, %v5151_v7  ;;  %v1599_v43 = vadd.f32 %v1598_v40, %v5153_v8  ;;  %v927_v44 = vpop.f32.mrb[22].mxu0  ;;  %v1600_v45 = vpop.f32.mrb[22].mxu1 }
 0x158   :  { %2225 = vst [vmem:[#allocation2 + $0x140] sm:$0xff] %v924_v37  ;;  %2227 = vst [vmem:[#allocation2 + $0x150] sm:$0xff] %v1597_v38  ;;  %v928_v46 = vadd.f32 %v927_v44, %v5147_v5  ;;  %v1601_v47 = vadd.f32 %v1600_v45, %v5149_v6  ;;  %v929_v48 = vpop.f32.mrb[23].mxu0  ;;  %v1602_v49 = vpop.f32.mrb[23].mxu1 }
 0x159   :  { %2226 = vst [vmem:[#allocation2 + $0x148] sm:$0xff] %v926_v42  ;;  %2228 = vst [vmem:[#allocation2 + $0x158] sm:$0xff] %v1599_v43  ;;  %v930_v50 = vadd.f32 %v929_v48, %v5151_v7  ;;  %v1603_v51 = vadd.f32 %v1602_v49, %v5153_v8 }
 0x15a   :  { %2229 = vst [vmem:[#allocation2 + $0x160] sm:$0xff] %v928_v46  ;;  %2231 = vst [vmem:[#allocation2 + $0x170] sm:$0xff] %v1601_v47  ;;  %1192 = vmatmul.mubr.bf16.gmra.mrb[128].mxu0 %v4528_v41  ;;  %1865 = vmatmul.mubr.bf16.gmra.mrb[128].mxu1 %v4528_v41 }
 0x15b   :  { %2230 = vst [vmem:[#allocation2 + $0x168] sm:$0xff] %v930_v50  ;;  %2232 = vst [vmem:[#allocation2 + $0x178] sm:$0xff] %v1603_v51  ;;  %1201 = vmatprep.mubr.bf16.mxu0 %v4991_v3  ;;  %1874 = vmatprep.mubr.bf16.mxu1 %v4991_v3  ;;  %v4532_v50 = vld [vmem:[#allocation7 + $0x120] sm:$0xff]  }
 0x15d   :  { %v933_v52 = vpop.f32.mrb[24].mxu0  ;;  %v1606_v53 = vpop.f32.mrb[24].mxu1 }
 0x15e   :  { %v934_v54 = vadd.f32 %v933_v52, %v5147_v5  ;;  %v1607_v55 = vadd.f32 %v1606_v53, %v5149_v6  ;;  %v935_v56 = vpop.f32.mrb[25].mxu0  ;;  %v1608_v57 = vpop.f32.mrb[25].mxu1 }
 0x15f   :  { %v936_v59 = vadd.f32 %v935_v56, %v5151_v7  ;;  %v1609_v60 = vadd.f32 %v1608_v57, %v5153_v8  ;;  %v937_v61 = vpop.f32.mrb[26].mxu0  ;;  %v1610_v62 = vpop.f32.mrb[26].mxu1 }
 0x160   :  { %2233 = vst [vmem:[#allocation2 + $0x180] sm:$0xff] %v934_v54  ;;  %2235 = vst [vmem:[#allocation2 + $0x190] sm:$0xff] %v1607_v55  ;;  %v938_v63 = vadd.f32 %v937_v61, %v5147_v5  ;;  %v1611_v0 = vadd.f32 %v1610_v62, %v5149_v6  ;;  %v939_v1 = vpop.f32.mrb[27].mxu0  ;;  %v1612_v2 = vpop.f32.mrb[27].mxu1 }
 0x161   :  { %2234 = vst [vmem:[#allocation2 + $0x188] sm:$0xff] %v936_v59  ;;  %2236 = vst [vmem:[#allocation2 + $0x198] sm:$0xff] %v1609_v60  ;;  %v940_v4 = vadd.f32 %v939_v1, %v5151_v7  ;;  %v1613_v9 = vadd.f32 %v1612_v2, %v5153_v8 }
 0x162   :  { %2237 = vst [vmem:[#allocation2 + $0x1a0] sm:$0xff] %v938_v63  ;;  %2239 = vst [vmem:[#allocation2 + $0x1b0] sm:$0xff] %v1611_v0  ;;  %1202 = vmatmul.mubr.bf16.gmra.mrb[132].mxu0 %v4529_v58  ;;  %1875 = vmatmul.mubr.bf16.gmra.mrb[132].mxu1 %v4529_v58 }
 0x163   :  { %2238 = vst [vmem:[#allocation2 + $0x1a8] sm:$0xff] %v940_v4  ;;  %2240 = vst [vmem:[#allocation2 + $0x1b8] sm:$0xff] %v1613_v9  ;;  %1211 = vmatprep.mubr.bf16.mxu0 %v4991_v3  ;;  %1884 = vmatprep.mubr.bf16.mxu1 %v4991_v3  ;;  %v4533_v4 = vld [vmem:[#allocation7 + $0x128] sm:$0xff]  }
 0x165   :  { %v943_v10 = vpop.f32.mrb[28].mxu0  ;;  %v1616_v11 = vpop.f32.mrb[28].mxu1 }
 0x166   :  { %v944_v12 = vadd.f32 %v943_v10, %v5147_v5  ;;  %v1617_v13 = vadd.f32 %v1616_v11, %v5149_v6  ;;  %v945_v14 = vpop.f32.mrb[29].mxu0  ;;  %v1618_v15 = vpop.f32.mrb[29].mxu1 }
 0x167   :  { %v946_v17 = vadd.f32 %v945_v14, %v5151_v7  ;;  %v1619_v18 = vadd.f32 %v1618_v15, %v5153_v8  ;;  %v947_v19 = vpop.f32.mrb[30].mxu0  ;;  %v1620_v20 = vpop.f32.mrb[30].mxu1 }
 0x168   :  { %2241 = vst [vmem:[#allocation2 + $0x1c0] sm:$0xff] %v944_v12  ;;  %2243 = vst [vmem:[#allocation2 + $0x1d0] sm:$0xff] %v1617_v13  ;;  %v948_v21 = vadd.f32 %v947_v19, %v5147_v5  ;;  %v1621_v22 = vadd.f32 %v1620_v20, %v5149_v6  ;;  %v949_v23 = vpop.f32.mrb[31].mxu0  ;;  %v1622_v24 = vpop.f32.mrb[31].mxu1 }
 0x169   :  { %2242 = vst [vmem:[#allocation2 + $0x1c8] sm:$0xff] %v946_v17  ;;  %2244 = vst [vmem:[#allocation2 + $0x1d8] sm:$0xff] %v1619_v18  ;;  %v950_v25 = vadd.f32 %v949_v23, %v5151_v7  ;;  %v1623_v26 = vadd.f32 %v1622_v24, %v5153_v8 }
 0x16a   :  { %2245 = vst [vmem:[#allocation2 + $0x1e0] sm:$0xff] %v948_v21  ;;  %2247 = vst [vmem:[#allocation2 + $0x1f0] sm:$0xff] %v1621_v22  ;;  %1212 = vmatmul.mubr.bf16.gmra.mrb[136].mxu0 %v4530_v16  ;;  %1885 = vmatmul.mubr.bf16.gmra.mrb[136].mxu1 %v4530_v16 }
 0x16b   :  { %2246 = vst [vmem:[#allocation2 + $0x1e8] sm:$0xff] %v950_v25  ;;  %2248 = vst [vmem:[#allocation2 + $0x1f8] sm:$0xff] %v1623_v26  ;;  %1221 = vmatprep.mubr.bf16.mxu0 %v4991_v3  ;;  %1894 = vmatprep.mubr.bf16.mxu1 %v4991_v3  ;;  %v4534_v25 = vld [vmem:[#allocation7 + $0x130] sm:$0xff]  }
 0x16d   :  { %v953_v27 = vpop.f32.mrb[32].mxu0  ;;  %v1626_v28 = vpop.f32.mrb[32].mxu1 }
 0x16e   :  { %v954_v29 = vadd.f32 %v953_v27, %v5147_v5  ;;  %v1627_v30 = vadd.f32 %v1626_v28, %v5149_v6  ;;  %v955_v31 = vpop.f32.mrb[33].mxu0  ;;  %v1628_v32 = vpop.f32.mrb[33].mxu1 }
 0x16f   :  { %v956_v34 = vadd.f32 %v955_v31, %v5151_v7  ;;  %v1629_v35 = vadd.f32 %v1628_v32, %v5153_v8  ;;  %v957_v36 = vpop.f32.mrb[34].mxu0  ;;  %v1630_v37 = vpop.f32.mrb[34].mxu1 }
 0x170   :  { %2249 = vst [vmem:[#allocation2 + $0x200] sm:$0xff] %v954_v29  ;;  %2251 = vst [vmem:[#allocation2 + $0x210] sm:$0xff] %v1627_v30  ;;  %v958_v38 = vadd.f32 %v957_v36, %v5147_v5  ;;  %v1631_v39 = vadd.f32 %v1630_v37, %v5149_v6  ;;  %v959_v40 = vpop.f32.mrb[35].mxu0  ;;  %v1632_v41 = vpop.f32.mrb[35].mxu1 }
 0x171   :  { %2250 = vst [vmem:[#allocation2 + $0x208] sm:$0xff] %v956_v34  ;;  %2252 = vst [vmem:[#allocation2 + $0x218] sm:$0xff] %v1629_v35  ;;  %v960_v42 = vadd.f32 %v959_v40, %v5151_v7  ;;  %v1633_v43 = vadd.f32 %v1632_v41, %v5153_v8 }
 0x172   :  { %2253 = vst [vmem:[#allocation2 + $0x220] sm:$0xff] %v958_v38  ;;  %2255 = vst [vmem:[#allocation2 + $0x230] sm:$0xff] %v1631_v39  ;;  %1222 = vmatmul.mubr.bf16.gmra.mrb[140].mxu0 %v4531_v33  ;;  %1895 = vmatmul.mubr.bf16.gmra.mrb[140].mxu1 %v4531_v33 }
 0x173   :  { %2254 = vst [vmem:[#allocation2 + $0x228] sm:$0xff] %v960_v42  ;;  %2256 = vst [vmem:[#allocation2 + $0x238] sm:$0xff] %v1633_v43  ;;  %1231 = vmatprep.mubr.bf16.mxu0 %v4991_v3  ;;  %1904 = vmatprep.mubr.bf16.mxu1 %v4991_v3  ;;  %v4535_v42 = vld [vmem:[#allocation7 + $0x138] sm:$0xff]  }
 0x175   :  { %v963_v44 = vpop.f32.mrb[36].mxu0  ;;  %v1636_v45 = vpop.f32.mrb[36].mxu1 }
 0x176   :  { %v964_v46 = vadd.f32 %v963_v44, %v5147_v5  ;;  %v1637_v47 = vadd.f32 %v1636_v45, %v5149_v6  ;;  %v965_v48 = vpop.f32.mrb[37].mxu0  ;;  %v1638_v49 = vpop.f32.mrb[37].mxu1 }
 0x177   :  { %v966_v51 = vadd.f32 %v965_v48, %v5151_v7  ;;  %v1639_v52 = vadd.f32 %v1638_v49, %v5153_v8  ;;  %v967_v53 = vpop.f32.mrb[38].mxu0  ;;  %v1640_v54 = vpop.f32.mrb[38].mxu1 }
 0x178   :  { %2257 = vst [vmem:[#allocation2 + $0x240] sm:$0xff] %v964_v46  ;;  %2259 = vst [vmem:[#allocation2 + $0x250] sm:$0xff] %v1637_v47  ;;  %v968_v55 = vadd.f32 %v967_v53, %v5147_v5  ;;  %v1641_v56 = vadd.f32 %v1640_v54, %v5149_v6  ;;  %v969_v57 = vpop.f32.mrb[39].mxu0  ;;  %v1642_v58 = vpop.f32.mrb[39].mxu1 }
 0x179   :  { %2258 = vst [vmem:[#allocation2 + $0x248] sm:$0xff] %v966_v51  ;;  %2260 = vst [vmem:[#allocation2 + $0x258] sm:$0xff] %v1639_v52  ;;  %v970_v59 = vadd.f32 %v969_v57, %v5151_v7  ;;  %v1643_v60 = vadd.f32 %v1642_v58, %v5153_v8 }
 0x17a   :  { %2261 = vst [vmem:[#allocation2 + $0x260] sm:$0xff] %v968_v55  ;;  %2263 = vst [vmem:[#allocation2 + $0x270] sm:$0xff] %v1641_v56  ;;  %1232 = vmatmul.mubr.bf16.gmra.mrb[144].mxu0 %v4532_v50  ;;  %1905 = vmatmul.mubr.bf16.gmra.mrb[144].mxu1 %v4532_v50 }
 0x17b   :  { %2262 = vst [vmem:[#allocation2 + $0x268] sm:$0xff] %v970_v59  ;;  %2264 = vst [vmem:[#allocation2 + $0x278] sm:$0xff] %v1643_v60  ;;  %1241 = vmatprep.mubr.bf16.mxu0 %v4991_v3  ;;  %1914 = vmatprep.mubr.bf16.mxu1 %v4991_v3  ;;  %v4536_v59 = vld [vmem:[#allocation7 + $0x140] sm:$0xff]  }
 0x17d   :  { %v973_v61 = vpop.f32.mrb[40].mxu0  ;;  %v1646_v62 = vpop.f32.mrb[40].mxu1 }
 0x17e   :  { %v974_v63 = vadd.f32 %v973_v61, %v5147_v5  ;;  %v1647_v0 = vadd.f32 %v1646_v62, %v5149_v6  ;;  %v975_v1 = vpop.f32.mrb[41].mxu0  ;;  %v1648_v2 = vpop.f32.mrb[41].mxu1 }
 0x17f   :  { %v976_v9 = vadd.f32 %v975_v1, %v5151_v7  ;;  %v1649_v10 = vadd.f32 %v1648_v2, %v5153_v8  ;;  %v977_v11 = vpop.f32.mrb[42].mxu0  ;;  %v1650_v12 = vpop.f32.mrb[42].mxu1 }
 0x180   :  { %2265 = vst [vmem:[#allocation2 + $0x280] sm:$0xff] %v974_v63  ;;  %2267 = vst [vmem:[#allocation2 + $0x290] sm:$0xff] %v1647_v0  ;;  %v978_v13 = vadd.f32 %v977_v11, %v5147_v5  ;;  %v1651_v14 = vadd.f32 %v1650_v12, %v5149_v6  ;;  %v979_v15 = vpop.f32.mrb[43].mxu0  ;;  %v1652_v16 = vpop.f32.mrb[43].mxu1 }
 0x181   :  { %2266 = vst [vmem:[#allocation2 + $0x288] sm:$0xff] %v976_v9  ;;  %2268 = vst [vmem:[#allocation2 + $0x298] sm:$0xff] %v1649_v10  ;;  %v980_v17 = vadd.f32 %v979_v15, %v5151_v7  ;;  %v1653_v18 = vadd.f32 %v1652_v16, %v5153_v8 }
 0x182   :  { %2269 = vst [vmem:[#allocation2 + $0x2a0] sm:$0xff] %v978_v13  ;;  %2271 = vst [vmem:[#allocation2 + $0x2b0] sm:$0xff] %v1651_v14  ;;  %1242 = vmatmul.mubr.bf16.gmra.mrb[148].mxu0 %v4533_v4  ;;  %1915 = vmatmul.mubr.bf16.gmra.mrb[148].mxu1 %v4533_v4 }
 0x183   :  { %2270 = vst [vmem:[#allocation2 + $0x2a8] sm:$0xff] %v980_v17  ;;  %2272 = vst [vmem:[#allocation2 + $0x2b8] sm:$0xff] %v1653_v18  ;;  %1251 = vmatprep.mubr.bf16.mxu0 %v4991_v3  ;;  %1924 = vmatprep.mubr.bf16.mxu1 %v4991_v3  ;;  %v4537_v17 = vld [vmem:[#allocation7 + $0x148] sm:$0xff]  }
 0x185   :  { %v983_v19 = vpop.f32.mrb[44].mxu0  ;;  %v1656_v20 = vpop.f32.mrb[44].mxu1 }
 0x186   :  { %v984_v21 = vadd.f32 %v983_v19, %v5147_v5  ;;  %v1657_v22 = vadd.f32 %v1656_v20, %v5149_v6  ;;  %v985_v23 = vpop.f32.mrb[45].mxu0  ;;  %v1658_v24 = vpop.f32.mrb[45].mxu1 }
 0x187   :  { %v986_v26 = vadd.f32 %v985_v23, %v5151_v7  ;;  %v1659_v27 = vadd.f32 %v1658_v24, %v5153_v8  ;;  %v987_v28 = vpop.f32.mrb[46].mxu0  ;;  %v1660_v29 = vpop.f32.mrb[46].mxu1 }
 0x188   :  { %2273 = vst [vmem:[#allocation2 + $0x2c0] sm:$0xff] %v984_v21  ;;  %2275 = vst [vmem:[#allocation2 + $0x2d0] sm:$0xff] %v1657_v22  ;;  %v988_v30 = vadd.f32 %v987_v28, %v5147_v5  ;;  %v1661_v31 = vadd.f32 %v1660_v29, %v5149_v6  ;;  %v989_v32 = vpop.f32.mrb[47].mxu0  ;;  %v1662_v33 = vpop.f32.mrb[47].mxu1 }
 0x189   :  { %2274 = vst [vmem:[#allocation2 + $0x2c8] sm:$0xff] %v986_v26  ;;  %2276 = vst [vmem:[#allocation2 + $0x2d8] sm:$0xff] %v1659_v27  ;;  %v990_v34 = vadd.f32 %v989_v32, %v5151_v7  ;;  %v1663_v35 = vadd.f32 %v1662_v33, %v5153_v8 }
 0x18a   :  { %2277 = vst [vmem:[#allocation2 + $0x2e0] sm:$0xff] %v988_v30  ;;  %2279 = vst [vmem:[#allocation2 + $0x2f0] sm:$0xff] %v1661_v31  ;;  %1252 = vmatmul.mubr.bf16.gmra.mrb[152].mxu0 %v4534_v25  ;;  %1925 = vmatmul.mubr.bf16.gmra.mrb[152].mxu1 %v4534_v25 }
 0x18b   :  { %2278 = vst [vmem:[#allocation2 + $0x2e8] sm:$0xff] %v990_v34  ;;  %2280 = vst [vmem:[#allocation2 + $0x2f8] sm:$0xff] %v1663_v35  ;;  %1261 = vmatprep.mubr.bf16.mxu0 %v4991_v3  ;;  %1934 = vmatprep.mubr.bf16.mxu1 %v4991_v3  ;;  %v4538_v34 = vld [vmem:[#allocation7 + $0x150] sm:$0xff]  }
 0x18d   :  { %v993_v36 = vpop.f32.mrb[48].mxu0  ;;  %v1666_v37 = vpop.f32.mrb[48].mxu1 }
 0x18e   :  { %v994_v38 = vadd.f32 %v993_v36, %v5147_v5  ;;  %v1667_v39 = vadd.f32 %v1666_v37, %v5149_v6  ;;  %v995_v40 = vpop.f32.mrb[49].mxu0  ;;  %v1668_v41 = vpop.f32.mrb[49].mxu1 }
 0x18f   :  { %v996_v43 = vadd.f32 %v995_v40, %v5151_v7  ;;  %v1669_v44 = vadd.f32 %v1668_v41, %v5153_v8  ;;  %v997_v45 = vpop.f32.mrb[50].mxu0  ;;  %v1670_v46 = vpop.f32.mrb[50].mxu1 }
 0x190   :  { %2281 = vst [vmem:[#allocation2 + $0x300] sm:$0xff] %v994_v38  ;;  %2283 = vst [vmem:[#allocation2 + $0x310] sm:$0xff] %v1667_v39  ;;  %v998_v47 = vadd.f32 %v997_v45, %v5147_v5  ;;  %v1671_v48 = vadd.f32 %v1670_v46, %v5149_v6  ;;  %v999_v49 = vpop.f32.mrb[51].mxu0  ;;  %v1672_v50 = vpop.f32.mrb[51].mxu1 }
 0x191   :  { %2282 = vst [vmem:[#allocation2 + $0x308] sm:$0xff] %v996_v43  ;;  %2284 = vst [vmem:[#allocation2 + $0x318] sm:$0xff] %v1669_v44  ;;  %v1000_v51 = vadd.f32 %v999_v49, %v5151_v7  ;;  %v1673_v52 = vadd.f32 %v1672_v50, %v5153_v8 }
 0x192   :  { %2285 = vst [vmem:[#allocation2 + $0x320] sm:$0xff] %v998_v47  ;;  %2287 = vst [vmem:[#allocation2 + $0x330] sm:$0xff] %v1671_v48  ;;  %1262 = vmatmul.mubr.bf16.gmra.mrb[156].mxu0 %v4535_v42  ;;  %1935 = vmatmul.mubr.bf16.gmra.mrb[156].mxu1 %v4535_v42 }
 0x193   :  { %2286 = vst [vmem:[#allocation2 + $0x328] sm:$0xff] %v1000_v51  ;;  %2288 = vst [vmem:[#allocation2 + $0x338] sm:$0xff] %v1673_v52  ;;  %1271 = vmatprep.mubr.bf16.mxu0 %v4991_v3  ;;  %1944 = vmatprep.mubr.bf16.mxu1 %v4991_v3  ;;  %v4539_v51 = vld [vmem:[#allocation7 + $0x158] sm:$0xff]  }
 0x195   :  { %v1003_v53 = vpop.f32.mrb[52].mxu0  ;;  %v1676_v54 = vpop.f32.mrb[52].mxu1 }
 0x196   :  { %v1004_v55 = vadd.f32 %v1003_v53, %v5147_v5  ;;  %v1677_v56 = vadd.f32 %v1676_v54, %v5149_v6  ;;  %v1005_v57 = vpop.f32.mrb[53].mxu0  ;;  %v1678_v58 = vpop.f32.mrb[53].mxu1 }
 0x197   :  { %v1006_v60 = vadd.f32 %v1005_v57, %v5151_v7  ;;  %v1679_v61 = vadd.f32 %v1678_v58, %v5153_v8  ;;  %v1007_v62 = vpop.f32.mrb[54].mxu0  ;;  %v1680_v63 = vpop.f32.mrb[54].mxu1 }
 0x198   :  { %2289 = vst [vmem:[#allocation2 + $0x340] sm:$0xff] %v1004_v55  ;;  %2291 = vst [vmem:[#allocation2 + $0x350] sm:$0xff] %v1677_v56  ;;  %v1008_v0 = vadd.f32 %v1007_v62, %v5147_v5  ;;  %v1681_v1 = vadd.f32 %v1680_v63, %v5149_v6  ;;  %v1009_v2 = vpop.f32.mrb[55].mxu0  ;;  %v1682_v4 = vpop.f32.mrb[55].mxu1 }
 0x199   :  { %2290 = vst [vmem:[#allocation2 + $0x348] sm:$0xff] %v1006_v60  ;;  %2292 = vst [vmem:[#allocation2 + $0x358] sm:$0xff] %v1679_v61  ;;  %v1010_v9 = vadd.f32 %v1009_v2, %v5151_v7  ;;  %v1683_v10 = vadd.f32 %v1682_v4, %v5153_v8 }
 0x19a   :  { %2293 = vst [vmem:[#allocation2 + $0x360] sm:$0xff] %v1008_v0  ;;  %2295 = vst [vmem:[#allocation2 + $0x370] sm:$0xff] %v1681_v1  ;;  %1272 = vmatmul.mubr.bf16.gmra.mrb[160].mxu0 %v4536_v59  ;;  %1945 = vmatmul.mubr.bf16.gmra.mrb[160].mxu1 %v4536_v59 }
 0x19b   :  { %2294 = vst [vmem:[#allocation2 + $0x368] sm:$0xff] %v1010_v9  ;;  %2296 = vst [vmem:[#allocation2 + $0x378] sm:$0xff] %v1683_v10  ;;  %1281 = vmatprep.mubr.bf16.mxu0 %v4991_v3  ;;  %1954 = vmatprep.mubr.bf16.mxu1 %v4991_v3  ;;  %v4540_v9 = vld [vmem:[#allocation7 + $0x160] sm:$0xff]  }
 0x19d   :  { %v1013_v11 = vpop.f32.mrb[56].mxu0  ;;  %v1686_v12 = vpop.f32.mrb[56].mxu1 }
 0x19e   :  { %v1014_v13 = vadd.f32 %v1013_v11, %v5147_v5  ;;  %v1687_v14 = vadd.f32 %v1686_v12, %v5149_v6  ;;  %v1015_v15 = vpop.f32.mrb[57].mxu0  ;;  %v1688_v16 = vpop.f32.mrb[57].mxu1 }
 0x19f   :  { %v1016_v18 = vadd.f32 %v1015_v15, %v5151_v7  ;;  %v1689_v19 = vadd.f32 %v1688_v16, %v5153_v8  ;;  %v1017_v20 = vpop.f32.mrb[58].mxu0  ;;  %v1690_v21 = vpop.f32.mrb[58].mxu1 }
 0x1a0   :  { %2297 = vst [vmem:[#allocation2 + $0x380] sm:$0xff] %v1014_v13  ;;  %2299 = vst [vmem:[#allocation2 + $0x390] sm:$0xff] %v1687_v14  ;;  %v1018_v22 = vadd.f32 %v1017_v20, %v5147_v5  ;;  %v1691_v23 = vadd.f32 %v1690_v21, %v5149_v6  ;;  %v1019_v24 = vpop.f32.mrb[59].mxu0  ;;  %v1692_v25 = vpop.f32.mrb[59].mxu1 }
 0x1a1   :  { %2298 = vst [vmem:[#allocation2 + $0x388] sm:$0xff] %v1016_v18  ;;  %2300 = vst [vmem:[#allocation2 + $0x398] sm:$0xff] %v1689_v19  ;;  %v1020_v26 = vadd.f32 %v1019_v24, %v5151_v7  ;;  %v1693_v27 = vadd.f32 %v1692_v25, %v5153_v8 }
 0x1a2   :  { %2301 = vst [vmem:[#allocation2 + $0x3a0] sm:$0xff] %v1018_v22  ;;  %2303 = vst [vmem:[#allocation2 + $0x3b0] sm:$0xff] %v1691_v23  ;;  %1282 = vmatmul.mubr.bf16.gmra.mrb[164].mxu0 %v4537_v17  ;;  %1955 = vmatmul.mubr.bf16.gmra.mrb[164].mxu1 %v4537_v17 }
 0x1a3   :  { %2302 = vst [vmem:[#allocation2 + $0x3a8] sm:$0xff] %v1020_v26  ;;  %2304 = vst [vmem:[#allocation2 + $0x3b8] sm:$0xff] %v1693_v27  ;;  %1291 = vmatprep.mubr.bf16.mxu0 %v4991_v3  ;;  %1964 = vmatprep.mubr.bf16.mxu1 %v4991_v3  ;;  %v4541_v26 = vld [vmem:[#allocation7 + $0x168] sm:$0xff]  }
 0x1a5   :  { %v1023_v28 = vpop.f32.mrb[60].mxu0  ;;  %v1696_v29 = vpop.f32.mrb[60].mxu1 }
 0x1a6   :  { %v1024_v30 = vadd.f32 %v1023_v28, %v5147_v5  ;;  %v1697_v31 = vadd.f32 %v1696_v29, %v5149_v6  ;;  %v1025_v32 = vpop.f32.mrb[61].mxu0  ;;  %v1698_v33 = vpop.f32.mrb[61].mxu1 }
 0x1a7   :  { %v1026_v35 = vadd.f32 %v1025_v32, %v5151_v7  ;;  %v1699_v36 = vadd.f32 %v1698_v33, %v5153_v8  ;;  %v1027_v37 = vpop.f32.mrb[62].mxu0  ;;  %v1700_v38 = vpop.f32.mrb[62].mxu1 }
 0x1a8   :  { %2305 = vst [vmem:[#allocation2 + $0x3c0] sm:$0xff] %v1024_v30  ;;  %2307 = vst [vmem:[#allocation2 + $0x3d0] sm:$0xff] %v1697_v31  ;;  %v1028_v39 = vadd.f32 %v1027_v37, %v5147_v5  ;;  %v1701_v40 = vadd.f32 %v1700_v38, %v5149_v6  ;;  %v1029_v41 = vpop.f32.mrb[63].mxu0  ;;  %v1702_v42 = vpop.f32.mrb[63].mxu1 }
 0x1a9   :  { %2306 = vst [vmem:[#allocation2 + $0x3c8] sm:$0xff] %v1026_v35  ;;  %2308 = vst [vmem:[#allocation2 + $0x3d8] sm:$0xff] %v1699_v36  ;;  %v1030_v43 = vadd.f32 %v1029_v41, %v5151_v7  ;;  %v1703_v44 = vadd.f32 %v1702_v42, %v5153_v8 }
 0x1aa   :  { %2309 = vst [vmem:[#allocation2 + $0x3e0] sm:$0xff] %v1028_v39  ;;  %2311 = vst [vmem:[#allocation2 + $0x3f0] sm:$0xff] %v1701_v40  ;;  %1292 = vmatmul.mubr.bf16.gmra.mrb[168].mxu0 %v4538_v34  ;;  %1965 = vmatmul.mubr.bf16.gmra.mrb[168].mxu1 %v4538_v34 }
 0x1ab   :  { %2310 = vst [vmem:[#allocation2 + $0x3e8] sm:$0xff] %v1030_v43  ;;  %2312 = vst [vmem:[#allocation2 + $0x3f8] sm:$0xff] %v1703_v44  ;;  %1301 = vmatprep.mubr.bf16.mxu0 %v4991_v3  ;;  %1974 = vmatprep.mubr.bf16.mxu1 %v4991_v3  ;;  %v4542_v43 = vld [vmem:[#allocation7 + $0x170] sm:$0xff]  }
 0x1ad   :  { %v1033_v45 = vpop.f32.mrb[64].mxu0  ;;  %v1706_v46 = vpop.f32.mrb[64].mxu1 }
 0x1ae   :  { %v1034_v47 = vadd.f32 %v1033_v45, %v5147_v5  ;;  %v1707_v48 = vadd.f32 %v1706_v46, %v5149_v6  ;;  %v1035_v49 = vpop.f32.mrb[65].mxu0  ;;  %v1708_v50 = vpop.f32.mrb[65].mxu1 }
 0x1af   :  { %v1036_v52 = vadd.f32 %v1035_v49, %v5151_v7  ;;  %v1709_v53 = vadd.f32 %v1708_v50, %v5153_v8  ;;  %v1037_v54 = vpop.f32.mrb[66].mxu0  ;;  %v1710_v55 = vpop.f32.mrb[66].mxu1 }
 0x1b0   :  { %2313 = vst [vmem:[#allocation2 + $0x400] sm:$0xff] %v1034_v47  ;;  %2315 = vst [vmem:[#allocation2 + $0x410] sm:$0xff] %v1707_v48  ;;  %v1038_v56 = vadd.f32 %v1037_v54, %v5147_v5  ;;  %v1711_v57 = vadd.f32 %v1710_v55, %v5149_v6  ;;  %v1039_v58 = vpop.f32.mrb[67].mxu0  ;;  %v1712_v59 = vpop.f32.mrb[67].mxu1 }
 0x1b1   :  { %2314 = vst [vmem:[#allocation2 + $0x408] sm:$0xff] %v1036_v52  ;;  %2316 = vst [vmem:[#allocation2 + $0x418] sm:$0xff] %v1709_v53  ;;  %v1040_v60 = vadd.f32 %v1039_v58, %v5151_v7  ;;  %v1713_v61 = vadd.f32 %v1712_v59, %v5153_v8 }
 0x1b2   :  { %2317 = vst [vmem:[#allocation2 + $0x420] sm:$0xff] %v1038_v56  ;;  %2319 = vst [vmem:[#allocation2 + $0x430] sm:$0xff] %v1711_v57  ;;  %1302 = vmatmul.mubr.bf16.gmra.mrb[172].mxu0 %v4539_v51  ;;  %1975 = vmatmul.mubr.bf16.gmra.mrb[172].mxu1 %v4539_v51 }
 0x1b3   :  { %2318 = vst [vmem:[#allocation2 + $0x428] sm:$0xff] %v1040_v60  ;;  %2320 = vst [vmem:[#allocation2 + $0x438] sm:$0xff] %v1713_v61  ;;  %1311 = vmatprep.mubr.bf16.mxu0 %v4991_v3  ;;  %1984 = vmatprep.mubr.bf16.mxu1 %v4991_v3  ;;  %v4543_v60 = vld [vmem:[#allocation7 + $0x178] sm:$0xff]  }
 0x1b5   :  { %v1043_v62 = vpop.f32.mrb[68].mxu0  ;;  %v1716_v63 = vpop.f32.mrb[68].mxu1 }
 0x1b6   :  { %v1044_v0 = vadd.f32 %v1043_v62, %v5147_v5  ;;  %v1717_v1 = vadd.f32 %v1716_v63, %v5149_v6  ;;  %v1045_v2 = vpop.f32.mrb[69].mxu0  ;;  %v1718_v4 = vpop.f32.mrb[69].mxu1 }
 0x1b7   :  { %v1046_v10 = vadd.f32 %v1045_v2, %v5151_v7  ;;  %v1719_v11 = vadd.f32 %v1718_v4, %v5153_v8  ;;  %v1047_v12 = vpop.f32.mrb[70].mxu0  ;;  %v1720_v13 = vpop.f32.mrb[70].mxu1 }
 0x1b8   :  { %2321 = vst [vmem:[#allocation2 + $0x440] sm:$0xff] %v1044_v0  ;;  %2323 = vst [vmem:[#allocation2 + $0x450] sm:$0xff] %v1717_v1  ;;  %v1048_v14 = vadd.f32 %v1047_v12, %v5147_v5  ;;  %v1721_v15 = vadd.f32 %v1720_v13, %v5149_v6  ;;  %v1049_v16 = vpop.f32.mrb[71].mxu0  ;;  %v1722_v17 = vpop.f32.mrb[71].mxu1 }
 0x1b9   :  { %2322 = vst [vmem:[#allocation2 + $0x448] sm:$0xff] %v1046_v10  ;;  %2324 = vst [vmem:[#allocation2 + $0x458] sm:$0xff] %v1719_v11  ;;  %v1050_v18 = vadd.f32 %v1049_v16, %v5151_v7  ;;  %v1723_v19 = vadd.f32 %v1722_v17, %v5153_v8 }
 0x1ba   :  { %2325 = vst [vmem:[#allocation2 + $0x460] sm:$0xff] %v1048_v14  ;;  %2327 = vst [vmem:[#allocation2 + $0x470] sm:$0xff] %v1721_v15  ;;  %1312 = vmatmul.mubr.bf16.gmra.mrb[176].mxu0 %v4540_v9  ;;  %1985 = vmatmul.mubr.bf16.gmra.mrb[176].mxu1 %v4540_v9 }
 0x1bb   :  { %2326 = vst [vmem:[#allocation2 + $0x468] sm:$0xff] %v1050_v18  ;;  %2328 = vst [vmem:[#allocation2 + $0x478] sm:$0xff] %v1723_v19  ;;  %1321 = vmatprep.mubr.bf16.mxu0 %v4991_v3  ;;  %1994 = vmatprep.mubr.bf16.mxu1 %v4991_v3  ;;  %v4544_v18 = vld [vmem:[#allocation7 + $0x180] sm:$0xff]  }
 0x1bd   :  { %v1053_v20 = vpop.f32.mrb[72].mxu0  ;;  %v1726_v21 = vpop.f32.mrb[72].mxu1 }
 0x1be   :  { %v1054_v22 = vadd.f32 %v1053_v20, %v5147_v5  ;;  %v1727_v23 = vadd.f32 %v1726_v21, %v5149_v6  ;;  %v1055_v24 = vpop.f32.mrb[73].mxu0  ;;  %v1728_v25 = vpop.f32.mrb[73].mxu1 }
 0x1bf   :  { %v1056_v27 = vadd.f32 %v1055_v24, %v5151_v7  ;;  %v1729_v28 = vadd.f32 %v1728_v25, %v5153_v8  ;;  %v1057_v29 = vpop.f32.mrb[74].mxu0  ;;  %v1730_v30 = vpop.f32.mrb[74].mxu1 }
 0x1c0   :  { %2329 = vst [vmem:[#allocation2 + $0x480] sm:$0xff] %v1054_v22  ;;  %2331 = vst [vmem:[#allocation2 + $0x490] sm:$0xff] %v1727_v23  ;;  %v1058_v31 = vadd.f32 %v1057_v29, %v5147_v5  ;;  %v1731_v32 = vadd.f32 %v1730_v30, %v5149_v6  ;;  %v1059_v33 = vpop.f32.mrb[75].mxu0  ;;  %v1732_v34 = vpop.f32.mrb[75].mxu1 }
 0x1c1   :  { %2330 = vst [vmem:[#allocation2 + $0x488] sm:$0xff] %v1056_v27  ;;  %2332 = vst [vmem:[#allocation2 + $0x498] sm:$0xff] %v1729_v28  ;;  %v1060_v35 = vadd.f32 %v1059_v33, %v5151_v7  ;;  %v1733_v36 = vadd.f32 %v1732_v34, %v5153_v8 }
 0x1c2   :  { %2333 = vst [vmem:[#allocation2 + $0x4a0] sm:$0xff] %v1058_v31  ;;  %2335 = vst [vmem:[#allocation2 + $0x4b0] sm:$0xff] %v1731_v32  ;;  %1322 = vmatmul.mubr.bf16.gmra.mrb[180].mxu0 %v4541_v26  ;;  %1995 = vmatmul.mubr.bf16.gmra.mrb[180].mxu1 %v4541_v26 }
 0x1c3   :  { %2334 = vst [vmem:[#allocation2 + $0x4a8] sm:$0xff] %v1060_v35  ;;  %2336 = vst [vmem:[#allocation2 + $0x4b8] sm:$0xff] %v1733_v36  ;;  %1331 = vmatprep.mubr.bf16.mxu0 %v4991_v3  ;;  %2004 = vmatprep.mubr.bf16.mxu1 %v4991_v3  ;;  %v4545_v35 = vld [vmem:[#allocation7 + $0x188] sm:$0xff]  }
 0x1c5   :  { %v1063_v37 = vpop.f32.mrb[76].mxu0  ;;  %v1736_v38 = vpop.f32.mrb[76].mxu1 }
 0x1c6   :  { %v1064_v39 = vadd.f32 %v1063_v37, %v5147_v5  ;;  %v1737_v40 = vadd.f32 %v1736_v38, %v5149_v6  ;;  %v1065_v41 = vpop.f32.mrb[77].mxu0  ;;  %v1738_v42 = vpop.f32.mrb[77].mxu1 }
 0x1c7   :  { %v1066_v44 = vadd.f32 %v1065_v41, %v5151_v7  ;;  %v1739_v45 = vadd.f32 %v1738_v42, %v5153_v8  ;;  %v1067_v46 = vpop.f32.mrb[78].mxu0  ;;  %v1740_v47 = vpop.f32.mrb[78].mxu1 }
 0x1c8   :  { %2337 = vst [vmem:[#allocation2 + $0x4c0] sm:$0xff] %v1064_v39  ;;  %2339 = vst [vmem:[#allocation2 + $0x4d0] sm:$0xff] %v1737_v40  ;;  %v1068_v48 = vadd.f32 %v1067_v46, %v5147_v5  ;;  %v1741_v49 = vadd.f32 %v1740_v47, %v5149_v6  ;;  %v1069_v50 = vpop.f32.mrb[79].mxu0  ;;  %v1742_v51 = vpop.f32.mrb[79].mxu1 }
 0x1c9   :  { %2338 = vst [vmem:[#allocation2 + $0x4c8] sm:$0xff] %v1066_v44  ;;  %2340 = vst [vmem:[#allocation2 + $0x4d8] sm:$0xff] %v1739_v45  ;;  %v1070_v52 = vadd.f32 %v1069_v50, %v5151_v7  ;;  %v1743_v53 = vadd.f32 %v1742_v51, %v5153_v8 }
 0x1ca   :  { %2341 = vst [vmem:[#allocation2 + $0x4e0] sm:$0xff] %v1068_v48  ;;  %2343 = vst [vmem:[#allocation2 + $0x4f0] sm:$0xff] %v1741_v49  ;;  %1332 = vmatmul.mubr.bf16.gmra.mrb[184].mxu0 %v4542_v43  ;;  %2005 = vmatmul.mubr.bf16.gmra.mrb[184].mxu1 %v4542_v43 }
 0x1cb   :  { %2342 = vst [vmem:[#allocation2 + $0x4e8] sm:$0xff] %v1070_v52  ;;  %2344 = vst [vmem:[#allocation2 + $0x4f8] sm:$0xff] %v1743_v53  ;;  %1341 = vmatprep.mubr.bf16.mxu0 %v4991_v3  ;;  %2014 = vmatprep.mubr.bf16.mxu1 %v4991_v3  ;;  %v4546_v52 = vld [vmem:[#allocation7 + $0x190] sm:$0xff]  }
 0x1cd   :  { %v1073_v54 = vpop.f32.mrb[80].mxu0  ;;  %v1746_v55 = vpop.f32.mrb[80].mxu1 }
 0x1ce   :  { %v1074_v56 = vadd.f32 %v1073_v54, %v5147_v5  ;;  %v1747_v57 = vadd.f32 %v1746_v55, %v5149_v6  ;;  %v1075_v58 = vpop.f32.mrb[81].mxu0  ;;  %v1748_v59 = vpop.f32.mrb[81].mxu1 }
 0x1cf   :  { %v1076_v61 = vadd.f32 %v1075_v58, %v5151_v7  ;;  %v1749_v62 = vadd.f32 %v1748_v59, %v5153_v8  ;;  %v1077_v63 = vpop.f32.mrb[82].mxu0  ;;  %v1750_v0 = vpop.f32.mrb[82].mxu1 }
 0x1d0   :  { %2345 = vst [vmem:[#allocation2 + $0x500] sm:$0xff] %v1074_v56  ;;  %2347 = vst [vmem:[#allocation2 + $0x510] sm:$0xff] %v1747_v57  ;;  %v1078_v1 = vadd.f32 %v1077_v63, %v5147_v5  ;;  %v1751_v2 = vadd.f32 %v1750_v0, %v5149_v6  ;;  %v1079_v4 = vpop.f32.mrb[83].mxu0  ;;  %v1752_v9 = vpop.f32.mrb[83].mxu1 }
 0x1d1   :  { %2346 = vst [vmem:[#allocation2 + $0x508] sm:$0xff] %v1076_v61  ;;  %2348 = vst [vmem:[#allocation2 + $0x518] sm:$0xff] %v1749_v62  ;;  %v1080_v10 = vadd.f32 %v1079_v4, %v5151_v7  ;;  %v1753_v11 = vadd.f32 %v1752_v9, %v5153_v8 }
 0x1d2   :  { %2349 = vst [vmem:[#allocation2 + $0x520] sm:$0xff] %v1078_v1  ;;  %2351 = vst [vmem:[#allocation2 + $0x530] sm:$0xff] %v1751_v2  ;;  %1342 = vmatmul.mubr.bf16.gmra.mrb[188].mxu0 %v4543_v60  ;;  %2015 = vmatmul.mubr.bf16.gmra.mrb[188].mxu1 %v4543_v60 }
 0x1d3   :  { %2350 = vst [vmem:[#allocation2 + $0x528] sm:$0xff] %v1080_v10  ;;  %2352 = vst [vmem:[#allocation2 + $0x538] sm:$0xff] %v1753_v11  ;;  %1351 = vmatprep.mubr.bf16.mxu0 %v4991_v3  ;;  %2024 = vmatprep.mubr.bf16.mxu1 %v4991_v3  ;;  %v4547_v10 = vld [vmem:[#allocation7 + $0x198] sm:$0xff]  }
 0x1d5   :  { %v1083_v12 = vpop.f32.mrb[84].mxu0  ;;  %v1756_v13 = vpop.f32.mrb[84].mxu1 }
 0x1d6   :  { %v1084_v14 = vadd.f32 %v1083_v12, %v5147_v5  ;;  %v1757_v15 = vadd.f32 %v1756_v13, %v5149_v6  ;;  %v1085_v16 = vpop.f32.mrb[85].mxu0  ;;  %v1758_v17 = vpop.f32.mrb[85].mxu1 }
 0x1d7   :  { %v1086_v19 = vadd.f32 %v1085_v16, %v5151_v7  ;;  %v1759_v20 = vadd.f32 %v1758_v17, %v5153_v8  ;;  %v1087_v21 = vpop.f32.mrb[86].mxu0  ;;  %v1760_v22 = vpop.f32.mrb[86].mxu1 }
 0x1d8   :  { %2353 = vst [vmem:[#allocation2 + $0x540] sm:$0xff] %v1084_v14  ;;  %2355 = vst [vmem:[#allocation2 + $0x550] sm:$0xff] %v1757_v15  ;;  %v1088_v23 = vadd.f32 %v1087_v21, %v5147_v5  ;;  %v1761_v24 = vadd.f32 %v1760_v22, %v5149_v6  ;;  %v1089_v25 = vpop.f32.mrb[87].mxu0  ;;  %v1762_v26 = vpop.f32.mrb[87].mxu1 }
 0x1d9   :  { %2354 = vst [vmem:[#allocation2 + $0x548] sm:$0xff] %v1086_v19  ;;  %2356 = vst [vmem:[#allocation2 + $0x558] sm:$0xff] %v1759_v20  ;;  %v1090_v27 = vadd.f32 %v1089_v25, %v5151_v7  ;;  %v1763_v28 = vadd.f32 %v1762_v26, %v5153_v8 }
 0x1da   :  { %2357 = vst [vmem:[#allocation2 + $0x560] sm:$0xff] %v1088_v23  ;;  %2359 = vst [vmem:[#allocation2 + $0x570] sm:$0xff] %v1761_v24  ;;  %1352 = vmatmul.mubr.bf16.gmra.mrb[192].mxu0 %v4544_v18  ;;  %2025 = vmatmul.mubr.bf16.gmra.mrb[192].mxu1 %v4544_v18 }
 0x1db   :  { %2358 = vst [vmem:[#allocation2 + $0x568] sm:$0xff] %v1090_v27  ;;  %2360 = vst [vmem:[#allocation2 + $0x578] sm:$0xff] %v1763_v28  ;;  %1361 = vmatprep.mubr.bf16.mxu0 %v4991_v3  ;;  %2034 = vmatprep.mubr.bf16.mxu1 %v4991_v3  ;;  %v4548_v27 = vld [vmem:[#allocation7 + $0x1a0] sm:$0xff]  }
 0x1dd   :  { %v1093_v29 = vpop.f32.mrb[88].mxu0  ;;  %v1766_v30 = vpop.f32.mrb[88].mxu1 }
 0x1de   :  { %v1094_v31 = vadd.f32 %v1093_v29, %v5147_v5  ;;  %v1767_v32 = vadd.f32 %v1766_v30, %v5149_v6  ;;  %v1095_v33 = vpop.f32.mrb[89].mxu0  ;;  %v1768_v34 = vpop.f32.mrb[89].mxu1 }
 0x1df   :  { %v1096_v36 = vadd.f32 %v1095_v33, %v5151_v7  ;;  %v1769_v37 = vadd.f32 %v1768_v34, %v5153_v8  ;;  %v1097_v38 = vpop.f32.mrb[90].mxu0  ;;  %v1770_v39 = vpop.f32.mrb[90].mxu1 }
 0x1e0   :  { %2361 = vst [vmem:[#allocation2 + $0x580] sm:$0xff] %v1094_v31  ;;  %2363 = vst [vmem:[#allocation2 + $0x590] sm:$0xff] %v1767_v32  ;;  %v1098_v40 = vadd.f32 %v1097_v38, %v5147_v5  ;;  %v1771_v41 = vadd.f32 %v1770_v39, %v5149_v6  ;;  %v1099_v42 = vpop.f32.mrb[91].mxu0  ;;  %v1772_v43 = vpop.f32.mrb[91].mxu1 }
 0x1e1   :  { %2362 = vst [vmem:[#allocation2 + $0x588] sm:$0xff] %v1096_v36  ;;  %2364 = vst [vmem:[#allocation2 + $0x598] sm:$0xff] %v1769_v37  ;;  %v1100_v44 = vadd.f32 %v1099_v42, %v5151_v7  ;;  %v1773_v45 = vadd.f32 %v1772_v43, %v5153_v8 }
 0x1e2   :  { %2365 = vst [vmem:[#allocation2 + $0x5a0] sm:$0xff] %v1098_v40  ;;  %2367 = vst [vmem:[#allocation2 + $0x5b0] sm:$0xff] %v1771_v41  ;;  %1362 = vmatmul.mubr.bf16.gmra.mrb[196].mxu0 %v4545_v35  ;;  %2035 = vmatmul.mubr.bf16.gmra.mrb[196].mxu1 %v4545_v35 }
 0x1e3   :  { %2366 = vst [vmem:[#allocation2 + $0x5a8] sm:$0xff] %v1100_v44  ;;  %2368 = vst [vmem:[#allocation2 + $0x5b8] sm:$0xff] %v1773_v45  ;;  %1371 = vmatprep.mubr.bf16.mxu0 %v4991_v3  ;;  %2044 = vmatprep.mubr.bf16.mxu1 %v4991_v3  ;;  %v4549_v44 = vld [vmem:[#allocation7 + $0x1a8] sm:$0xff]  }
 0x1e5   :  { %v1103_v46 = vpop.f32.mrb[92].mxu0  ;;  %v1776_v47 = vpop.f32.mrb[92].mxu1 }
 0x1e6   :  { %v1104_v48 = vadd.f32 %v1103_v46, %v5147_v5  ;;  %v1777_v49 = vadd.f32 %v1776_v47, %v5149_v6  ;;  %v1105_v50 = vpop.f32.mrb[93].mxu0  ;;  %v1778_v51 = vpop.f32.mrb[93].mxu1 }
 0x1e7   :  { %v1106_v53 = vadd.f32 %v1105_v50, %v5151_v7  ;;  %v1779_v54 = vadd.f32 %v1778_v51, %v5153_v8  ;;  %v1107_v55 = vpop.f32.mrb[94].mxu0  ;;  %v1780_v56 = vpop.f32.mrb[94].mxu1 }
 0x1e8   :  { %2369 = vst [vmem:[#allocation2 + $0x5c0] sm:$0xff] %v1104_v48  ;;  %2371 = vst [vmem:[#allocation2 + $0x5d0] sm:$0xff] %v1777_v49  ;;  %v1108_v57 = vadd.f32 %v1107_v55, %v5147_v5  ;;  %v1781_v58 = vadd.f32 %v1780_v56, %v5149_v6  ;;  %v1109_v59 = vpop.f32.mrb[95].mxu0  ;;  %v1782_v60 = vpop.f32.mrb[95].mxu1 }
 0x1e9   :  { %2370 = vst [vmem:[#allocation2 + $0x5c8] sm:$0xff] %v1106_v53  ;;  %2372 = vst [vmem:[#allocation2 + $0x5d8] sm:$0xff] %v1779_v54  ;;  %v1110_v61 = vadd.f32 %v1109_v59, %v5151_v7  ;;  %v1783_v62 = vadd.f32 %v1782_v60, %v5153_v8 }
 0x1ea   :  { %2373 = vst [vmem:[#allocation2 + $0x5e0] sm:$0xff] %v1108_v57  ;;  %2375 = vst [vmem:[#allocation2 + $0x5f0] sm:$0xff] %v1781_v58  ;;  %1372 = vmatmul.mubr.bf16.gmra.mrb[200].mxu0 %v4546_v52  ;;  %2045 = vmatmul.mubr.bf16.gmra.mrb[200].mxu1 %v4546_v52 }
 0x1eb   :  { %2374 = vst [vmem:[#allocation2 + $0x5e8] sm:$0xff] %v1110_v61  ;;  %2376 = vst [vmem:[#allocation2 + $0x5f8] sm:$0xff] %v1783_v62  ;;  %1381 = vmatprep.mubr.bf16.mxu0 %v4991_v3  ;;  %2054 = vmatprep.mubr.bf16.mxu1 %v4991_v3  ;;  %v4550_v61 = vld [vmem:[#allocation7 + $0x1b0] sm:$0xff]  }
 0x1ed   :  { %v1113_v63 = vpop.f32.mrb[96].mxu0  ;;  %v1786_v0 = vpop.f32.mrb[96].mxu1 }
 0x1ee   :  { %v1114_v1 = vadd.f32 %v1113_v63, %v5147_v5  ;;  %v1787_v2 = vadd.f32 %v1786_v0, %v5149_v6  ;;  %v1115_v4 = vpop.f32.mrb[97].mxu0  ;;  %v1788_v9 = vpop.f32.mrb[97].mxu1 }
 0x1ef   :  { %v1116_v11 = vadd.f32 %v1115_v4, %v5151_v7  ;;  %v1789_v12 = vadd.f32 %v1788_v9, %v5153_v8  ;;  %v1117_v13 = vpop.f32.mrb[98].mxu0  ;;  %v1790_v14 = vpop.f32.mrb[98].mxu1 }
 0x1f0   :  { %2377 = vst [vmem:[#allocation2 + $0x600] sm:$0xff] %v1114_v1  ;;  %2379 = vst [vmem:[#allocation2 + $0x610] sm:$0xff] %v1787_v2  ;;  %v1118_v15 = vadd.f32 %v1117_v13, %v5147_v5  ;;  %v1791_v16 = vadd.f32 %v1790_v14, %v5149_v6  ;;  %v1119_v17 = vpop.f32.mrb[99].mxu0  ;;  %v1792_v18 = vpop.f32.mrb[99].mxu1 }
 0x1f1   :  { %2378 = vst [vmem:[#allocation2 + $0x608] sm:$0xff] %v1116_v11  ;;  %2380 = vst [vmem:[#allocation2 + $0x618] sm:$0xff] %v1789_v12  ;;  %v1120_v19 = vadd.f32 %v1119_v17, %v5151_v7  ;;  %v1793_v20 = vadd.f32 %v1792_v18, %v5153_v8 }
 0x1f2   :  { %2381 = vst [vmem:[#allocation2 + $0x620] sm:$0xff] %v1118_v15  ;;  %2383 = vst [vmem:[#allocation2 + $0x630] sm:$0xff] %v1791_v16  ;;  %1382 = vmatmul.mubr.bf16.gmra.mrb[204].mxu0 %v4547_v10  ;;  %2055 = vmatmul.mubr.bf16.gmra.mrb[204].mxu1 %v4547_v10 }
 0x1f3   :  { %2382 = vst [vmem:[#allocation2 + $0x628] sm:$0xff] %v1120_v19  ;;  %2384 = vst [vmem:[#allocation2 + $0x638] sm:$0xff] %v1793_v20  ;;  %1391 = vmatprep.mubr.bf16.mxu0 %v4991_v3  ;;  %2064 = vmatprep.mubr.bf16.mxu1 %v4991_v3  ;;  %v4551_v19 = vld [vmem:[#allocation7 + $0x1b8] sm:$0xff]  }
 0x1f5   :  { %v1123_v21 = vpop.f32.mrb[100].mxu0  ;;  %v1796_v22 = vpop.f32.mrb[100].mxu1 }
 0x1f6   :  { %v1124_v23 = vadd.f32 %v1123_v21, %v5147_v5  ;;  %v1797_v24 = vadd.f32 %v1796_v22, %v5149_v6  ;;  %v1125_v25 = vpop.f32.mrb[101].mxu0  ;;  %v1798_v26 = vpop.f32.mrb[101].mxu1 }
 0x1f7   :  { %v1126_v28 = vadd.f32 %v1125_v25, %v5151_v7  ;;  %v1799_v29 = vadd.f32 %v1798_v26, %v5153_v8  ;;  %v1127_v30 = vpop.f32.mrb[102].mxu0  ;;  %v1800_v31 = vpop.f32.mrb[102].mxu1 }
 0x1f8   :  { %2385 = vst [vmem:[#allocation2 + $0x640] sm:$0xff] %v1124_v23  ;;  %2387 = vst [vmem:[#allocation2 + $0x650] sm:$0xff] %v1797_v24  ;;  %v1128_v32 = vadd.f32 %v1127_v30, %v5147_v5  ;;  %v1801_v33 = vadd.f32 %v1800_v31, %v5149_v6  ;;  %v1129_v34 = vpop.f32.mrb[103].mxu0  ;;  %v1802_v35 = vpop.f32.mrb[103].mxu1 }
 0x1f9   :  { %2386 = vst [vmem:[#allocation2 + $0x648] sm:$0xff] %v1126_v28  ;;  %2388 = vst [vmem:[#allocation2 + $0x658] sm:$0xff] %v1799_v29  ;;  %v1130_v36 = vadd.f32 %v1129_v34, %v5151_v7  ;;  %v1803_v37 = vadd.f32 %v1802_v35, %v5153_v8 }
 0x1fa   :  { %2389 = vst [vmem:[#allocation2 + $0x660] sm:$0xff] %v1128_v32  ;;  %2391 = vst [vmem:[#allocation2 + $0x670] sm:$0xff] %v1801_v33  ;;  %1392 = vmatmul.mubr.bf16.gmra.mrb[208].mxu0 %v4548_v27  ;;  %2065 = vmatmul.mubr.bf16.gmra.mrb[208].mxu1 %v4548_v27 }
 0x1fb   :  { %2390 = vst [vmem:[#allocation2 + $0x668] sm:$0xff] %v1130_v36  ;;  %2392 = vst [vmem:[#allocation2 + $0x678] sm:$0xff] %v1803_v37  ;;  %1401 = vmatprep.mubr.bf16.mxu0 %v4991_v3  ;;  %2074 = vmatprep.mubr.bf16.mxu1 %v4991_v3  ;;  %v4552_v36 = vld [vmem:[#allocation7 + $0x1c0] sm:$0xff]  }
 0x1fd   :  { %v1133_v38 = vpop.f32.mrb[104].mxu0  ;;  %v1806_v39 = vpop.f32.mrb[104].mxu1 }
 0x1fe   :  { %v1134_v40 = vadd.f32 %v1133_v38, %v5147_v5  ;;  %v1807_v41 = vadd.f32 %v1806_v39, %v5149_v6  ;;  %v1135_v42 = vpop.f32.mrb[105].mxu0  ;;  %v1808_v43 = vpop.f32.mrb[105].mxu1 }
 0x1ff   :  { %v1136_v45 = vadd.f32 %v1135_v42, %v5151_v7  ;;  %v1809_v46 = vadd.f32 %v1808_v43, %v5153_v8  ;;  %v1137_v47 = vpop.f32.mrb[106].mxu0  ;;  %v1810_v48 = vpop.f32.mrb[106].mxu1 }
 0x200   :  { %2393 = vst [vmem:[#allocation2 + $0x680] sm:$0xff] %v1134_v40  ;;  %2395 = vst [vmem:[#allocation2 + $0x690] sm:$0xff] %v1807_v41  ;;  %v1138_v49 = vadd.f32 %v1137_v47, %v5147_v5  ;;  %v1811_v50 = vadd.f32 %v1810_v48, %v5149_v6  ;;  %v1139_v51 = vpop.f32.mrb[107].mxu0  ;;  %v1812_v52 = vpop.f32.mrb[107].mxu1 }
 0x201   :  { %2394 = vst [vmem:[#allocation2 + $0x688] sm:$0xff] %v1136_v45  ;;  %2396 = vst [vmem:[#allocation2 + $0x698] sm:$0xff] %v1809_v46  ;;  %v1140_v53 = vadd.f32 %v1139_v51, %v5151_v7  ;;  %v1813_v54 = vadd.f32 %v1812_v52, %v5153_v8 }
 0x202   :  { %2397 = vst [vmem:[#allocation2 + $0x6a0] sm:$0xff] %v1138_v49  ;;  %2399 = vst [vmem:[#allocation2 + $0x6b0] sm:$0xff] %v1811_v50  ;;  %1402 = vmatmul.mubr.bf16.gmra.mrb[212].mxu0 %v4549_v44  ;;  %2075 = vmatmul.mubr.bf16.gmra.mrb[212].mxu1 %v4549_v44 }
 0x203   :  { %2398 = vst [vmem:[#allocation2 + $0x6a8] sm:$0xff] %v1140_v53  ;;  %2400 = vst [vmem:[#allocation2 + $0x6b8] sm:$0xff] %v1813_v54  ;;  %1411 = vmatprep.mubr.bf16.mxu0 %v4991_v3  ;;  %2084 = vmatprep.mubr.bf16.mxu1 %v4991_v3  ;;  %v4553_v53 = vld [vmem:[#allocation7 + $0x1c8] sm:$0xff]  }
 0x205   :  { %v1143_v55 = vpop.f32.mrb[108].mxu0  ;;  %v1816_v56 = vpop.f32.mrb[108].mxu1 }
 0x206   :  { %v1144_v57 = vadd.f32 %v1143_v55, %v5147_v5  ;;  %v1817_v58 = vadd.f32 %v1816_v56, %v5149_v6  ;;  %v1145_v59 = vpop.f32.mrb[109].mxu0  ;;  %v1818_v60 = vpop.f32.mrb[109].mxu1 }
 0x207   :  { %v1146_v62 = vadd.f32 %v1145_v59, %v5151_v7  ;;  %v1819_v63 = vadd.f32 %v1818_v60, %v5153_v8  ;;  %v1147_v0 = vpop.f32.mrb[110].mxu0  ;;  %v1820_v1 = vpop.f32.mrb[110].mxu1 }
 0x208   :  { %2401 = vst [vmem:[#allocation2 + $0x6c0] sm:$0xff] %v1144_v57  ;;  %2403 = vst [vmem:[#allocation2 + $0x6d0] sm:$0xff] %v1817_v58  ;;  %v1148_v2 = vadd.f32 %v1147_v0, %v5147_v5  ;;  %v1821_v4 = vadd.f32 %v1820_v1, %v5149_v6  ;;  %v1149_v9 = vpop.f32.mrb[111].mxu0  ;;  %v1822_v10 = vpop.f32.mrb[111].mxu1 }
 0x209   :  { %2402 = vst [vmem:[#allocation2 + $0x6c8] sm:$0xff] %v1146_v62  ;;  %2404 = vst [vmem:[#allocation2 + $0x6d8] sm:$0xff] %v1819_v63  ;;  %v1150_v11 = vadd.f32 %v1149_v9, %v5151_v7  ;;  %v1823_v12 = vadd.f32 %v1822_v10, %v5153_v8 }
 0x20a   :  { %2405 = vst [vmem:[#allocation2 + $0x6e0] sm:$0xff] %v1148_v2  ;;  %2407 = vst [vmem:[#allocation2 + $0x6f0] sm:$0xff] %v1821_v4  ;;  %1412 = vmatmul.mubr.bf16.gmra.mrb[216].mxu0 %v4550_v61  ;;  %2085 = vmatmul.mubr.bf16.gmra.mrb[216].mxu1 %v4550_v61 }
 0x20b   :  { %2406 = vst [vmem:[#allocation2 + $0x6e8] sm:$0xff] %v1150_v11  ;;  %2408 = vst [vmem:[#allocation2 + $0x6f8] sm:$0xff] %v1823_v12  ;;  %1421 = vmatprep.mubr.bf16.mxu0 %v4991_v3  ;;  %2094 = vmatprep.mubr.bf16.mxu1 %v4991_v3  ;;  %v4554_v11 = vld [vmem:[#allocation7 + $0x1d0] sm:$0xff]  }
 0x20d   :  { %v1153_v13 = vpop.f32.mrb[112].mxu0  ;;  %v1826_v14 = vpop.f32.mrb[112].mxu1 }
 0x20e   :  { %v1154_v15 = vadd.f32 %v1153_v13, %v5147_v5  ;;  %v1827_v16 = vadd.f32 %v1826_v14, %v5149_v6  ;;  %v1155_v17 = vpop.f32.mrb[113].mxu0  ;;  %v1828_v18 = vpop.f32.mrb[113].mxu1 }
 0x20f   :  { %v1156_v20 = vadd.f32 %v1155_v17, %v5151_v7  ;;  %v1829_v21 = vadd.f32 %v1828_v18, %v5153_v8  ;;  %v1157_v22 = vpop.f32.mrb[114].mxu0  ;;  %v1830_v23 = vpop.f32.mrb[114].mxu1 }
 0x210   :  { %2409 = vst [vmem:[#allocation2 + $0x700] sm:$0xff] %v1154_v15  ;;  %2411 = vst [vmem:[#allocation2 + $0x710] sm:$0xff] %v1827_v16  ;;  %v1158_v24 = vadd.f32 %v1157_v22, %v5147_v5  ;;  %v1831_v25 = vadd.f32 %v1830_v23, %v5149_v6  ;;  %v1159_v26 = vpop.f32.mrb[115].mxu0  ;;  %v1832_v27 = vpop.f32.mrb[115].mxu1 }
 0x211   :  { %2410 = vst [vmem:[#allocation2 + $0x708] sm:$0xff] %v1156_v20  ;;  %2412 = vst [vmem:[#allocation2 + $0x718] sm:$0xff] %v1829_v21  ;;  %v1160_v28 = vadd.f32 %v1159_v26, %v5151_v7  ;;  %v1833_v29 = vadd.f32 %v1832_v27, %v5153_v8 }
 0x212   :  { %2413 = vst [vmem:[#allocation2 + $0x720] sm:$0xff] %v1158_v24  ;;  %2415 = vst [vmem:[#allocation2 + $0x730] sm:$0xff] %v1831_v25  ;;  %1422 = vmatmul.mubr.bf16.gmra.mrb[220].mxu0 %v4551_v19  ;;  %2095 = vmatmul.mubr.bf16.gmra.mrb[220].mxu1 %v4551_v19 }
 0x213   :  { %2414 = vst [vmem:[#allocation2 + $0x728] sm:$0xff] %v1160_v28  ;;  %2416 = vst [vmem:[#allocation2 + $0x738] sm:$0xff] %v1833_v29  ;;  %1431 = vmatprep.mubr.bf16.mxu0 %v4991_v3  ;;  %2104 = vmatprep.mubr.bf16.mxu1 %v4991_v3  ;;  %v4555_v28 = vld [vmem:[#allocation7 + $0x1d8] sm:$0xff]  }
 0x215   :  { %v1163_v30 = vpop.f32.mrb[116].mxu0  ;;  %v1836_v31 = vpop.f32.mrb[116].mxu1 }
 0x216   :  { %v1164_v32 = vadd.f32 %v1163_v30, %v5147_v5  ;;  %v1837_v33 = vadd.f32 %v1836_v31, %v5149_v6  ;;  %v1165_v34 = vpop.f32.mrb[117].mxu0  ;;  %v1838_v35 = vpop.f32.mrb[117].mxu1 }
 0x217   :  { %v1166_v37 = vadd.f32 %v1165_v34, %v5151_v7  ;;  %v1839_v38 = vadd.f32 %v1838_v35, %v5153_v8  ;;  %v1167_v39 = vpop.f32.mrb[118].mxu0  ;;  %v1840_v40 = vpop.f32.mrb[118].mxu1 }
 0x218   :  { %2417 = vst [vmem:[#allocation2 + $0x740] sm:$0xff] %v1164_v32  ;;  %2419 = vst [vmem:[#allocation2 + $0x750] sm:$0xff] %v1837_v33  ;;  %v1168_v41 = vadd.f32 %v1167_v39, %v5147_v5  ;;  %v1841_v42 = vadd.f32 %v1840_v40, %v5149_v6  ;;  %v1169_v43 = vpop.f32.mrb[119].mxu0  ;;  %v1842_v44 = vpop.f32.mrb[119].mxu1 }
 0x219   :  { %2418 = vst [vmem:[#allocation2 + $0x748] sm:$0xff] %v1166_v37  ;;  %2420 = vst [vmem:[#allocation2 + $0x758] sm:$0xff] %v1839_v38  ;;  %v1170_v45 = vadd.f32 %v1169_v43, %v5151_v7  ;;  %v1843_v46 = vadd.f32 %v1842_v44, %v5153_v8 }
 0x21a   :  { %2421 = vst [vmem:[#allocation2 + $0x760] sm:$0xff] %v1168_v41  ;;  %2423 = vst [vmem:[#allocation2 + $0x770] sm:$0xff] %v1841_v42  ;;  %1432 = vmatmul.mubr.bf16.gmra.mrb[224].mxu0 %v4552_v36  ;;  %2105 = vmatmul.mubr.bf16.gmra.mrb[224].mxu1 %v4552_v36 }
 0x21b   :  { %2422 = vst [vmem:[#allocation2 + $0x768] sm:$0xff] %v1170_v45  ;;  %2424 = vst [vmem:[#allocation2 + $0x778] sm:$0xff] %v1843_v46  ;;  %1441 = vmatprep.mubr.bf16.mxu0 %v4991_v3  ;;  %2114 = vmatprep.mubr.bf16.mxu1 %v4991_v3  ;;  %v4556_v45 = vld [vmem:[#allocation7 + $0x1e0] sm:$0xff]  }
 0x21d   :  { %v1173_v47 = vpop.f32.mrb[120].mxu0  ;;  %v1846_v48 = vpop.f32.mrb[120].mxu1 }
 0x21e   :  { %v1174_v49 = vadd.f32 %v1173_v47, %v5147_v5  ;;  %v1847_v50 = vadd.f32 %v1846_v48, %v5149_v6  ;;  %v1175_v51 = vpop.f32.mrb[121].mxu0  ;;  %v1848_v52 = vpop.f32.mrb[121].mxu1 }
 0x21f   :  { %v1176_v54 = vadd.f32 %v1175_v51, %v5151_v7  ;;  %v1849_v55 = vadd.f32 %v1848_v52, %v5153_v8  ;;  %v1177_v56 = vpop.f32.mrb[122].mxu0  ;;  %v1850_v57 = vpop.f32.mrb[122].mxu1 }
 0x220   :  { %2425 = vst [vmem:[#allocation2 + $0x780] sm:$0xff] %v1174_v49  ;;  %2427 = vst [vmem:[#allocation2 + $0x790] sm:$0xff] %v1847_v50  ;;  %v1178_v58 = vadd.f32 %v1177_v56, %v5147_v5  ;;  %v1851_v59 = vadd.f32 %v1850_v57, %v5149_v6  ;;  %v1179_v60 = vpop.f32.mrb[123].mxu0  ;;  %v1852_v61 = vpop.f32.mrb[123].mxu1 }
 0x221   :  { %2426 = vst [vmem:[#allocation2 + $0x788] sm:$0xff] %v1176_v54  ;;  %2428 = vst [vmem:[#allocation2 + $0x798] sm:$0xff] %v1849_v55  ;;  %v1180_v62 = vadd.f32 %v1179_v60, %v5151_v7  ;;  %v1853_v63 = vadd.f32 %v1852_v61, %v5153_v8 }
 0x222   :  { %2429 = vst [vmem:[#allocation2 + $0x7a0] sm:$0xff] %v1178_v58  ;;  %2431 = vst [vmem:[#allocation2 + $0x7b0] sm:$0xff] %v1851_v59  ;;  %1442 = vmatmul.mubr.bf16.gmra.mrb[228].mxu0 %v4553_v53  ;;  %2115 = vmatmul.mubr.bf16.gmra.mrb[228].mxu1 %v4553_v53 }
 0x223   :  { %2430 = vst [vmem:[#allocation2 + $0x7a8] sm:$0xff] %v1180_v62  ;;  %2432 = vst [vmem:[#allocation2 + $0x7b8] sm:$0xff] %v1853_v63  ;;  %1451 = vmatprep.mubr.bf16.mxu0 %v4991_v3  ;;  %2124 = vmatprep.mubr.bf16.mxu1 %v4991_v3  ;;  %v4557_v62 = vld [vmem:[#allocation7 + $0x1e8] sm:$0xff]  }
 0x225   :  { %v1183_v0 = vpop.f32.mrb[124].mxu0  ;;  %v1856_v1 = vpop.f32.mrb[124].mxu1 }
 0x226   :  { %v1184_v2 = vadd.f32 %v1183_v0, %v5147_v5  ;;  %v1857_v4 = vadd.f32 %v1856_v1, %v5149_v6  ;;  %v1185_v9 = vpop.f32.mrb[125].mxu0  ;;  %v1858_v10 = vpop.f32.mrb[125].mxu1 }
 0x227   :  { %v1186_v12 = vadd.f32 %v1185_v9, %v5151_v7  ;;  %v1859_v13 = vadd.f32 %v1858_v10, %v5153_v8  ;;  %v1187_v14 = vpop.f32.mrb[126].mxu0  ;;  %v1860_v15 = vpop.f32.mrb[126].mxu1 }
 0x228   :  { %2433 = vst [vmem:[#allocation2 + $0x7c0] sm:$0xff] %v1184_v2  ;;  %2435 = vst [vmem:[#allocation2 + $0x7d0] sm:$0xff] %v1857_v4  ;;  %v1188_v16 = vadd.f32 %v1187_v14, %v5147_v5  ;;  %v1861_v17 = vadd.f32 %v1860_v15, %v5149_v6  ;;  %v1189_v18 = vpop.f32.mrb[127].mxu0  ;;  %v1862_v19 = vpop.f32.mrb[127].mxu1 }
 0x229   :  { %2434 = vst [vmem:[#allocation2 + $0x7c8] sm:$0xff] %v1186_v12  ;;  %2436 = vst [vmem:[#allocation2 + $0x7d8] sm:$0xff] %v1859_v13  ;;  %v1190_v20 = vadd.f32 %v1189_v18, %v5151_v7  ;;  %v1863_v21 = vadd.f32 %v1862_v19, %v5153_v8 }
 0x22a   :  { %2437 = vst [vmem:[#allocation2 + $0x7e0] sm:$0xff] %v1188_v16  ;;  %2439 = vst [vmem:[#allocation2 + $0x7f0] sm:$0xff] %v1861_v17  ;;  %1452 = vmatmul.mubr.bf16.gmra.mrb[232].mxu0 %v4554_v11  ;;  %2125 = vmatmul.mubr.bf16.gmra.mrb[232].mxu1 %v4554_v11 }
 0x22b   :  { %2438 = vst [vmem:[#allocation2 + $0x7e8] sm:$0xff] %v1190_v20  ;;  %2440 = vst [vmem:[#allocation2 + $0x7f8] sm:$0xff] %v1863_v21  ;;  %1461 = vmatprep.mubr.bf16.mxu0 %v4991_v3  ;;  %2134 = vmatprep.mubr.bf16.mxu1 %v4991_v3  ;;  %v4558_v20 = vld [vmem:[#allocation7 + $0x1f0] sm:$0xff]  }
 0x22d   :  { %v1193_v22 = vpop.f32.mrb[128].mxu0  ;;  %v1866_v23 = vpop.f32.mrb[128].mxu1 }
 0x22e   :  { %v1194_v24 = vadd.f32 %v1193_v22, %v5147_v5  ;;  %v1867_v25 = vadd.f32 %v1866_v23, %v5149_v6  ;;  %v1195_v26 = vpop.f32.mrb[129].mxu0  ;;  %v1868_v27 = vpop.f32.mrb[129].mxu1 }
 0x22f   :  { %v1196_v29 = vadd.f32 %v1195_v26, %v5151_v7  ;;  %v1869_v30 = vadd.f32 %v1868_v27, %v5153_v8  ;;  %v1197_v31 = vpop.f32.mrb[130].mxu0  ;;  %v1870_v32 = vpop.f32.mrb[130].mxu1 }
 0x230   :  { %2441 = vst [vmem:[#allocation2 + $0x800] sm:$0xff] %v1194_v24  ;;  %2443 = vst [vmem:[#allocation2 + $0x810] sm:$0xff] %v1867_v25  ;;  %v1198_v33 = vadd.f32 %v1197_v31, %v5147_v5  ;;  %v1871_v34 = vadd.f32 %v1870_v32, %v5149_v6  ;;  %v1199_v35 = vpop.f32.mrb[131].mxu0  ;;  %v1872_v36 = vpop.f32.mrb[131].mxu1 }
 0x231   :  { %2442 = vst [vmem:[#allocation2 + $0x808] sm:$0xff] %v1196_v29  ;;  %2444 = vst [vmem:[#allocation2 + $0x818] sm:$0xff] %v1869_v30  ;;  %v1200_v37 = vadd.f32 %v1199_v35, %v5151_v7  ;;  %v1873_v38 = vadd.f32 %v1872_v36, %v5153_v8 }
 0x232   :  { %2445 = vst [vmem:[#allocation2 + $0x820] sm:$0xff] %v1198_v33  ;;  %2447 = vst [vmem:[#allocation2 + $0x830] sm:$0xff] %v1871_v34  ;;  %1462 = vmatmul.mubr.bf16.gmra.mrb[236].mxu0 %v4555_v28  ;;  %2135 = vmatmul.mubr.bf16.gmra.mrb[236].mxu1 %v4555_v28 }
 0x233   :  { %2446 = vst [vmem:[#allocation2 + $0x828] sm:$0xff] %v1200_v37  ;;  %2448 = vst [vmem:[#allocation2 + $0x838] sm:$0xff] %v1873_v38  ;;  %1471 = vmatprep.mubr.bf16.mxu0 %v4991_v3  ;;  %2144 = vmatprep.mubr.bf16.mxu1 %v4991_v3  ;;  %v4559_v37 = vld [vmem:[#allocation7 + $0x1f8] sm:$0xff]  }
 0x235   :  { %v1203_v39 = vpop.f32.mrb[132].mxu0  ;;  %v1876_v40 = vpop.f32.mrb[132].mxu1 }
 0x236   :  { %v1204_v41 = vadd.f32 %v1203_v39, %v5147_v5  ;;  %v1877_v42 = vadd.f32 %v1876_v40, %v5149_v6  ;;  %v1205_v43 = vpop.f32.mrb[133].mxu0  ;;  %v1878_v44 = vpop.f32.mrb[133].mxu1 }
 0x237   :  { %v1206_v46 = vadd.f32 %v1205_v43, %v5151_v7  ;;  %v1879_v47 = vadd.f32 %v1878_v44, %v5153_v8  ;;  %v1207_v48 = vpop.f32.mrb[134].mxu0  ;;  %v1880_v49 = vpop.f32.mrb[134].mxu1 }
 0x238   :  { %2449 = vst [vmem:[#allocation2 + $0x840] sm:$0xff] %v1204_v41  ;;  %2451 = vst [vmem:[#allocation2 + $0x850] sm:$0xff] %v1877_v42  ;;  %v1208_v50 = vadd.f32 %v1207_v48, %v5147_v5  ;;  %v1881_v51 = vadd.f32 %v1880_v49, %v5149_v6  ;;  %v1209_v52 = vpop.f32.mrb[135].mxu0  ;;  %v1882_v53 = vpop.f32.mrb[135].mxu1 }
 0x239   :  { %2450 = vst [vmem:[#allocation2 + $0x848] sm:$0xff] %v1206_v46  ;;  %2452 = vst [vmem:[#allocation2 + $0x858] sm:$0xff] %v1879_v47  ;;  %v1210_v54 = vadd.f32 %v1209_v52, %v5151_v7  ;;  %v1883_v55 = vadd.f32 %v1882_v53, %v5153_v8 }
 0x23a   :  { %2453 = vst [vmem:[#allocation2 + $0x860] sm:$0xff] %v1208_v50  ;;  %2455 = vst [vmem:[#allocation2 + $0x870] sm:$0xff] %v1881_v51  ;;  %1472 = vmatmul.mubr.bf16.gmra.mrb[240].mxu0 %v4556_v45  ;;  %2145 = vmatmul.mubr.bf16.gmra.mrb[240].mxu1 %v4556_v45 }
 0x23b   :  { %2454 = vst [vmem:[#allocation2 + $0x868] sm:$0xff] %v1210_v54  ;;  %2456 = vst [vmem:[#allocation2 + $0x878] sm:$0xff] %v1883_v55  ;;  %1481 = vmatprep.mubr.bf16.mxu0 %v4991_v3  ;;  %2154 = vmatprep.mubr.bf16.mxu1 %v4991_v3 }
 0x23d   :  { %v1213_v56 = vpop.f32.mrb[136].mxu0  ;;  %v1886_v57 = vpop.f32.mrb[136].mxu1 }
 0x23e   :  { %v1214_v58 = vadd.f32 %v1213_v56, %v5147_v5  ;;  %v1887_v59 = vadd.f32 %v1886_v57, %v5149_v6  ;;  %v1215_v60 = vpop.f32.mrb[137].mxu0  ;;  %v1888_v61 = vpop.f32.mrb[137].mxu1 }
 0x23f   :  { %v1216_v63 = vadd.f32 %v1215_v60, %v5151_v7  ;;  %v1889_v0 = vadd.f32 %v1888_v61, %v5153_v8  ;;  %v1217_v1 = vpop.f32.mrb[138].mxu0  ;;  %v1890_v2 = vpop.f32.mrb[138].mxu1 }
 0x240   :  { %2457 = vst [vmem:[#allocation2 + $0x880] sm:$0xff] %v1214_v58  ;;  %2459 = vst [vmem:[#allocation2 + $0x890] sm:$0xff] %v1887_v59  ;;  %v1218_v4 = vadd.f32 %v1217_v1, %v5147_v5  ;;  %v1891_v9 = vadd.f32 %v1890_v2, %v5149_v6  ;;  %v1219_v10 = vpop.f32.mrb[139].mxu0  ;;  %v1892_v11 = vpop.f32.mrb[139].mxu1 }
 0x241   :  { %2458 = vst [vmem:[#allocation2 + $0x888] sm:$0xff] %v1216_v63  ;;  %2460 = vst [vmem:[#allocation2 + $0x898] sm:$0xff] %v1889_v0  ;;  %v1220_v12 = vadd.f32 %v1219_v10, %v5151_v7  ;;  %v1893_v13 = vadd.f32 %v1892_v11, %v5153_v8 }
 0x242   :  { %2461 = vst [vmem:[#allocation2 + $0x8a0] sm:$0xff] %v1218_v4  ;;  %2463 = vst [vmem:[#allocation2 + $0x8b0] sm:$0xff] %v1891_v9  ;;  %1482 = vmatmul.mubr.bf16.gmra.mrb[244].mxu0 %v4557_v62  ;;  %2155 = vmatmul.mubr.bf16.gmra.mrb[244].mxu1 %v4557_v62 }
 0x243   :  { %2462 = vst [vmem:[#allocation2 + $0x8a8] sm:$0xff] %v1220_v12  ;;  %2464 = vst [vmem:[#allocation2 + $0x8b8] sm:$0xff] %v1893_v13  ;;  %1491 = vmatprep.mubr.bf16.mxu0 %v4991_v3  ;;  %2164 = vmatprep.mubr.bf16.mxu1 %v4991_v3 }
 0x245   :  { %v1223_v14 = vpop.f32.mrb[140].mxu0  ;;  %v1896_v15 = vpop.f32.mrb[140].mxu1 }
 0x246   :  { %v1224_v16 = vadd.f32 %v1223_v14, %v5147_v5  ;;  %v1897_v17 = vadd.f32 %v1896_v15, %v5149_v6  ;;  %v1225_v18 = vpop.f32.mrb[141].mxu0  ;;  %v1898_v19 = vpop.f32.mrb[141].mxu1 }
 0x247   :  { %v1226_v21 = vadd.f32 %v1225_v18, %v5151_v7  ;;  %v1899_v22 = vadd.f32 %v1898_v19, %v5153_v8  ;;  %v1227_v23 = vpop.f32.mrb[142].mxu0  ;;  %v1900_v24 = vpop.f32.mrb[142].mxu1 }
 0x248   :  { %2465 = vst [vmem:[#allocation2 + $0x8c0] sm:$0xff] %v1224_v16  ;;  %2467 = vst [vmem:[#allocation2 + $0x8d0] sm:$0xff] %v1897_v17  ;;  %v1228_v25 = vadd.f32 %v1227_v23, %v5147_v5  ;;  %v1901_v26 = vadd.f32 %v1900_v24, %v5149_v6  ;;  %v1229_v27 = vpop.f32.mrb[143].mxu0  ;;  %v1902_v28 = vpop.f32.mrb[143].mxu1 }
 0x249   :  { %2466 = vst [vmem:[#allocation2 + $0x8c8] sm:$0xff] %v1226_v21  ;;  %2468 = vst [vmem:[#allocation2 + $0x8d8] sm:$0xff] %v1899_v22  ;;  %v1230_v29 = vadd.f32 %v1229_v27, %v5151_v7  ;;  %v1903_v30 = vadd.f32 %v1902_v28, %v5153_v8 }
 0x24a   :  { %2469 = vst [vmem:[#allocation2 + $0x8e0] sm:$0xff] %v1228_v25  ;;  %2471 = vst [vmem:[#allocation2 + $0x8f0] sm:$0xff] %v1901_v26  ;;  %1492 = vmatmul.mubr.bf16.gmra.mrb[248].mxu0 %v4558_v20  ;;  %2165 = vmatmul.mubr.bf16.gmra.mrb[248].mxu1 %v4558_v20 }
 0x24b   :  { %2470 = vst [vmem:[#allocation2 + $0x8e8] sm:$0xff] %v1230_v29  ;;  %2472 = vst [vmem:[#allocation2 + $0x8f8] sm:$0xff] %v1903_v30  ;;  %1501 = vmatprep.mubr.bf16.mxu0 %v4991_v3  ;;  %2174 = vmatprep.mubr.bf16.mxu1 %v4991_v3 }
 0x24d   :  { %v1233_v31 = vpop.f32.mrb[144].mxu0  ;;  %v1906_v32 = vpop.f32.mrb[144].mxu1 }
 0x24e   :  { %v1234_v33 = vadd.f32 %v1233_v31, %v5147_v5  ;;  %v1907_v34 = vadd.f32 %v1906_v32, %v5149_v6  ;;  %v1235_v35 = vpop.f32.mrb[145].mxu0  ;;  %v1908_v36 = vpop.f32.mrb[145].mxu1 }
 0x24f   :  { %v1236_v38 = vadd.f32 %v1235_v35, %v5151_v7  ;;  %v1909_v39 = vadd.f32 %v1908_v36, %v5153_v8  ;;  %v1237_v40 = vpop.f32.mrb[146].mxu0  ;;  %v1910_v41 = vpop.f32.mrb[146].mxu1 }
 0x250   :  { %2473 = vst [vmem:[#allocation2 + $0x900] sm:$0xff] %v1234_v33  ;;  %2475 = vst [vmem:[#allocation2 + $0x910] sm:$0xff] %v1907_v34  ;;  %v1238_v42 = vadd.f32 %v1237_v40, %v5147_v5  ;;  %v1911_v3 = vadd.f32 %v1910_v41, %v5149_v6  ;;  %v1239_v43 = vpop.f32.mrb[147].mxu0  ;;  %v1912_v44 = vpop.f32.mrb[147].mxu1 }
 0x251   :  { %2474 = vst [vmem:[#allocation2 + $0x908] sm:$0xff] %v1236_v38  ;;  %2476 = vst [vmem:[#allocation2 + $0x918] sm:$0xff] %v1909_v39  ;;  %v1240_v45 = vadd.f32 %v1239_v43, %v5151_v7  ;;  %v1913_v46 = vadd.f32 %v1912_v44, %v5153_v8 }
 0x252   :  { %2477 = vst [vmem:[#allocation2 + $0x920] sm:$0xff] %v1238_v42  ;;  %2479 = vst [vmem:[#allocation2 + $0x930] sm:$0xff] %v1911_v3  ;;  %1502 = vmatmul.mubr.bf16.gmra.mrb[252].mxu0 %v4559_v37  ;;  %2175 = vmatmul.mubr.bf16.gmra.mrb[252].mxu1 %v4559_v37 }
 0x253   :  { %2478 = vst [vmem:[#allocation2 + $0x928] sm:$0xff] %v1240_v45  ;;  %2480 = vst [vmem:[#allocation2 + $0x938] sm:$0xff] %v1913_v46 }
 0x255   :  { %v1243_v47 = vpop.f32.mrb[148].mxu0  ;;  %v1916_v48 = vpop.f32.mrb[148].mxu1 }
 0x256   :  { %v1244_v49 = vadd.f32 %v1243_v47, %v5147_v5  ;;  %v1917_v50 = vadd.f32 %v1916_v48, %v5149_v6  ;;  %v1245_v51 = vpop.f32.mrb[149].mxu0  ;;  %v1918_v52 = vpop.f32.mrb[149].mxu1 }
 0x257   :  { %v1246_v53 = vadd.f32 %v1245_v51, %v5151_v7  ;;  %v1919_v54 = vadd.f32 %v1918_v52, %v5153_v8  ;;  %v1247_v55 = vpop.f32.mrb[150].mxu0  ;;  %v1920_v56 = vpop.f32.mrb[150].mxu1 }
 0x258   :  { %2481 = vst [vmem:[#allocation2 + $0x940] sm:$0xff] %v1244_v49  ;;  %2483 = vst [vmem:[#allocation2 + $0x950] sm:$0xff] %v1917_v50  ;;  %v1248_v57 = vadd.f32 %v1247_v55, %v5147_v5  ;;  %v1921_v58 = vadd.f32 %v1920_v56, %v5149_v6  ;;  %v1249_v59 = vpop.f32.mrb[151].mxu0  ;;  %v1922_v60 = vpop.f32.mrb[151].mxu1 }
 0x259   :  { %2482 = vst [vmem:[#allocation2 + $0x948] sm:$0xff] %v1246_v53  ;;  %2484 = vst [vmem:[#allocation2 + $0x958] sm:$0xff] %v1919_v54  ;;  %v1250_v61 = vadd.f32 %v1249_v59, %v5151_v7  ;;  %v1923_v62 = vadd.f32 %v1922_v60, %v5153_v8 }
 0x25a   :  { %2485 = vst [vmem:[#allocation2 + $0x960] sm:$0xff] %v1248_v57  ;;  %2487 = vst [vmem:[#allocation2 + $0x970] sm:$0xff] %v1921_v58 }
 0x25b   :  { %2486 = vst [vmem:[#allocation2 + $0x968] sm:$0xff] %v1250_v61  ;;  %2488 = vst [vmem:[#allocation2 + $0x978] sm:$0xff] %v1923_v62 }
 0x25d   :  { %v1253_v63 = vpop.f32.mrb[152].mxu0  ;;  %v1926_v0 = vpop.f32.mrb[152].mxu1 }
 0x25e   :  { %v1254_v1 = vadd.f32 %v1253_v63, %v5147_v5  ;;  %v1927_v2 = vadd.f32 %v1926_v0, %v5149_v6  ;;  %v1255_v4 = vpop.f32.mrb[153].mxu0  ;;  %v1928_v9 = vpop.f32.mrb[153].mxu1 }
 0x25f   :  { %v1256_v10 = vadd.f32 %v1255_v4, %v5151_v7  ;;  %v1929_v11 = vadd.f32 %v1928_v9, %v5153_v8  ;;  %v1257_v12 = vpop.f32.mrb[154].mxu0  ;;  %v1930_v13 = vpop.f32.mrb[154].mxu1 }
 0x260   :  { %2489 = vst [vmem:[#allocation2 + $0x980] sm:$0xff] %v1254_v1  ;;  %2491 = vst [vmem:[#allocation2 + $0x990] sm:$0xff] %v1927_v2  ;;  %v1258_v14 = vadd.f32 %v1257_v12, %v5147_v5  ;;  %v1931_v15 = vadd.f32 %v1930_v13, %v5149_v6  ;;  %v1259_v16 = vpop.f32.mrb[155].mxu0  ;;  %v1932_v17 = vpop.f32.mrb[155].mxu1 }
 0x261   :  { %2490 = vst [vmem:[#allocation2 + $0x988] sm:$0xff] %v1256_v10  ;;  %2492 = vst [vmem:[#allocation2 + $0x998] sm:$0xff] %v1929_v11  ;;  %v1260_v18 = vadd.f32 %v1259_v16, %v5151_v7  ;;  %v1933_v19 = vadd.f32 %v1932_v17, %v5153_v8 }
 0x262   :  { %2493 = vst [vmem:[#allocation2 + $0x9a0] sm:$0xff] %v1258_v14  ;;  %2495 = vst [vmem:[#allocation2 + $0x9b0] sm:$0xff] %v1931_v15 }
 0x263   :  { %2494 = vst [vmem:[#allocation2 + $0x9a8] sm:$0xff] %v1260_v18  ;;  %2496 = vst [vmem:[#allocation2 + $0x9b8] sm:$0xff] %v1933_v19 }
 0x265   :  { %v1263_v20 = vpop.f32.mrb[156].mxu0  ;;  %v1936_v21 = vpop.f32.mrb[156].mxu1 }
 0x266   :  { %v1264_v22 = vadd.f32 %v1263_v20, %v5147_v5  ;;  %v1937_v23 = vadd.f32 %v1936_v21, %v5149_v6  ;;  %v1265_v24 = vpop.f32.mrb[157].mxu0  ;;  %v1938_v25 = vpop.f32.mrb[157].mxu1 }
 0x267   :  { %v1266_v26 = vadd.f32 %v1265_v24, %v5151_v7  ;;  %v1939_v27 = vadd.f32 %v1938_v25, %v5153_v8  ;;  %v1267_v28 = vpop.f32.mrb[158].mxu0  ;;  %v1940_v29 = vpop.f32.mrb[158].mxu1 }
 0x268   :  { %2497 = vst [vmem:[#allocation2 + $0x9c0] sm:$0xff] %v1264_v22  ;;  %2499 = vst [vmem:[#allocation2 + $0x9d0] sm:$0xff] %v1937_v23  ;;  %v1268_v30 = vadd.f32 %v1267_v28, %v5147_v5  ;;  %v1941_v31 = vadd.f32 %v1940_v29, %v5149_v6  ;;  %v1269_v32 = vpop.f32.mrb[159].mxu0  ;;  %v1942_v33 = vpop.f32.mrb[159].mxu1 }
 0x269   :  { %2498 = vst [vmem:[#allocation2 + $0x9c8] sm:$0xff] %v1266_v26  ;;  %2500 = vst [vmem:[#allocation2 + $0x9d8] sm:$0xff] %v1939_v27  ;;  %v1270_v34 = vadd.f32 %v1269_v32, %v5151_v7  ;;  %v1943_v35 = vadd.f32 %v1942_v33, %v5153_v8 }
 0x26a   :  { %2501 = vst [vmem:[#allocation2 + $0x9e0] sm:$0xff] %v1268_v30  ;;  %2503 = vst [vmem:[#allocation2 + $0x9f0] sm:$0xff] %v1941_v31 }
 0x26b   :  { %2502 = vst [vmem:[#allocation2 + $0x9e8] sm:$0xff] %v1270_v34  ;;  %2504 = vst [vmem:[#allocation2 + $0x9f8] sm:$0xff] %v1943_v35 }
 0x26d   :  { %v1273_v36 = vpop.f32.mrb[160].mxu0  ;;  %v1946_v37 = vpop.f32.mrb[160].mxu1 }
 0x26e   :  { %v1274_v38 = vadd.f32 %v1273_v36, %v5147_v5  ;;  %v1947_v39 = vadd.f32 %v1946_v37, %v5149_v6  ;;  %v1275_v40 = vpop.f32.mrb[161].mxu0  ;;  %v1948_v41 = vpop.f32.mrb[161].mxu1 }
 0x26f   :  { %v1276_v42 = vadd.f32 %v1275_v40, %v5151_v7  ;;  %v1949_v3 = vadd.f32 %v1948_v41, %v5153_v8  ;;  %v1277_v43 = vpop.f32.mrb[162].mxu0  ;;  %v1950_v44 = vpop.f32.mrb[162].mxu1 }
 0x270   :  { %2505 = vst [vmem:[#allocation2 + $0xa00] sm:$0xff] %v1274_v38  ;;  %2507 = vst [vmem:[#allocation2 + $0xa10] sm:$0xff] %v1947_v39  ;;  %v1278_v45 = vadd.f32 %v1277_v43, %v5147_v5  ;;  %v1951_v46 = vadd.f32 %v1950_v44, %v5149_v6  ;;  %v1279_v47 = vpop.f32.mrb[163].mxu0  ;;  %v1952_v48 = vpop.f32.mrb[163].mxu1 }
 0x271   :  { %2506 = vst [vmem:[#allocation2 + $0xa08] sm:$0xff] %v1276_v42  ;;  %2508 = vst [vmem:[#allocation2 + $0xa18] sm:$0xff] %v1949_v3  ;;  %v1280_v49 = vadd.f32 %v1279_v47, %v5151_v7  ;;  %v1953_v50 = vadd.f32 %v1952_v48, %v5153_v8 }
 0x272   :  { %2509 = vst [vmem:[#allocation2 + $0xa20] sm:$0xff] %v1278_v45  ;;  %2511 = vst [vmem:[#allocation2 + $0xa30] sm:$0xff] %v1951_v46 }
 0x273   :  { %2510 = vst [vmem:[#allocation2 + $0xa28] sm:$0xff] %v1280_v49  ;;  %2512 = vst [vmem:[#allocation2 + $0xa38] sm:$0xff] %v1953_v50 }
 0x275   :  { %v1283_v51 = vpop.f32.mrb[164].mxu0  ;;  %v1956_v52 = vpop.f32.mrb[164].mxu1 }
 0x276   :  { %v1284_v53 = vadd.f32 %v1283_v51, %v5147_v5  ;;  %v1957_v54 = vadd.f32 %v1956_v52, %v5149_v6  ;;  %v1285_v55 = vpop.f32.mrb[165].mxu0  ;;  %v1958_v56 = vpop.f32.mrb[165].mxu1 }
 0x277   :  { %v1286_v57 = vadd.f32 %v1285_v55, %v5151_v7  ;;  %v1959_v58 = vadd.f32 %v1958_v56, %v5153_v8  ;;  %v1287_v59 = vpop.f32.mrb[166].mxu0  ;;  %v1960_v60 = vpop.f32.mrb[166].mxu1 }
 0x278   :  { %2513 = vst [vmem:[#allocation2 + $0xa40] sm:$0xff] %v1284_v53  ;;  %2515 = vst [vmem:[#allocation2 + $0xa50] sm:$0xff] %v1957_v54  ;;  %v1288_v61 = vadd.f32 %v1287_v59, %v5147_v5  ;;  %v1961_v62 = vadd.f32 %v1960_v60, %v5149_v6  ;;  %v1289_v63 = vpop.f32.mrb[167].mxu0  ;;  %v1962_v0 = vpop.f32.mrb[167].mxu1 }
 0x279   :  { %2514 = vst [vmem:[#allocation2 + $0xa48] sm:$0xff] %v1286_v57  ;;  %2516 = vst [vmem:[#allocation2 + $0xa58] sm:$0xff] %v1959_v58  ;;  %v1290_v1 = vadd.f32 %v1289_v63, %v5151_v7  ;;  %v1963_v2 = vadd.f32 %v1962_v0, %v5153_v8 }
 0x27a   :  { %2517 = vst [vmem:[#allocation2 + $0xa60] sm:$0xff] %v1288_v61  ;;  %2519 = vst [vmem:[#allocation2 + $0xa70] sm:$0xff] %v1961_v62 }
 0x27b   :  { %2518 = vst [vmem:[#allocation2 + $0xa68] sm:$0xff] %v1290_v1  ;;  %2520 = vst [vmem:[#allocation2 + $0xa78] sm:$0xff] %v1963_v2 }
 0x27d   :  { %v1293_v4 = vpop.f32.mrb[168].mxu0  ;;  %v1966_v9 = vpop.f32.mrb[168].mxu1 }
 0x27e   :  { %v1294_v10 = vadd.f32 %v1293_v4, %v5147_v5  ;;  %v1967_v11 = vadd.f32 %v1966_v9, %v5149_v6  ;;  %v1295_v12 = vpop.f32.mrb[169].mxu0  ;;  %v1968_v13 = vpop.f32.mrb[169].mxu1 }
 0x27f   :  { %v1296_v14 = vadd.f32 %v1295_v12, %v5151_v7  ;;  %v1969_v15 = vadd.f32 %v1968_v13, %v5153_v8  ;;  %v1297_v16 = vpop.f32.mrb[170].mxu0  ;;  %v1970_v17 = vpop.f32.mrb[170].mxu1 }
 0x280   :  { %2521 = vst [vmem:[#allocation2 + $0xa80] sm:$0xff] %v1294_v10  ;;  %2523 = vst [vmem:[#allocation2 + $0xa90] sm:$0xff] %v1967_v11  ;;  %v1298_v18 = vadd.f32 %v1297_v16, %v5147_v5  ;;  %v1971_v19 = vadd.f32 %v1970_v17, %v5149_v6  ;;  %v1299_v20 = vpop.f32.mrb[171].mxu0  ;;  %v1972_v21 = vpop.f32.mrb[171].mxu1 }
 0x281   :  { %2522 = vst [vmem:[#allocation2 + $0xa88] sm:$0xff] %v1296_v14  ;;  %2524 = vst [vmem:[#allocation2 + $0xa98] sm:$0xff] %v1969_v15  ;;  %v1300_v22 = vadd.f32 %v1299_v20, %v5151_v7  ;;  %v1973_v23 = vadd.f32 %v1972_v21, %v5153_v8 }
 0x282   :  { %2525 = vst [vmem:[#allocation2 + $0xaa0] sm:$0xff] %v1298_v18  ;;  %2527 = vst [vmem:[#allocation2 + $0xab0] sm:$0xff] %v1971_v19 }
 0x283   :  { %2526 = vst [vmem:[#allocation2 + $0xaa8] sm:$0xff] %v1300_v22  ;;  %2528 = vst [vmem:[#allocation2 + $0xab8] sm:$0xff] %v1973_v23 }
 0x285   :  { %v1303_v24 = vpop.f32.mrb[172].mxu0  ;;  %v1976_v25 = vpop.f32.mrb[172].mxu1 }
 0x286   :  { %v1304_v26 = vadd.f32 %v1303_v24, %v5147_v5  ;;  %v1977_v27 = vadd.f32 %v1976_v25, %v5149_v6  ;;  %v1305_v28 = vpop.f32.mrb[173].mxu0  ;;  %v1978_v29 = vpop.f32.mrb[173].mxu1 }
 0x287   :  { %v1306_v30 = vadd.f32 %v1305_v28, %v5151_v7  ;;  %v1979_v31 = vadd.f32 %v1978_v29, %v5153_v8  ;;  %v1307_v32 = vpop.f32.mrb[174].mxu0  ;;  %v1980_v33 = vpop.f32.mrb[174].mxu1 }
 0x288   :  { %2529 = vst [vmem:[#allocation2 + $0xac0] sm:$0xff] %v1304_v26  ;;  %2531 = vst [vmem:[#allocation2 + $0xad0] sm:$0xff] %v1977_v27  ;;  %v1308_v34 = vadd.f32 %v1307_v32, %v5147_v5  ;;  %v1981_v35 = vadd.f32 %v1980_v33, %v5149_v6  ;;  %v1309_v36 = vpop.f32.mrb[175].mxu0  ;;  %v1982_v37 = vpop.f32.mrb[175].mxu1 }
 0x289   :  { %2530 = vst [vmem:[#allocation2 + $0xac8] sm:$0xff] %v1306_v30  ;;  %2532 = vst [vmem:[#allocation2 + $0xad8] sm:$0xff] %v1979_v31  ;;  %v1310_v38 = vadd.f32 %v1309_v36, %v5151_v7  ;;  %v1983_v39 = vadd.f32 %v1982_v37, %v5153_v8 }
 0x28a   :  { %2533 = vst [vmem:[#allocation2 + $0xae0] sm:$0xff] %v1308_v34  ;;  %2535 = vst [vmem:[#allocation2 + $0xaf0] sm:$0xff] %v1981_v35 }
 0x28b   :  { %2534 = vst [vmem:[#allocation2 + $0xae8] sm:$0xff] %v1310_v38  ;;  %2536 = vst [vmem:[#allocation2 + $0xaf8] sm:$0xff] %v1983_v39 }
 0x28d   :  { %v1313_v40 = vpop.f32.mrb[176].mxu0  ;;  %v1986_v41 = vpop.f32.mrb[176].mxu1 }
 0x28e   :  { %v1314_v42 = vadd.f32 %v1313_v40, %v5147_v5  ;;  %v1987_v3 = vadd.f32 %v1986_v41, %v5149_v6  ;;  %v1315_v43 = vpop.f32.mrb[177].mxu0  ;;  %v1988_v44 = vpop.f32.mrb[177].mxu1 }
 0x28f   :  { %v1316_v45 = vadd.f32 %v1315_v43, %v5151_v7  ;;  %v1989_v46 = vadd.f32 %v1988_v44, %v5153_v8  ;;  %v1317_v47 = vpop.f32.mrb[178].mxu0  ;;  %v1990_v48 = vpop.f32.mrb[178].mxu1 }
 0x290   :  { %2537 = vst [vmem:[#allocation2 + $0xb00] sm:$0xff] %v1314_v42  ;;  %2539 = vst [vmem:[#allocation2 + $0xb10] sm:$0xff] %v1987_v3  ;;  %v1318_v49 = vadd.f32 %v1317_v47, %v5147_v5  ;;  %v1991_v50 = vadd.f32 %v1990_v48, %v5149_v6  ;;  %v1319_v51 = vpop.f32.mrb[179].mxu0  ;;  %v1992_v52 = vpop.f32.mrb[179].mxu1 }
 0x291   :  { %2538 = vst [vmem:[#allocation2 + $0xb08] sm:$0xff] %v1316_v45  ;;  %2540 = vst [vmem:[#allocation2 + $0xb18] sm:$0xff] %v1989_v46  ;;  %v1320_v53 = vadd.f32 %v1319_v51, %v5151_v7  ;;  %v1993_v54 = vadd.f32 %v1992_v52, %v5153_v8 }
 0x292   :  { %2541 = vst [vmem:[#allocation2 + $0xb20] sm:$0xff] %v1318_v49  ;;  %2543 = vst [vmem:[#allocation2 + $0xb30] sm:$0xff] %v1991_v50 }
 0x293   :  { %2542 = vst [vmem:[#allocation2 + $0xb28] sm:$0xff] %v1320_v53  ;;  %2544 = vst [vmem:[#allocation2 + $0xb38] sm:$0xff] %v1993_v54 }
 0x295   :  { %v1323_v55 = vpop.f32.mrb[180].mxu0  ;;  %v1996_v56 = vpop.f32.mrb[180].mxu1 }
 0x296   :  { %v1324_v57 = vadd.f32 %v1323_v55, %v5147_v5  ;;  %v1997_v58 = vadd.f32 %v1996_v56, %v5149_v6  ;;  %v1325_v59 = vpop.f32.mrb[181].mxu0  ;;  %v1998_v60 = vpop.f32.mrb[181].mxu1 }
 0x297   :  { %v1326_v61 = vadd.f32 %v1325_v59, %v5151_v7  ;;  %v1999_v62 = vadd.f32 %v1998_v60, %v5153_v8  ;;  %v1327_v63 = vpop.f32.mrb[182].mxu0  ;;  %v2000_v0 = vpop.f32.mrb[182].mxu1 }
 0x298   :  { %2545 = vst [vmem:[#allocation2 + $0xb40] sm:$0xff] %v1324_v57  ;;  %2547 = vst [vmem:[#allocation2 + $0xb50] sm:$0xff] %v1997_v58  ;;  %v1328_v1 = vadd.f32 %v1327_v63, %v5147_v5  ;;  %v2001_v2 = vadd.f32 %v2000_v0, %v5149_v6  ;;  %v1329_v4 = vpop.f32.mrb[183].mxu0  ;;  %v2002_v9 = vpop.f32.mrb[183].mxu1 }
 0x299   :  { %2546 = vst [vmem:[#allocation2 + $0xb48] sm:$0xff] %v1326_v61  ;;  %2548 = vst [vmem:[#allocation2 + $0xb58] sm:$0xff] %v1999_v62  ;;  %v1330_v10 = vadd.f32 %v1329_v4, %v5151_v7  ;;  %v2003_v11 = vadd.f32 %v2002_v9, %v5153_v8 }
 0x29a   :  { %2549 = vst [vmem:[#allocation2 + $0xb60] sm:$0xff] %v1328_v1  ;;  %2551 = vst [vmem:[#allocation2 + $0xb70] sm:$0xff] %v2001_v2 }
 0x29b   :  { %2550 = vst [vmem:[#allocation2 + $0xb68] sm:$0xff] %v1330_v10  ;;  %2552 = vst [vmem:[#allocation2 + $0xb78] sm:$0xff] %v2003_v11 }
 0x29d   :  { %v1333_v12 = vpop.f32.mrb[184].mxu0  ;;  %v2006_v13 = vpop.f32.mrb[184].mxu1 }
 0x29e   :  { %v1334_v14 = vadd.f32 %v1333_v12, %v5147_v5  ;;  %v2007_v15 = vadd.f32 %v2006_v13, %v5149_v6  ;;  %v1335_v16 = vpop.f32.mrb[185].mxu0  ;;  %v2008_v17 = vpop.f32.mrb[185].mxu1 }
 0x29f   :  { %v1336_v18 = vadd.f32 %v1335_v16, %v5151_v7  ;;  %v2009_v19 = vadd.f32 %v2008_v17, %v5153_v8  ;;  %v1337_v20 = vpop.f32.mrb[186].mxu0  ;;  %v2010_v21 = vpop.f32.mrb[186].mxu1 }
 0x2a0   :  { %2553 = vst [vmem:[#allocation2 + $0xb80] sm:$0xff] %v1334_v14  ;;  %2555 = vst [vmem:[#allocation2 + $0xb90] sm:$0xff] %v2007_v15  ;;  %v1338_v22 = vadd.f32 %v1337_v20, %v5147_v5  ;;  %v2011_v23 = vadd.f32 %v2010_v21, %v5149_v6  ;;  %v1339_v24 = vpop.f32.mrb[187].mxu0  ;;  %v2012_v25 = vpop.f32.mrb[187].mxu1 }
 0x2a1   :  { %2554 = vst [vmem:[#allocation2 + $0xb88] sm:$0xff] %v1336_v18  ;;  %2556 = vst [vmem:[#allocation2 + $0xb98] sm:$0xff] %v2009_v19  ;;  %v1340_v26 = vadd.f32 %v1339_v24, %v5151_v7  ;;  %v2013_v27 = vadd.f32 %v2012_v25, %v5153_v8 }
 0x2a2   :  { %2557 = vst [vmem:[#allocation2 + $0xba0] sm:$0xff] %v1338_v22  ;;  %2559 = vst [vmem:[#allocation2 + $0xbb0] sm:$0xff] %v2011_v23 }
 0x2a3   :  { %2558 = vst [vmem:[#allocation2 + $0xba8] sm:$0xff] %v1340_v26  ;;  %2560 = vst [vmem:[#allocation2 + $0xbb8] sm:$0xff] %v2013_v27 }
 0x2a5   :  { %v1343_v28 = vpop.f32.mrb[188].mxu0  ;;  %v2016_v29 = vpop.f32.mrb[188].mxu1 }
 0x2a6   :  { %v1344_v30 = vadd.f32 %v1343_v28, %v5147_v5  ;;  %v2017_v31 = vadd.f32 %v2016_v29, %v5149_v6  ;;  %v1345_v32 = vpop.f32.mrb[189].mxu0  ;;  %v2018_v33 = vpop.f32.mrb[189].mxu1 }
 0x2a7   :  { %v1346_v34 = vadd.f32 %v1345_v32, %v5151_v7  ;;  %v2019_v35 = vadd.f32 %v2018_v33, %v5153_v8  ;;  %v1347_v36 = vpop.f32.mrb[190].mxu0  ;;  %v2020_v37 = vpop.f32.mrb[190].mxu1 }
 0x2a8   :  { %2561 = vst [vmem:[#allocation2 + $0xbc0] sm:$0xff] %v1344_v30  ;;  %2563 = vst [vmem:[#allocation2 + $0xbd0] sm:$0xff] %v2017_v31  ;;  %v1348_v38 = vadd.f32 %v1347_v36, %v5147_v5  ;;  %v2021_v39 = vadd.f32 %v2020_v37, %v5149_v6  ;;  %v1349_v40 = vpop.f32.mrb[191].mxu0  ;;  %v2022_v41 = vpop.f32.mrb[191].mxu1 }
 0x2a9   :  { %2562 = vst [vmem:[#allocation2 + $0xbc8] sm:$0xff] %v1346_v34  ;;  %2564 = vst [vmem:[#allocation2 + $0xbd8] sm:$0xff] %v2019_v35  ;;  %v1350_v42 = vadd.f32 %v1349_v40, %v5151_v7  ;;  %v2023_v3 = vadd.f32 %v2022_v41, %v5153_v8 }
 0x2aa   :  { %2565 = vst [vmem:[#allocation2 + $0xbe0] sm:$0xff] %v1348_v38  ;;  %2567 = vst [vmem:[#allocation2 + $0xbf0] sm:$0xff] %v2021_v39 }
 0x2ab   :  { %2566 = vst [vmem:[#allocation2 + $0xbe8] sm:$0xff] %v1350_v42  ;;  %2568 = vst [vmem:[#allocation2 + $0xbf8] sm:$0xff] %v2023_v3 }
 0x2ad   :  { %v1353_v43 = vpop.f32.mrb[192].mxu0  ;;  %v2026_v44 = vpop.f32.mrb[192].mxu1 }
 0x2ae   :  { %v1354_v45 = vadd.f32 %v1353_v43, %v5147_v5  ;;  %v2027_v46 = vadd.f32 %v2026_v44, %v5149_v6  ;;  %v1355_v47 = vpop.f32.mrb[193].mxu0  ;;  %v2028_v48 = vpop.f32.mrb[193].mxu1 }
 0x2af   :  { %v1356_v49 = vadd.f32 %v1355_v47, %v5151_v7  ;;  %v2029_v50 = vadd.f32 %v2028_v48, %v5153_v8  ;;  %v1357_v51 = vpop.f32.mrb[194].mxu0  ;;  %v2030_v52 = vpop.f32.mrb[194].mxu1 }
 0x2b0   :  { %2569 = vst [vmem:[#allocation2 + $0xc00] sm:$0xff] %v1354_v45  ;;  %2571 = vst [vmem:[#allocation2 + $0xc10] sm:$0xff] %v2027_v46  ;;  %v1358_v53 = vadd.f32 %v1357_v51, %v5147_v5  ;;  %v2031_v54 = vadd.f32 %v2030_v52, %v5149_v6  ;;  %v1359_v55 = vpop.f32.mrb[195].mxu0  ;;  %v2032_v56 = vpop.f32.mrb[195].mxu1 }
 0x2b1   :  { %2570 = vst [vmem:[#allocation2 + $0xc08] sm:$0xff] %v1356_v49  ;;  %2572 = vst [vmem:[#allocation2 + $0xc18] sm:$0xff] %v2029_v50  ;;  %v1360_v57 = vadd.f32 %v1359_v55, %v5151_v7  ;;  %v2033_v58 = vadd.f32 %v2032_v56, %v5153_v8 }
 0x2b2   :  { %2573 = vst [vmem:[#allocation2 + $0xc20] sm:$0xff] %v1358_v53  ;;  %2575 = vst [vmem:[#allocation2 + $0xc30] sm:$0xff] %v2031_v54 }
 0x2b3   :  { %2574 = vst [vmem:[#allocation2 + $0xc28] sm:$0xff] %v1360_v57  ;;  %2576 = vst [vmem:[#allocation2 + $0xc38] sm:$0xff] %v2033_v58 }
 0x2b5   :  { %v1363_v59 = vpop.f32.mrb[196].mxu0  ;;  %v2036_v60 = vpop.f32.mrb[196].mxu1 }
 0x2b6   :  { %v1364_v61 = vadd.f32 %v1363_v59, %v5147_v5  ;;  %v2037_v62 = vadd.f32 %v2036_v60, %v5149_v6  ;;  %v1365_v63 = vpop.f32.mrb[197].mxu0  ;;  %v2038_v0 = vpop.f32.mrb[197].mxu1 }
 0x2b7   :  { %v1366_v1 = vadd.f32 %v1365_v63, %v5151_v7  ;;  %v2039_v2 = vadd.f32 %v2038_v0, %v5153_v8  ;;  %v1367_v4 = vpop.f32.mrb[198].mxu0  ;;  %v2040_v9 = vpop.f32.mrb[198].mxu1 }
 0x2b8   :  { %2577 = vst [vmem:[#allocation2 + $0xc40] sm:$0xff] %v1364_v61  ;;  %2579 = vst [vmem:[#allocation2 + $0xc50] sm:$0xff] %v2037_v62  ;;  %v1368_v10 = vadd.f32 %v1367_v4, %v5147_v5  ;;  %v2041_v11 = vadd.f32 %v2040_v9, %v5149_v6  ;;  %v1369_v12 = vpop.f32.mrb[199].mxu0  ;;  %v2042_v13 = vpop.f32.mrb[199].mxu1 }
 0x2b9   :  { %2578 = vst [vmem:[#allocation2 + $0xc48] sm:$0xff] %v1366_v1  ;;  %2580 = vst [vmem:[#allocation2 + $0xc58] sm:$0xff] %v2039_v2  ;;  %v1370_v14 = vadd.f32 %v1369_v12, %v5151_v7  ;;  %v2043_v15 = vadd.f32 %v2042_v13, %v5153_v8 }
 0x2ba   :  { %2581 = vst [vmem:[#allocation2 + $0xc60] sm:$0xff] %v1368_v10  ;;  %2583 = vst [vmem:[#allocation2 + $0xc70] sm:$0xff] %v2041_v11 }
 0x2bb   :  { %2582 = vst [vmem:[#allocation2 + $0xc68] sm:$0xff] %v1370_v14  ;;  %2584 = vst [vmem:[#allocation2 + $0xc78] sm:$0xff] %v2043_v15 }
 0x2bd   :  { %v1373_v16 = vpop.f32.mrb[200].mxu0  ;;  %v2046_v17 = vpop.f32.mrb[200].mxu1 }
 0x2be   :  { %v1374_v18 = vadd.f32 %v1373_v16, %v5147_v5  ;;  %v2047_v19 = vadd.f32 %v2046_v17, %v5149_v6  ;;  %v1375_v20 = vpop.f32.mrb[201].mxu0  ;;  %v2048_v21 = vpop.f32.mrb[201].mxu1 }
 0x2bf   :  { %v1376_v22 = vadd.f32 %v1375_v20, %v5151_v7  ;;  %v2049_v23 = vadd.f32 %v2048_v21, %v5153_v8  ;;  %v1377_v24 = vpop.f32.mrb[202].mxu0  ;;  %v2050_v25 = vpop.f32.mrb[202].mxu1 }
 0x2c0   :  { %2585 = vst [vmem:[#allocation2 + $0xc80] sm:$0xff] %v1374_v18  ;;  %2587 = vst [vmem:[#allocation2 + $0xc90] sm:$0xff] %v2047_v19  ;;  %v1378_v26 = vadd.f32 %v1377_v24, %v5147_v5  ;;  %v2051_v27 = vadd.f32 %v2050_v25, %v5149_v6  ;;  %v1379_v28 = vpop.f32.mrb[203].mxu0  ;;  %v2052_v29 = vpop.f32.mrb[203].mxu1 }
 0x2c1   :  { %2586 = vst [vmem:[#allocation2 + $0xc88] sm:$0xff] %v1376_v22  ;;  %2588 = vst [vmem:[#allocation2 + $0xc98] sm:$0xff] %v2049_v23  ;;  %v1380_v30 = vadd.f32 %v1379_v28, %v5151_v7  ;;  %v2053_v31 = vadd.f32 %v2052_v29, %v5153_v8 }
 0x2c2   :  { %2589 = vst [vmem:[#allocation2 + $0xca0] sm:$0xff] %v1378_v26  ;;  %2591 = vst [vmem:[#allocation2 + $0xcb0] sm:$0xff] %v2051_v27 }
 0x2c3   :  { %2590 = vst [vmem:[#allocation2 + $0xca8] sm:$0xff] %v1380_v30  ;;  %2592 = vst [vmem:[#allocation2 + $0xcb8] sm:$0xff] %v2053_v31 }
 0x2c5   :  { %v1383_v32 = vpop.f32.mrb[204].mxu0  ;;  %v2056_v33 = vpop.f32.mrb[204].mxu1 }
 0x2c6   :  { %v1384_v34 = vadd.f32 %v1383_v32, %v5147_v5  ;;  %v2057_v35 = vadd.f32 %v2056_v33, %v5149_v6  ;;  %v1385_v36 = vpop.f32.mrb[205].mxu0  ;;  %v2058_v37 = vpop.f32.mrb[205].mxu1 }
 0x2c7   :  { %v1386_v38 = vadd.f32 %v1385_v36, %v5151_v7  ;;  %v2059_v39 = vadd.f32 %v2058_v37, %v5153_v8  ;;  %v1387_v40 = vpop.f32.mrb[206].mxu0  ;;  %v2060_v41 = vpop.f32.mrb[206].mxu1 }
 0x2c8   :  { %2593 = vst [vmem:[#allocation2 + $0xcc0] sm:$0xff] %v1384_v34  ;;  %2595 = vst [vmem:[#allocation2 + $0xcd0] sm:$0xff] %v2057_v35  ;;  %v1388_v42 = vadd.f32 %v1387_v40, %v5147_v5  ;;  %v2061_v3 = vadd.f32 %v2060_v41, %v5149_v6  ;;  %v1389_v43 = vpop.f32.mrb[207].mxu0  ;;  %v2062_v44 = vpop.f32.mrb[207].mxu1 }
 0x2c9   :  { %2594 = vst [vmem:[#allocation2 + $0xcc8] sm:$0xff] %v1386_v38  ;;  %2596 = vst [vmem:[#allocation2 + $0xcd8] sm:$0xff] %v2059_v39  ;;  %v1390_v45 = vadd.f32 %v1389_v43, %v5151_v7  ;;  %v2063_v46 = vadd.f32 %v2062_v44, %v5153_v8 }
 0x2ca   :  { %2597 = vst [vmem:[#allocation2 + $0xce0] sm:$0xff] %v1388_v42  ;;  %2599 = vst [vmem:[#allocation2 + $0xcf0] sm:$0xff] %v2061_v3 }
 0x2cb   :  { %2598 = vst [vmem:[#allocation2 + $0xce8] sm:$0xff] %v1390_v45  ;;  %2600 = vst [vmem:[#allocation2 + $0xcf8] sm:$0xff] %v2063_v46 }
 0x2cd   :  { %v1393_v47 = vpop.f32.mrb[208].mxu0  ;;  %v2066_v48 = vpop.f32.mrb[208].mxu1 }
 0x2ce   :  { %v1394_v49 = vadd.f32 %v1393_v47, %v5147_v5  ;;  %v2067_v50 = vadd.f32 %v2066_v48, %v5149_v6  ;;  %v1395_v51 = vpop.f32.mrb[209].mxu0  ;;  %v2068_v52 = vpop.f32.mrb[209].mxu1 }
 0x2cf   :  { %v1396_v53 = vadd.f32 %v1395_v51, %v5151_v7  ;;  %v2069_v54 = vadd.f32 %v2068_v52, %v5153_v8  ;;  %v1397_v55 = vpop.f32.mrb[210].mxu0  ;;  %v2070_v56 = vpop.f32.mrb[210].mxu1 }
 0x2d0   :  { %2601 = vst [vmem:[#allocation2 + $0xd00] sm:$0xff] %v1394_v49  ;;  %2603 = vst [vmem:[#allocation2 + $0xd10] sm:$0xff] %v2067_v50  ;;  %v1398_v57 = vadd.f32 %v1397_v55, %v5147_v5  ;;  %v2071_v58 = vadd.f32 %v2070_v56, %v5149_v6  ;;  %v1399_v59 = vpop.f32.mrb[211].mxu0  ;;  %v2072_v60 = vpop.f32.mrb[211].mxu1 }
 0x2d1   :  { %2602 = vst [vmem:[#allocation2 + $0xd08] sm:$0xff] %v1396_v53  ;;  %2604 = vst [vmem:[#allocation2 + $0xd18] sm:$0xff] %v2069_v54  ;;  %v1400_v61 = vadd.f32 %v1399_v59, %v5151_v7  ;;  %v2073_v62 = vadd.f32 %v2072_v60, %v5153_v8 }
 0x2d2   :  { %2605 = vst [vmem:[#allocation2 + $0xd20] sm:$0xff] %v1398_v57  ;;  %2607 = vst [vmem:[#allocation2 + $0xd30] sm:$0xff] %v2071_v58 }
 0x2d3   :  { %2606 = vst [vmem:[#allocation2 + $0xd28] sm:$0xff] %v1400_v61  ;;  %2608 = vst [vmem:[#allocation2 + $0xd38] sm:$0xff] %v2073_v62 }
 0x2d5   :  { %v1403_v63 = vpop.f32.mrb[212].mxu0  ;;  %v2076_v0 = vpop.f32.mrb[212].mxu1 }
 0x2d6   :  { %v1404_v1 = vadd.f32 %v1403_v63, %v5147_v5  ;;  %v2077_v2 = vadd.f32 %v2076_v0, %v5149_v6  ;;  %v1405_v4 = vpop.f32.mrb[213].mxu0  ;;  %v2078_v9 = vpop.f32.mrb[213].mxu1 }
 0x2d7   :  { %v1406_v10 = vadd.f32 %v1405_v4, %v5151_v7  ;;  %v2079_v11 = vadd.f32 %v2078_v9, %v5153_v8  ;;  %v1407_v12 = vpop.f32.mrb[214].mxu0  ;;  %v2080_v13 = vpop.f32.mrb[214].mxu1 }
 0x2d8   :  { %2609 = vst [vmem:[#allocation2 + $0xd40] sm:$0xff] %v1404_v1  ;;  %2611 = vst [vmem:[#allocation2 + $0xd50] sm:$0xff] %v2077_v2  ;;  %v1408_v14 = vadd.f32 %v1407_v12, %v5147_v5  ;;  %v2081_v15 = vadd.f32 %v2080_v13, %v5149_v6  ;;  %v1409_v16 = vpop.f32.mrb[215].mxu0  ;;  %v2082_v17 = vpop.f32.mrb[215].mxu1 }
 0x2d9   :  { %2610 = vst [vmem:[#allocation2 + $0xd48] sm:$0xff] %v1406_v10  ;;  %2612 = vst [vmem:[#allocation2 + $0xd58] sm:$0xff] %v2079_v11  ;;  %v1410_v18 = vadd.f32 %v1409_v16, %v5151_v7  ;;  %v2083_v19 = vadd.f32 %v2082_v17, %v5153_v8 }
 0x2da   :  { %2613 = vst [vmem:[#allocation2 + $0xd60] sm:$0xff] %v1408_v14  ;;  %2615 = vst [vmem:[#allocation2 + $0xd70] sm:$0xff] %v2081_v15 }
 0x2db   :  { %2614 = vst [vmem:[#allocation2 + $0xd68] sm:$0xff] %v1410_v18  ;;  %2616 = vst [vmem:[#allocation2 + $0xd78] sm:$0xff] %v2083_v19 }
 0x2dd   :  { %v1413_v20 = vpop.f32.mrb[216].mxu0  ;;  %v2086_v21 = vpop.f32.mrb[216].mxu1 }
 0x2de   :  { %v1414_v22 = vadd.f32 %v1413_v20, %v5147_v5  ;;  %v2087_v23 = vadd.f32 %v2086_v21, %v5149_v6  ;;  %v1415_v24 = vpop.f32.mrb[217].mxu0  ;;  %v2088_v25 = vpop.f32.mrb[217].mxu1 }
 0x2df   :  { %v1416_v26 = vadd.f32 %v1415_v24, %v5151_v7  ;;  %v2089_v27 = vadd.f32 %v2088_v25, %v5153_v8  ;;  %v1417_v28 = vpop.f32.mrb[218].mxu0  ;;  %v2090_v29 = vpop.f32.mrb[218].mxu1 }
 0x2e0   :  { %2617 = vst [vmem:[#allocation2 + $0xd80] sm:$0xff] %v1414_v22  ;;  %2619 = vst [vmem:[#allocation2 + $0xd90] sm:$0xff] %v2087_v23  ;;  %v1418_v30 = vadd.f32 %v1417_v28, %v5147_v5  ;;  %v2091_v31 = vadd.f32 %v2090_v29, %v5149_v6  ;;  %v1419_v32 = vpop.f32.mrb[219].mxu0  ;;  %v2092_v33 = vpop.f32.mrb[219].mxu1 }
 0x2e1   :  { %2618 = vst [vmem:[#allocation2 + $0xd88] sm:$0xff] %v1416_v26  ;;  %2620 = vst [vmem:[#allocation2 + $0xd98] sm:$0xff] %v2089_v27  ;;  %v1420_v34 = vadd.f32 %v1419_v32, %v5151_v7  ;;  %v2093_v35 = vadd.f32 %v2092_v33, %v5153_v8 }
 0x2e2   :  { %2621 = vst [vmem:[#allocation2 + $0xda0] sm:$0xff] %v1418_v30  ;;  %2623 = vst [vmem:[#allocation2 + $0xdb0] sm:$0xff] %v2091_v31 }
 0x2e3   :  { %2622 = vst [vmem:[#allocation2 + $0xda8] sm:$0xff] %v1420_v34  ;;  %2624 = vst [vmem:[#allocation2 + $0xdb8] sm:$0xff] %v2093_v35 }
 0x2e5   :  { %v1423_v36 = vpop.f32.mrb[220].mxu0  ;;  %v2096_v37 = vpop.f32.mrb[220].mxu1 }
 0x2e6   :  { %v1424_v38 = vadd.f32 %v1423_v36, %v5147_v5  ;;  %v2097_v39 = vadd.f32 %v2096_v37, %v5149_v6  ;;  %v1425_v40 = vpop.f32.mrb[221].mxu0  ;;  %v2098_v41 = vpop.f32.mrb[221].mxu1 }
 0x2e7   :  { %v1426_v42 = vadd.f32 %v1425_v40, %v5151_v7  ;;  %v2099_v3 = vadd.f32 %v2098_v41, %v5153_v8  ;;  %v1427_v43 = vpop.f32.mrb[222].mxu0  ;;  %v2100_v44 = vpop.f32.mrb[222].mxu1 }
 0x2e8   :  { %2625 = vst [vmem:[#allocation2 + $0xdc0] sm:$0xff] %v1424_v38  ;;  %2627 = vst [vmem:[#allocation2 + $0xdd0] sm:$0xff] %v2097_v39  ;;  %v1428_v45 = vadd.f32 %v1427_v43, %v5147_v5  ;;  %v2101_v46 = vadd.f32 %v2100_v44, %v5149_v6  ;;  %v1429_v47 = vpop.f32.mrb[223].mxu0  ;;  %v2102_v48 = vpop.f32.mrb[223].mxu1 }
 0x2e9   :  { %2626 = vst [vmem:[#allocation2 + $0xdc8] sm:$0xff] %v1426_v42  ;;  %2628 = vst [vmem:[#allocation2 + $0xdd8] sm:$0xff] %v2099_v3  ;;  %v1430_v49 = vadd.f32 %v1429_v47, %v5151_v7  ;;  %v2103_v50 = vadd.f32 %v2102_v48, %v5153_v8 }
 0x2ea   :  { %2629 = vst [vmem:[#allocation2 + $0xde0] sm:$0xff] %v1428_v45  ;;  %2631 = vst [vmem:[#allocation2 + $0xdf0] sm:$0xff] %v2101_v46 }
 0x2eb   :  { %2630 = vst [vmem:[#allocation2 + $0xde8] sm:$0xff] %v1430_v49  ;;  %2632 = vst [vmem:[#allocation2 + $0xdf8] sm:$0xff] %v2103_v50 }
 0x2ed   :  { %v1433_v51 = vpop.f32.mrb[224].mxu0  ;;  %v2106_v52 = vpop.f32.mrb[224].mxu1 }
 0x2ee   :  { %v1434_v53 = vadd.f32 %v1433_v51, %v5147_v5  ;;  %v2107_v54 = vadd.f32 %v2106_v52, %v5149_v6  ;;  %v1435_v55 = vpop.f32.mrb[225].mxu0  ;;  %v2108_v56 = vpop.f32.mrb[225].mxu1 }
 0x2ef   :  { %v1436_v57 = vadd.f32 %v1435_v55, %v5151_v7  ;;  %v2109_v58 = vadd.f32 %v2108_v56, %v5153_v8  ;;  %v1437_v59 = vpop.f32.mrb[226].mxu0  ;;  %v2110_v60 = vpop.f32.mrb[226].mxu1 }
 0x2f0   :  { %2633 = vst [vmem:[#allocation2 + $0xe00] sm:$0xff] %v1434_v53  ;;  %2635 = vst [vmem:[#allocation2 + $0xe10] sm:$0xff] %v2107_v54  ;;  %v1438_v61 = vadd.f32 %v1437_v59, %v5147_v5  ;;  %v2111_v62 = vadd.f32 %v2110_v60, %v5149_v6  ;;  %v1439_v63 = vpop.f32.mrb[227].mxu0  ;;  %v2112_v0 = vpop.f32.mrb[227].mxu1 }
 0x2f1   :  { %2634 = vst [vmem:[#allocation2 + $0xe08] sm:$0xff] %v1436_v57  ;;  %2636 = vst [vmem:[#allocation2 + $0xe18] sm:$0xff] %v2109_v58  ;;  %v1440_v1 = vadd.f32 %v1439_v63, %v5151_v7  ;;  %v2113_v2 = vadd.f32 %v2112_v0, %v5153_v8 }
 0x2f2   :  { %2637 = vst [vmem:[#allocation2 + $0xe20] sm:$0xff] %v1438_v61  ;;  %2639 = vst [vmem:[#allocation2 + $0xe30] sm:$0xff] %v2111_v62 }
 0x2f3   :  { %2638 = vst [vmem:[#allocation2 + $0xe28] sm:$0xff] %v1440_v1  ;;  %2640 = vst [vmem:[#allocation2 + $0xe38] sm:$0xff] %v2113_v2 }
 0x2f5   :  { %v1443_v4 = vpop.f32.mrb[228].mxu0  ;;  %v2116_v9 = vpop.f32.mrb[228].mxu1 }
 0x2f6   :  { %v1444_v10 = vadd.f32 %v1443_v4, %v5147_v5  ;;  %v2117_v11 = vadd.f32 %v2116_v9, %v5149_v6  ;;  %v1445_v12 = vpop.f32.mrb[229].mxu0  ;;  %v2118_v13 = vpop.f32.mrb[229].mxu1 }
 0x2f7   :  { %v1446_v14 = vadd.f32 %v1445_v12, %v5151_v7  ;;  %v2119_v15 = vadd.f32 %v2118_v13, %v5153_v8  ;;  %v1447_v16 = vpop.f32.mrb[230].mxu0  ;;  %v2120_v17 = vpop.f32.mrb[230].mxu1 }
 0x2f8   :  { %2641 = vst [vmem:[#allocation2 + $0xe40] sm:$0xff] %v1444_v10  ;;  %2643 = vst [vmem:[#allocation2 + $0xe50] sm:$0xff] %v2117_v11  ;;  %v1448_v18 = vadd.f32 %v1447_v16, %v5147_v5  ;;  %v2121_v19 = vadd.f32 %v2120_v17, %v5149_v6  ;;  %v1449_v20 = vpop.f32.mrb[231].mxu0  ;;  %v2122_v21 = vpop.f32.mrb[231].mxu1 }
 0x2f9   :  { %2642 = vst [vmem:[#allocation2 + $0xe48] sm:$0xff] %v1446_v14  ;;  %2644 = vst [vmem:[#allocation2 + $0xe58] sm:$0xff] %v2119_v15  ;;  %v1450_v22 = vadd.f32 %v1449_v20, %v5151_v7  ;;  %v2123_v23 = vadd.f32 %v2122_v21, %v5153_v8 }
 0x2fa   :  { %2645 = vst [vmem:[#allocation2 + $0xe60] sm:$0xff] %v1448_v18  ;;  %2647 = vst [vmem:[#allocation2 + $0xe70] sm:$0xff] %v2121_v19 }
 0x2fb   :  { %2646 = vst [vmem:[#allocation2 + $0xe68] sm:$0xff] %v1450_v22  ;;  %2648 = vst [vmem:[#allocation2 + $0xe78] sm:$0xff] %v2123_v23 }
 0x2fd   :  { %v1453_v24 = vpop.f32.mrb[232].mxu0  ;;  %v2126_v25 = vpop.f32.mrb[232].mxu1 }
 0x2fe   :  { %v1454_v26 = vadd.f32 %v1453_v24, %v5147_v5  ;;  %v2127_v27 = vadd.f32 %v2126_v25, %v5149_v6  ;;  %v1455_v28 = vpop.f32.mrb[233].mxu0  ;;  %v2128_v29 = vpop.f32.mrb[233].mxu1 }
 0x2ff   :  { %v1456_v30 = vadd.f32 %v1455_v28, %v5151_v7  ;;  %v2129_v31 = vadd.f32 %v2128_v29, %v5153_v8  ;;  %v1457_v32 = vpop.f32.mrb[234].mxu0  ;;  %v2130_v33 = vpop.f32.mrb[234].mxu1 }
 0x300   :  { %2649 = vst [vmem:[#allocation2 + $0xe80] sm:$0xff] %v1454_v26  ;;  %2651 = vst [vmem:[#allocation2 + $0xe90] sm:$0xff] %v2127_v27  ;;  %v1458_v34 = vadd.f32 %v1457_v32, %v5147_v5  ;;  %v2131_v35 = vadd.f32 %v2130_v33, %v5149_v6  ;;  %v1459_v36 = vpop.f32.mrb[235].mxu0  ;;  %v2132_v37 = vpop.f32.mrb[235].mxu1 }
 0x301   :  { %2650 = vst [vmem:[#allocation2 + $0xe88] sm:$0xff] %v1456_v30  ;;  %2652 = vst [vmem:[#allocation2 + $0xe98] sm:$0xff] %v2129_v31  ;;  %v1460_v38 = vadd.f32 %v1459_v36, %v5151_v7  ;;  %v2133_v39 = vadd.f32 %v2132_v37, %v5153_v8 }
 0x302   :  { %2653 = vst [vmem:[#allocation2 + $0xea0] sm:$0xff] %v1458_v34  ;;  %2655 = vst [vmem:[#allocation2 + $0xeb0] sm:$0xff] %v2131_v35 }
 0x303   :  { %2654 = vst [vmem:[#allocation2 + $0xea8] sm:$0xff] %v1460_v38  ;;  %2656 = vst [vmem:[#allocation2 + $0xeb8] sm:$0xff] %v2133_v39 }
 0x305   :  { %v1463_v40 = vpop.f32.mrb[236].mxu0  ;;  %v2136_v41 = vpop.f32.mrb[236].mxu1 }
 0x306   :  { %v1464_v42 = vadd.f32 %v1463_v40, %v5147_v5  ;;  %v2137_v3 = vadd.f32 %v2136_v41, %v5149_v6  ;;  %v1465_v43 = vpop.f32.mrb[237].mxu0  ;;  %v2138_v44 = vpop.f32.mrb[237].mxu1 }
 0x307   :  { %v1466_v45 = vadd.f32 %v1465_v43, %v5151_v7  ;;  %v2139_v46 = vadd.f32 %v2138_v44, %v5153_v8  ;;  %v1467_v47 = vpop.f32.mrb[238].mxu0  ;;  %v2140_v48 = vpop.f32.mrb[238].mxu1 }
 0x308   :  { %2657 = vst [vmem:[#allocation2 + $0xec0] sm:$0xff] %v1464_v42  ;;  %2659 = vst [vmem:[#allocation2 + $0xed0] sm:$0xff] %v2137_v3  ;;  %v1468_v49 = vadd.f32 %v1467_v47, %v5147_v5  ;;  %v2141_v50 = vadd.f32 %v2140_v48, %v5149_v6  ;;  %v1469_v51 = vpop.f32.mrb[239].mxu0  ;;  %v2142_v52 = vpop.f32.mrb[239].mxu1 }
 0x309   :  { %2658 = vst [vmem:[#allocation2 + $0xec8] sm:$0xff] %v1466_v45  ;;  %2660 = vst [vmem:[#allocation2 + $0xed8] sm:$0xff] %v2139_v46  ;;  %v1470_v53 = vadd.f32 %v1469_v51, %v5151_v7  ;;  %v2143_v54 = vadd.f32 %v2142_v52, %v5153_v8 }
 0x30a   :  { %2661 = vst [vmem:[#allocation2 + $0xee0] sm:$0xff] %v1468_v49  ;;  %2663 = vst [vmem:[#allocation2 + $0xef0] sm:$0xff] %v2141_v50 }
 0x30b   :  { %2662 = vst [vmem:[#allocation2 + $0xee8] sm:$0xff] %v1470_v53  ;;  %2664 = vst [vmem:[#allocation2 + $0xef8] sm:$0xff] %v2143_v54 }
 0x30d   :  { %v1473_v55 = vpop.f32.mrb[240].mxu0  ;;  %v2146_v56 = vpop.f32.mrb[240].mxu1 }
 0x30e   :  { %v1474_v57 = vadd.f32 %v1473_v55, %v5147_v5  ;;  %v2147_v58 = vadd.f32 %v2146_v56, %v5149_v6  ;;  %v1475_v59 = vpop.f32.mrb[241].mxu0  ;;  %v2148_v60 = vpop.f32.mrb[241].mxu1 }
 0x30f   :  { %v1476_v61 = vadd.f32 %v1475_v59, %v5151_v7  ;;  %v2149_v62 = vadd.f32 %v2148_v60, %v5153_v8  ;;  %v1477_v63 = vpop.f32.mrb[242].mxu0  ;;  %v2150_v0 = vpop.f32.mrb[242].mxu1 }
 0x310   :  { %2665 = vst [vmem:[#allocation2 + $0xf00] sm:$0xff] %v1474_v57  ;;  %2667 = vst [vmem:[#allocation2 + $0xf10] sm:$0xff] %v2147_v58  ;;  %v1478_v1 = vadd.f32 %v1477_v63, %v5147_v5  ;;  %v2151_v2 = vadd.f32 %v2150_v0, %v5149_v6  ;;  %v1479_v4 = vpop.f32.mrb[243].mxu0  ;;  %v2152_v9 = vpop.f32.mrb[243].mxu1 }
 0x311   :  { %2666 = vst [vmem:[#allocation2 + $0xf08] sm:$0xff] %v1476_v61  ;;  %2668 = vst [vmem:[#allocation2 + $0xf18] sm:$0xff] %v2149_v62  ;;  %v1480_v10 = vadd.f32 %v1479_v4, %v5151_v7  ;;  %v2153_v11 = vadd.f32 %v2152_v9, %v5153_v8 }
 0x312   :  { %2669 = vst [vmem:[#allocation2 + $0xf20] sm:$0xff] %v1478_v1  ;;  %2671 = vst [vmem:[#allocation2 + $0xf30] sm:$0xff] %v2151_v2 }
 0x313   :  { %2670 = vst [vmem:[#allocation2 + $0xf28] sm:$0xff] %v1480_v10  ;;  %2672 = vst [vmem:[#allocation2 + $0xf38] sm:$0xff] %v2153_v11 }
 0x315   :  { %v1483_v12 = vpop.f32.mrb[244].mxu0  ;;  %v2156_v13 = vpop.f32.mrb[244].mxu1 }
 0x316   :  { %v1484_v14 = vadd.f32 %v1483_v12, %v5147_v5  ;;  %v2157_v15 = vadd.f32 %v2156_v13, %v5149_v6  ;;  %v1485_v16 = vpop.f32.mrb[245].mxu0  ;;  %v2158_v17 = vpop.f32.mrb[245].mxu1 }
 0x317   :  { %v1486_v18 = vadd.f32 %v1485_v16, %v5151_v7  ;;  %v2159_v19 = vadd.f32 %v2158_v17, %v5153_v8  ;;  %v1487_v20 = vpop.f32.mrb[246].mxu0  ;;  %v2160_v21 = vpop.f32.mrb[246].mxu1 }
 0x318   :  { %2673 = vst [vmem:[#allocation2 + $0xf40] sm:$0xff] %v1484_v14  ;;  %2675 = vst [vmem:[#allocation2 + $0xf50] sm:$0xff] %v2157_v15  ;;  %v1488_v22 = vadd.f32 %v1487_v20, %v5147_v5  ;;  %v2161_v23 = vadd.f32 %v2160_v21, %v5149_v6  ;;  %v1489_v24 = vpop.f32.mrb[247].mxu0  ;;  %v2162_v25 = vpop.f32.mrb[247].mxu1 }
 0x319   :  { %2674 = vst [vmem:[#allocation2 + $0xf48] sm:$0xff] %v1486_v18  ;;  %2676 = vst [vmem:[#allocation2 + $0xf58] sm:$0xff] %v2159_v19  ;;  %v1490_v26 = vadd.f32 %v1489_v24, %v5151_v7  ;;  %v2163_v27 = vadd.f32 %v2162_v25, %v5153_v8 }
 0x31a   :  { %2677 = vst [vmem:[#allocation2 + $0xf60] sm:$0xff] %v1488_v22  ;;  %2679 = vst [vmem:[#allocation2 + $0xf70] sm:$0xff] %v2161_v23 }
 0x31b   :  { %2678 = vst [vmem:[#allocation2 + $0xf68] sm:$0xff] %v1490_v26  ;;  %2680 = vst [vmem:[#allocation2 + $0xf78] sm:$0xff] %v2163_v27 }
 0x31d   :  { %v1493_v28 = vpop.f32.mrb[248].mxu0  ;;  %v2166_v29 = vpop.f32.mrb[248].mxu1 }
 0x31e   :  { %v1494_v30 = vadd.f32 %v1493_v28, %v5147_v5  ;;  %v2167_v31 = vadd.f32 %v2166_v29, %v5149_v6  ;;  %v1495_v32 = vpop.f32.mrb[249].mxu0  ;;  %v2168_v33 = vpop.f32.mrb[249].mxu1 }
 0x31f   :  { %v1496_v34 = vadd.f32 %v1495_v32, %v5151_v7  ;;  %v2169_v35 = vadd.f32 %v2168_v33, %v5153_v8  ;;  %v1497_v36 = vpop.f32.mrb[250].mxu0  ;;  %v2170_v37 = vpop.f32.mrb[250].mxu1 }
 0x320   :  { %2681 = vst [vmem:[#allocation2 + $0xf80] sm:$0xff] %v1494_v30  ;;  %2683 = vst [vmem:[#allocation2 + $0xf90] sm:$0xff] %v2167_v31  ;;  %v1498_v38 = vadd.f32 %v1497_v36, %v5147_v5  ;;  %v2171_v39 = vadd.f32 %v2170_v37, %v5149_v6  ;;  %v1499_v40 = vpop.f32.mrb[251].mxu0  ;;  %v2172_v41 = vpop.f32.mrb[251].mxu1 }
 0x321   :  { %2682 = vst [vmem:[#allocation2 + $0xf88] sm:$0xff] %v1496_v34  ;;  %2684 = vst [vmem:[#allocation2 + $0xf98] sm:$0xff] %v2169_v35  ;;  %v1500_v42 = vadd.f32 %v1499_v40, %v5151_v7  ;;  %v2173_v3 = vadd.f32 %v2172_v41, %v5153_v8 }
 0x322   :  { %2685 = vst [vmem:[#allocation2 + $0xfa0] sm:$0xff] %v1498_v38  ;;  %2687 = vst [vmem:[#allocation2 + $0xfb0] sm:$0xff] %v2171_v39 }
 0x323   :  { %2686 = vst [vmem:[#allocation2 + $0xfa8] sm:$0xff] %v1500_v42  ;;  %2688 = vst [vmem:[#allocation2 + $0xfb8] sm:$0xff] %v2173_v3 }
 0x325   :  { %v1503_v43 = vpop.f32.mrb[252].mxu0  ;;  %v2176_v44 = vpop.f32.mrb[252].mxu1  ;;  %4101 = sbr.rel (%p4105_p10) target bundleno = 1214 (0x4be), region = 74 }
 0x326   :  { %v1504_v45 = vadd.f32 %v1503_v43, %v5147_v5  ;;  %v2177_v46 = vadd.f32 %v2176_v44, %v5149_v6  ;;  %v1505_v47 = vpop.f32.mrb[253].mxu0  ;;  %v2178_v48 = vpop.f32.mrb[253].mxu1 }
 0x327   :  { %v1506_v49 = vadd.f32 %v1505_v47, %v5151_v7  ;;  %v2179_v50 = vadd.f32 %v2178_v48, %v5153_v8  ;;  %v1507_v51 = vpop.f32.mrb[254].mxu0  ;;  %v2180_v52 = vpop.f32.mrb[254].mxu1 }
 0x328   :  { %2689 = vst [vmem:[#allocation2 + $0xfc0] sm:$0xff] %v1504_v45  ;;  %2691 = vst [vmem:[#allocation2 + $0xfd0] sm:$0xff] %v2177_v46  ;;  %v1508_v53 = vadd.f32 %v1507_v51, %v5147_v5  ;;  %v2181_v54 = vadd.f32 %v2180_v52, %v5149_v6  ;;  %v1509_v55 = vpop.f32.mrb[255].mxu0  ;;  %v2182_v56 = vpop.f32.mrb[255].mxu1 }
 0x329   :  { %2690 = vst [vmem:[#allocation2 + $0xfc8] sm:$0xff] %v1506_v49  ;;  %2692 = vst [vmem:[#allocation2 + $0xfd8] sm:$0xff] %v2179_v50  ;;  %v1510_v57 = vadd.f32 %v1509_v55, %v5151_v7  ;;  %v2183_v58 = vadd.f32 %v2182_v56, %v5153_v8 }
 0x32a   :  { %2693 = vst [vmem:[#allocation2 + $0xfe0] sm:$0xff] %v1508_v53  ;;  %2695 = vst [vmem:[#allocation2 + $0xff0] sm:$0xff] %v2181_v54 }
 0x32b   :  { %2694 = vst [vmem:[#allocation2 + $0xfe8] sm:$0xff] %v1510_v57  ;;  %2696 = vst [vmem:[#allocation2 + $0xff8] sm:$0xff] %v2183_v58 }
 0x32c LB: > { %v4562_v5 = vld [vmem:[#allocation12 + $0x4] ss:$16 sps:$4 sm:$0xff]   ;;  %v4564_v6 = vld [vmem:[#allocation12] ss:$16 sps:$4 sm:$0xff]   ;;  %v4992_v7 = vmov 0   ;;  %v5763_v24 = vstv %s4981_s9  ;;  %v2811_v28 = vld [vmem:[#allocation3 + $0x8] sm:$0xff]  ;;  %s4981_s9 = sphi %s5753_s9, %s2703_s9  }
 0x32d   : > { %3058 = vmatprep.mubr.bf16.mxu0 %v4992_v7  ;;  %3171 = vmatprep.mubr.bf16.mxu1 %v4992_v7  ;;  %v4565_v8 = vld [vmem:[#allocation12 + $0x24] ss:$16 sps:$4 sm:$0xff]   ;;  %v4567_v59 = vld [vmem:[#allocation12 + $0x20] ss:$16 sps:$4 sm:$0xff]   ;;  %v4573_v61 = vld [vmem:[#allocation12 + $0xc] ss:$16 sps:$4 sm:$0xff]  }
 0x32e   : > { %3026 = vmatprep.subr.bf16.mxu0 %v4562_v5  ;;  %4560 = vset.pattern.permute.xlu0 %v4992_v7  ;;  %v4568_v60 = vld [vmem:[#allocation12 + $0x44] ss:$16 sps:$4 sm:$0xff]   ;;  %v4576_v62 = vld [vmem:[#allocation12 + $0x8] ss:$16 sps:$4 sm:$0xff]   ;;  %v4570_v63 = vld [vmem:[#allocation12 + $0x40] ss:$16 sps:$4 sm:$0xff]  }
 0x32f   : > { %3027 = vmatpush1.bf16.msra.mxu0 %v4564_v6  ;;  %4561 = vset.pattern.permute.xlu1 %v4992_v7  ;;  %v4571_v0 = vld [vmem:[#allocation12 + $0x64] ss:$16 sps:$4 sm:$0xff]   ;;  %v4579_v1 = vld [vmem:[#allocation12 + $0x2c] ss:$16 sps:$4 sm:$0xff]   ;;  %v4582_v2 = vld [vmem:[#allocation12 + $0x28] ss:$16 sps:$4 sm:$0xff]  }
 0x330   : > { %3028 = vmatprep.subr.bf16.mxu0 %v4565_v8  ;;  %3139 = vmatprep.subr.bf16.mxu1 %v4573_v61  ;;  %v4575_v4 = vld [vmem:[#allocation12 + $0x60] ss:$16 sps:$4 sm:$0xff]   ;;  %v4577_v9 = vld [vmem:[#allocation12 + $0x84] ss:$16 sps:$4 sm:$0xff]   ;;  %v4585_v10 = vld [vmem:[#allocation12 + $0x4c] ss:$16 sps:$4 sm:$0xff]  }
 0x331   : > { %3140 = vmatpush1.bf16.msra.mxu1 %v4576_v62  ;;  %v4588_v11 = vld [vmem:[#allocation12 + $0x48] ss:$16 sps:$4 sm:$0xff]   ;;  %v4591_v12 = vld [vmem:[#allocation12 + $0x6c] ss:$16 sps:$4 sm:$0xff]   ;;  %v4581_v13 = vld [vmem:[#allocation12 + $0x80] ss:$16 sps:$4 sm:$0xff]  }
 0x332   : > { %3141 = vmatprep.subr.bf16.mxu1 %v4579_v1  ;;  %v4583_v14 = vld [vmem:[#allocation12 + $0xa4] ss:$16 sps:$4 sm:$0xff]   ;;  %v4594_v15 = vld [vmem:[#allocation12 + $0x68] ss:$16 sps:$4 sm:$0xff]   ;;  %v4597_v16 = vld [vmem:[#allocation12 + $0x8c] ss:$16 sps:$4 sm:$0xff]  }
 0x333   : > { %3029 = vmatpush1.bf16.msra.mxu0 %v4567_v59  ;;  %v4587_v17 = vld [vmem:[#allocation12 + $0xa0] ss:$16 sps:$4 sm:$0xff]   ;;  %v4589_v18 = vld [vmem:[#allocation12 + $0xc4] ss:$16 sps:$4 sm:$0xff]   ;;  %v4600_v19 = vld [vmem:[#allocation12 + $0x88] ss:$16 sps:$4 sm:$0xff]  }
 0x334   : > { %3030 = vmatprep.subr.bf16.mxu0 %v4568_v60  ;;  %v4601_v20 = vld [vmem:[#allocation12 + $0xac] ss:$16 sps:$4 sm:$0xff]   ;;  %v4593_v21 = vld [vmem:[#allocation12 + $0xc0] ss:$16 sps:$4 sm:$0xff]   ;;  %v4595_v22 = vld [vmem:[#allocation12 + $0xe4] ss:$16 sps:$4 sm:$0xff]  }
 0x335   : > { %3142 = vmatpush1.bf16.msra.mxu1 %v4582_v2  ;;  %v4603_v23 = vld [vmem:[#allocation12 + $0xa8] ss:$16 sps:$4 sm:$0xff]   ;;  %v4599_v25 = vld [vmem:[#allocation12 + $0xe0] ss:$16 sps:$4 sm:$0xff]   ;;  %v4604_v26 = vld [vmem:[#allocation12 + $0xcc] ss:$16 sps:$4 sm:$0xff]  }
 0x336   : > { %3143 = vmatprep.subr.bf16.mxu1 %v4585_v10  ;;  %v5765_v27 = vld [vmem:[#allocation3] sm:$0xff]  ;;  %v2708_v30 = vld [vmem:[%s6315_s1 + $0x8] sm:$0xff]  ;;  %v2709_v31 = vld [vmem:[%s6315_s1 + $0x10] sm:$0xff]  ;;  %s4203_s18 = sshll.u32 %s4981_s9, 7  ;;  %s2703_s9 = sadd.s32 1, %s4981_s9  }
 0x337   : > { %3031 = vmatpush1.bf16.msra.mxu0 %v4570_v63  ;;  %v2707_v29 = vld [vmem:[%s6315_s1] sm:$0xff]  ;;  %v2710_v32 = vld [vmem:[%s6315_s1 + $0x18] sm:$0xff]  ;;  %vm2725_vm1 = vcmp.gt.s32.totalorder %v2708_v30, %v5763_v24  ;;  %vm2726_vm2 = vcmp.gt.s32.totalorder %v2709_v31, %v5763_v24  ;;  %v2712_v38 = vld [vmem:[%s6315_s1 + $0x28] sm:$0xff]  ;;  %v2826_v39 = vpack.c.bf16 %v2811_v28, %v5765_v27  ;;  %s2741_s19 = sshra.s32 %s4203_s18, 3  ;;  %p2702_p12 = scmp.ge.s32.totalorder %s2703_s9, %s5619_s3 }
 0x338   : > { %3032 = vmatprep.subr.bf16.mxu0 %v4571_v0  ;;  %vm2724_vm0 = vcmp.gt.s32.totalorder %v2707_v29, %v5763_v24  ;;  %v4606_v33 = vld [vmem:[#allocation12 + $0xc8] ss:$16 sps:$4 sm:$0xff]   ;;  %vm2727_vm3 = vcmp.gt.s32.totalorder %v2710_v32, %v5763_v24  ;;  %v2711_v35 = vld [vmem:[%s6315_s1 + $0x20] sm:$0xff]  ;;  %v4607_v36 = vld [vmem:[#allocation12 + $0xec] ss:$16 sps:$4 sm:$0xff]   ;;  %v3718_v37 = vsel %vm2726_vm2, 1, %v4992_v7  ;;  %vm2729_vm5 = vcmp.gt.s32.totalorder %v2712_v38, %v5763_v24 }
 0x339   : > { %3144 = vmatpush1.bf16.msra.mxu1 %v4588_v11  ;;  %v3716_v34 = vsel %vm2724_vm0, 1, %v4992_v7  ;;  %v3717_v40 = vsel %vm2725_vm1, 1, %v4992_v7  ;;  %3739 = vperm.xlu1 %4561, %v3718_v37   ;;  %v3719_v41 = vsel %vm2727_vm3, 1, %v4992_v7  ;;  %vm2728_vm4 = vcmp.gt.s32.totalorder %v2711_v35, %v5763_v24  ;;  %v4609_v42 = vld [vmem:[#allocation12 + $0xe8] ss:$16 sps:$4 sm:$0xff]   ;;  %v2713_v3 = vld [vmem:[%s6315_s1 + $0x30] sm:$0xff] }
 0x33a   : > { %3145 = vmatprep.subr.bf16.mxu1 %v4591_v12  ;;  %3733 = vperm.xlu0 %4560, %v3716_v34   ;;  %v2714_v43 = vld [vmem:[%s6315_s1 + $0x38] sm:$0xff]  ;;  %v3720_v44 = vsel %vm2728_vm4, 1, %v4992_v7  ;;  %v2812_v45 = vld [vmem:[#allocation3 + $0x10] sm:$0xff]  ;;  %v3721_v47 = vsel %vm2729_vm5, 1, %v4992_v7  ;;  %vm2730_vm6 = vcmp.gt.s32.totalorder %v2713_v3, %v5763_v24  ;;  %v2715_v48 = vld [vmem:[%s6315_s1 + $0x40] sm:$0xff]  ;;  %s4290_s21 = sshll.u32 %s2741_s19, 5 }
 0x33b   : > { %3033 = vmatpush1.bf16.msra.mxu0 %v4575_v4  ;;  %v2813_v46 = vld [vmem:[#allocation3 + $0x18] sm:$0xff]  ;;  %vm2731_vm7 = vcmp.gt.s32.totalorder %v2714_v43, %v5763_v24  ;;  %v2716_v49 = vld [vmem:[%s6315_s1 + $0x48] sm:$0xff]  ;;  %v3722_v51 = vsel %vm2730_vm6, 1, %v4992_v7  ;;  %vm2732_vm8 = vcmp.gt.s32.totalorder %v2715_v48, %v5763_v24  ;;  %v2717_v53 = vld [vmem:[%s6315_s1 + $0x50] sm:$0xff]  ;;  %s5863_s22 = scalar_lea.vmem [#allocation2], %s4290_s21 }
 0x33c   : > { %3034 = vmatprep.subr.bf16.mxu0 %v4577_v9  ;;  %v2827_v50 = vpack.c.bf16 %v2813_v46, %v2812_v45  ;;  %v3723_v52 = vsel %vm2731_vm7, 1, %v4992_v7  ;;  %vm2733_vm9 = vcmp.gt.s32.totalorder %v2716_v49, %v5763_v24  ;;  %v2718_v54 = vld [vmem:[%s6315_s1 + $0x58] sm:$0xff]  ;;  %v3724_v55 = vsel %vm2732_vm8, 1, %v4992_v7  ;;  %v2814_v56 = vld [vmem:[#allocation3 + $0x20] sm:$0xff]  ;;  %v2815_v57 = vld [vmem:[#allocation3 + $0x28] sm:$0xff] }
 0x33d   : > { %3146 = vmatpush1.bf16.msra.mxu1 %v4594_v15  ;;  %3742 = vperm.xlu1 %4561, %v3719_v41   ;;  %v3725_v58 = vsel %vm2733_vm9, 1, %v4992_v7  ;;  %vm2734_vm10 = vcmp.gt.s32.totalorder %v2717_v53, %v5763_v24  ;;  %vm2735_vm11 = vcmp.gt.s32.totalorder %v2718_v54, %v5763_v24  ;;  %v2719_v5 = vld [vmem:[%s6315_s1 + $0x60] sm:$0xff]  ;;  %v2720_v6 = vld [vmem:[%s6315_s1 + $0x68] sm:$0xff]  ;;  %v2828_v8 = vpack.c.bf16 %v2815_v57, %v2814_v56  ;;  %v2721_v61 = vld [vmem:[%s6315_s1 + $0x70] sm:$0xff] }
 0x33e   : > { %3147 = vmatprep.subr.bf16.mxu1 %v4597_v16  ;;  %3736 = vperm.xlu0 %4560, %v3717_v40   ;;  %v3726_v59 = vsel %vm2734_vm10, 1, %v4992_v7  ;;  %v3727_v60 = vsel %vm2735_vm11, 1, %v4992_v7  ;;  %vm2736_vm12 = vcmp.gt.s32.totalorder %v2719_v5, %v5763_v24  ;;  %vm2737_vm13 = vcmp.gt.s32.totalorder %v2720_v6, %v5763_v24  ;;  %v2722_v62 = vld [vmem:[%s6315_s1 + $0x78] sm:$0xff]  ;;  %v2816_v0 = vld [vmem:[#allocation3 + $0x30] sm:$0xff]  ;;  %v2818_v11 = vld [vmem:[#allocation3 + $0x40] sm:$0xff] }
 0x33f   : > { %3035 = vmatpush1.bf16.msra.mxu0 %v4581_v13  ;;  %v3728_v63 = vsel %vm2736_vm12, 1, %v4992_v7  ;;  %v2817_v1 = vld [vmem:[#allocation3 + $0x38] sm:$0xff]  ;;  %v3729_v2 = vsel %vm2737_vm13, 1, %v4992_v7  ;;  %vm2738_vm14 = vcmp.gt.s32.totalorder %v2721_v61, %v5763_v24  ;;  %vm2739_vm15 = vcmp.gt.s32.totalorder %v2722_v62, %v5763_v24  ;;  %v2819_v12 = vld [vmem:[#allocation3 + $0x48] sm:$0xff]  ;;  %v2748_v35 = vld [vmem:[%s5863_s22 + $0x10] sm:$0xff] }
 0x340   : > { %3036 = vmatprep.subr.bf16.mxu0 %v4583_v14  ;;  %v2829_v4 = vpack.c.bf16 %v2817_v1, %v2816_v0  ;;  %v3730_v9 = vsel %vm2738_vm14, 1, %v4992_v7  ;;  %v3731_v10 = vsel %vm2739_vm15, 1, %v4992_v7  ;;  %v2830_v13 = vpack.c.bf16 %v2819_v12, %v2818_v11  ;;  %v2820_v14 = vld [vmem:[#allocation3 + $0x50] sm:$0xff]  ;;  %v2821_v15 = vld [vmem:[#allocation3 + $0x58] sm:$0xff]  ;;  %v2747_v24 = vld [vmem:[%s5863_s22 + $0x8] sm:$0xff] }
 0x341   : > { %3148 = vmatpush1.bf16.msra.mxu1 %v4600_v19  ;;  %3748 = vperm.xlu1 %4561, %v3721_v47   ;;  %v2831_v16 = vpack.c.bf16 %v2821_v15, %v2820_v14  ;;  %v2751_v29 = vld [vmem:[%s5863_s22 + $0x28] sm:$0xff]  ;;  %v2749_v38 = vld [vmem:[%s5863_s22 + $0x18] sm:$0xff]  ;;  %v2752_v41 = vld [vmem:[%s5863_s22 + $0x30] sm:$0xff] }
 0x342   : > { %3149 = vmatprep.subr.bf16.mxu1 %v4601_v20  ;;  %3745 = vperm.xlu0 %4560, %v3720_v44   ;;  %v2824_v20 = vld [vmem:[#allocation3 + $0x70] sm:$0xff]  ;;  %v2754_v3 = vld [vmem:[%s5863_s22 + $0x40] sm:$0xff]  ;;  %v2753_v45 = vld [vmem:[%s5863_s22 + $0x38] sm:$0xff] }
 0x343   : > { %3037 = vmatpush1.bf16.msra.mxu0 %v4587_v17  ;;  %v2822_v17 = vld [vmem:[#allocation3 + $0x60] sm:$0xff]  ;;  %v2755_v46 = vld [vmem:[%s5863_s22 + $0x48] sm:$0xff] }
 0x344   : > { %3038 = vmatprep.subr.bf16.mxu0 %v4589_v18  ;;  %v2823_v18 = vld [vmem:[#allocation3 + $0x68] sm:$0xff]  ;;  %v2766_v15 = vld [vmem:[%s5863_s22 + $0xa0] sm:$0xff] }
 0x345   : > { %3150 = vmatpush1.bf16.msra.mxu1 %v4603_v23  ;;  %3754 = vperm.xlu1 %4561, %v3723_v52   ;;  %v2832_v19 = vpack.c.bf16 %v2823_v18, %v2822_v17  ;;  %v2746_v23 = vld [vmem:[%s5863_s22] sm:$0xff] }
 0x346   : > { %3151 = vmatprep.subr.bf16.mxu1 %v4604_v26  ;;  %3751 = vperm.xlu0 %4560, %v3722_v51   ;;  %v2750_v26 = vld [vmem:[%s5863_s22 + $0x20] sm:$0xff] }
 0x347   : > { %3039 = vmatpush1.bf16.msra.mxu0 %v4593_v21  ;;  %v2825_v21 = vld [vmem:[#allocation3 + $0x78] sm:$0xff] }
 0x348   : > { %3040 = vmatprep.subr.bf16.mxu0 %v4595_v22  ;;  %v2833_v22 = vpack.c.bf16 %v2825_v21, %v2824_v20 }
 0x349   : > { %3152 = vmatpush1.bf16.msra.mxu1 %v4606_v33  ;;  %3760 = vperm.xlu1 %4561, %v3725_v58  }
 0x34a   : > { %3153 = vmatprep.subr.bf16.mxu1 %v4607_v36  ;;  %3757 = vperm.xlu0 %4560, %v3724_v55   ;;  %v2759_v55 = vld [vmem:[%s5863_s22 + $0x68] sm:$0xff] }
 0x34b   : > { %3041 = vmatpush1.bf16.msra.mxu0 %v4599_v25 }
 0x34d   : > { %3154 = vmatpush1.bf16.msra.mxu1 %v4609_v42  ;;  %3766 = vperm.xlu1 %4561, %v3727_v60  }
 0x34e   : > { %3059 = vmatmul.mubr.bf16.vlgmr.msra.gmra.mrb[0].mxu0 %v2826_v39  ;;  %3763 = vperm.xlu0 %4560, %v3726_v59  }
 0x34f   : > { %3068 = vmatprep.mubr.bf16.mxu0 %v4992_v7 }
 0x350   : > { %3172 = vmatmul.mubr.bf16.vlgmr.msra.gmra.mrb[0].mxu1 %v2826_v39 }
 0x351   : > { %3181 = vmatprep.mubr.bf16.mxu1 %v4992_v7  ;;  %3772 = vperm.xlu1 %4561, %v3729_v2   ;;  %v2762_v2 = vld [vmem:[%s5863_s22 + $0x80] sm:$0xff] }
 0x352   : > { %3769 = vperm.xlu0 %4560, %v3728_v63  }
 0x355   : > { %3778 = vperm.xlu1 %4561, %v3731_v10   ;;  %v2763_v10 = vld [vmem:[%s5863_s22 + $0x88] sm:$0xff] }
 0x356   : > { %3069 = vmatmul.mubr.bf16.gmra.mrb[4].mxu0 %v2827_v50  ;;  %3775 = vperm.xlu0 %4560, %v3730_v9  }
 0x357   : > { %3078 = vmatprep.mubr.bf16.mxu0 %v4992_v7 }
 0x358   : > { %3182 = vmatmul.mubr.bf16.gmra.mrb[4].mxu1 %v2827_v50  ;;  %v2758_v50 = vld [vmem:[%s5863_s22 + $0x60] sm:$0xff] }
 0x359   : > { %3191 = vmatprep.mubr.bf16.mxu1 %v4992_v7 }
 0x35e   : > { %3079 = vmatmul.mubr.bf16.gmra.mrb[8].mxu0 %v2828_v8 }
 0x35f   : > { %3088 = vmatprep.mubr.bf16.mxu0 %v4992_v7 }
 0x360   : > { %3192 = vmatmul.mubr.bf16.gmra.mrb[8].mxu1 %v2828_v8 }
 0x361   : > { %3201 = vmatprep.mubr.bf16.mxu1 %v4992_v7 }
 0x366   : > { %3089 = vmatmul.mubr.bf16.gmra.mrb[12].mxu0 %v2829_v4 }
 0x367   : > { %3098 = vmatprep.mubr.bf16.mxu0 %v4992_v7 }
 0x368   : > { %3202 = vmatmul.mubr.bf16.gmra.mrb[12].mxu1 %v2829_v4 }
 0x369   : > { %3211 = vmatprep.mubr.bf16.mxu1 %v4992_v7 }
 0x36e   : > { %3099 = vmatmul.mubr.bf16.gmra.mrb[16].mxu0 %v2830_v13 }
 0x36f   : > { %3108 = vmatprep.mubr.bf16.mxu0 %v4992_v7 }
 0x370   : > { %3212 = vmatmul.mubr.bf16.gmra.mrb[16].mxu1 %v2830_v13 }
 0x371   : > { %3221 = vmatprep.mubr.bf16.mxu1 %v4992_v7 }
 0x376   : > { %3109 = vmatmul.mubr.bf16.gmra.mrb[20].mxu0 %v2831_v16 }
 0x377   : > { %3118 = vmatprep.mubr.bf16.mxu0 %v4992_v7 }
 0x378   : > { %3222 = vmatmul.mubr.bf16.gmra.mrb[20].mxu1 %v2831_v16 }
 0x379   : > { %3231 = vmatprep.mubr.bf16.mxu1 %v4992_v7 }
 0x37e   : > { %3119 = vmatmul.mubr.bf16.gmra.mrb[24].mxu0 %v2832_v19 }
 0x37f   : > { %3128 = vmatprep.mubr.bf16.mxu0 %v4992_v7 }
 0x380   : > { %3232 = vmatmul.mubr.bf16.gmra.mrb[24].mxu1 %v2832_v19 }
 0x381   : > { %3241 = vmatprep.mubr.bf16.mxu1 %v4992_v7 }
 0x386   : > { %3129 = vmatmul.mubr.bf16.gmra.mrb[28].mxu0 %v2833_v22 }
 0x388   : > { %3242 = vmatmul.mubr.bf16.gmra.mrb[28].mxu1 %v2833_v22 }
 0x421   : > { %v3060_v25 = vpop.f32.mrb[0].mxu0 }
 0x422   : > { %v3252_v28 = vadd.f32 %v3060_v25, %v2746_v23  ;;  %v3062_v7 = vpop.f32.mrb[1].mxu0 }
 0x423   : > { %v3253_v30 = vadd.f32 %v3062_v7, %v2747_v24  ;;  %v3064_v31 = vpop.f32.mrb[2].mxu0  ;;  %v3173_v40 = vpop.f32.mrb[0].mxu1 }
 0x424   : > { %v4238_v32 = vmul.f32 -1.442695, %v3252_v28  ;;  %v3256_v33 = vadd.f32 %v3064_v31, %v2750_v26  ;;  %v3066_v34 = vpop.f32.mrb[3].mxu0  ;;  %v3254_v43 = vadd.f32 %v3173_v40, %v2748_v35  ;;  %v3175_v44 = vpop.f32.mrb[1].mxu1  ;;  %v2767_v31 = vld [vmem:[%s5863_s22 + $0xa8] sm:$0xff] }
 0x425   : > { %v4254_v36 = vmul.f32 -1.442695, %v3253_v30  ;;  %v3257_v37 = vadd.f32 %v3066_v34, %v2751_v29  ;;  %v3255_v47 = vadd.f32 %v3175_v44, %v2749_v38  ;;  %v3177_v48 = vpop.f32.mrb[2].mxu1 }
 0x426   : > { %4610 = vpow2.f32 %v4238_v32  ;;  %v4239_v39 = vmul.f32 -1.442695, %v3256_v33  ;;  %v3258_v51 = vadd.f32 %v3177_v48, %v2752_v41  ;;  %v3179_v52 = vpop.f32.mrb[3].mxu1  ;;  %v2756_v48 = vld [vmem:[%s5863_s22 + $0x50] sm:$0xff] }
 0x427   : > { %4612 = vpow2.f32 %v4254_v36  ;;  %v4255_v42 = vmul.f32 -1.442695, %v3257_v37  ;;  %v4270_v56 = vmul.f32 -1.442695, %v3255_v47  ;;  %v3259_v57 = vadd.f32 %v3179_v52, %v2753_v45  ;;  %v2757_v37 = vld [vmem:[%s5863_s22 + $0x58] sm:$0xff] }
 0x428   : > { %4614 = vpow2.f32 %v4239_v39  ;;  %v5892_v39 = vpop.permute.xlu0 %3733 }
 0x429   : > { %4616 = vpow2.f32 %v4255_v42  ;;  %v3070_v49 = vpop.f32.mrb[4].mxu0  ;;  %v4271_v63 = vmul.f32 -1.442695, %v3259_v57  ;;  %vm3780_vm0 = vcmp.eq.s32.totalorder %v5892_v39, 1 }
 0x42a   : > { %v3260_v53 = vadd.f32 %v3070_v49, %v2754_v3  ;;  %v3072_v54 = vpop.f32.mrb[5].mxu0  ;;  %4618 = vtanh.f32 %v3254_v43 }
 0x42b   : > { %v3261_v58 = vadd.f32 %v3072_v54, %v2755_v46  ;;  %v3074_v5 = vpop.f32.mrb[6].mxu0  ;;  %4620 = vpow2.f32 %v4270_v56  ;;  %v5877_v0 = vpop.f32.mrb[4].mxu1 }
 0x42c   : > { %v4240_v6 = vmul.f32 -1.442695, %v3260_v53  ;;  %v3264_v8 = vadd.f32 %v3074_v5, %v2758_v50  ;;  %v3076_v59 = vpop.f32.mrb[7].mxu0  ;;  %4622 = vtanh.f32 %v3258_v51  ;;  %v3185_v4 = vpop.f32.mrb[5].mxu1  ;;  %v2761_v53 = vld [vmem:[%s5863_s22 + $0x78] sm:$0xff] }
 0x42d   : > { %v4256_v60 = vmul.f32 -1.442695, %v3261_v58  ;;  %v3265_v61 = vadd.f32 %v3076_v59, %v2759_v55  ;;  %v5881_v11 = vpop.f32.mrb[6].mxu1  ;;  %v3263_v49 = vadd.f32 %v3185_v4, %v2757_v37  ;;  %v2760_v58 = vld [vmem:[%s5863_s22 + $0x70] sm:$0xff]  ;;  %v2771_v4 = vld [vmem:[%s5863_s22 + $0xc8] sm:$0xff] }
 0x42e   : > { %4624 = vpow2.f32 %v4240_v6  ;;  %v4241_v62 = vmul.f32 -1.442695, %v3264_v8  ;;  %v5884_v16 = vpop.f32.mrb[7].mxu1  ;;  %v3620_v6 = vld [vmem:[#allocation4] sm:$0xff] }
 0x42f   : > { %4626 = vpow2.f32 %v4256_v60  ;;  %v4257_v1 = vmul.f32 -1.442695, %v3265_v61  ;;  %v3262_v60 = vadd.f32 %v5877_v0, %v2756_v48  ;;  %v2770_v61 = vld [vmem:[%s5863_s22 + $0xc0] sm:$0xff] }
 0x430   : > { %v4611_v9 = vpop.eup %4610  ;;  %4628 = vpow2.f32 %v4241_v62  ;;  %v5903_v62 = vpop.permute.xlu0 %3736 }
 0x431   : > { %v4613_v12 = vpop.eup %4612  ;;  %v3364_v13 = vadd.f32 1.0, %v4611_v9  ;;  %4630 = vpow2.f32 %v4257_v1  ;;  %v3080_v14 = vpop.f32.mrb[8].mxu0  ;;  %v4272_v1 = vmul.f32 -1.442695, %v3263_v49  ;;  %vm3781_vm1 = vcmp.eq.s32.totalorder %v5903_v62, 1  ;;  %v2764_v49 = vld [vmem:[%s5863_s22 + $0x90] sm:$0xff] }
 0x432   : > { %v4615_v17 = vpop.eup %4614  ;;  %v3460_v18 = vadd.f32 1.0, %v4613_v12  ;;  %4632 = vpow2.f32 %v4271_v63  ;;  %v3268_v19 = vadd.f32 %v3080_v14, %v2762_v2  ;;  %v3082_v20 = vpop.f32.mrb[9].mxu0  ;;  %v3267_v2 = vadd.f32 %v5884_v16, %v2761_v53 }
 0x433   : > { %v4617_v21 = vpop.eup %4616  ;;  %4634 = vrcp.f32 %v3364_v13  ;;  %v3365_v22 = vadd.f32 1.0, %v4615_v17  ;;  %v3269_v23 = vadd.f32 %v3082_v20, %v2763_v10  ;;  %v3084_v24 = vpop.f32.mrb[10].mxu0  ;;  %v3621_v10 = vld [vmem:[#allocation4 + $0x8] sm:$0xff]  ;;  %v3266_v14 = vadd.f32 %v5881_v11, %v2760_v58  ;;  %v2769_v58 = vld [vmem:[%s5863_s22 + $0xb8] sm:$0xff] }
 0x434   : > { %4636 = vrcp.f32 %v3460_v18  ;;  %v3461_v25 = vadd.f32 1.0, %v4617_v21  ;;  %v4242_v26 = vmul.f32 -1.442695, %v3268_v19  ;;  %v3272_v28 = vadd.f32 %v3084_v24, %v2766_v15  ;;  %v3086_v7 = vpop.f32.mrb[11].mxu0  ;;  %v4619_v29 = vpop.eup %4618  ;;  %v2774_v15 = vld [vmem:[%s5863_s22 + $0xe0] sm:$0xff]  ;;  %v2775_v20 = vld [vmem:[%s5863_s22 + $0xe8] sm:$0xff] }
 0x435   : > { %4638 = vrcp.f32 %v3365_v22  ;;  %v4258_v30 = vmul.f32 -1.442695, %v3269_v23  ;;  %v4621_v32 = vpop.eup %4620  ;;  %v5887_v34 = vpop.f32.mrb[8].mxu1  ;;  %v3273_v41 = vadd.f32 %v3086_v7, %v2767_v31 }
 0x436   : > { %4640 = vrcp.f32 %v3461_v25  ;;  %v4243_v33 = vmul.f32 -1.442695, %v3272_v28  ;;  %v4623_v35 = vpop.eup %4622  ;;  %v3572_v36 = vadd.f32 1.0, %v4621_v32  ;;  %v5890_v38 = vpop.f32.mrb[9].mxu1 }
 0x437   : > { %4642 = vpow2.f32 %v4242_v26  ;;  %v5894_v42 = vpop.f32.mrb[10].mxu1  ;;  %v4259_v57 = vmul.f32 -1.442695, %v3273_v41 }
 0x438   : > { %v4625_v40 = vpop.eup %4624  ;;  %4644 = vpow2.f32 %v4258_v30  ;;  %v5896_v45 = vpop.f32.mrb[11].mxu1 }
 0x439   : > { %v4627_v3 = vpop.eup %4626  ;;  %v3366_v43 = vadd.f32 1.0, %v4625_v40  ;;  %4646 = vrcp.f32 %v3572_v36  ;;  %v3090_v44 = vpop.f32.mrb[12].mxu0  ;;  %v2765_v36 = vld [vmem:[%s5863_s22 + $0x98] sm:$0xff] }
 0x43a   : > { %v4629_v46 = vpop.eup %4628  ;;  %v3462_v47 = vadd.f32 1.0, %v4627_v3  ;;  %4648 = vpow2.f32 %v4243_v33  ;;  %v3092_v50 = vpop.f32.mrb[13].mxu0  ;;  %v3276_v19 = vadd.f32 %v3090_v44, %v2770_v61 }
 0x43b   : > { %v4631_v51 = vpop.eup %4630  ;;  %4650 = vrcp.f32 %v3366_v43  ;;  %v3367_v52 = vadd.f32 1.0, %v4629_v46  ;;  %v3094_v54 = vpop.f32.mrb[14].mxu0  ;;  %v3277_v23 = vadd.f32 %v3092_v50, %v2771_v4 }
 0x43c   : > { %v4633_v55 = vpop.eup %4632  ;;  %4652 = vrcp.f32 %v3462_v47  ;;  %v3463_v56 = vadd.f32 1.0, %v4631_v51  ;;  %v3096_v5 = vpop.f32.mrb[15].mxu0  ;;  %v3280_v30 = vadd.f32 %v3094_v54, %v2774_v15  ;;  %v4244_v3 = vmul.f32 -1.442695, %v3276_v19 }
 0x43d   : > { %v4635_v8 = vpop.eup %4634  ;;  %4654 = vrcp.f32 %v3367_v52  ;;  %v3573_v59 = vadd.f32 1.0, %v4633_v55  ;;  %v5907_v12 = vpop.f32.mrb[12].mxu1  ;;  %v4260_v48 = vmul.f32 -1.442695, %v3277_v23  ;;  %v3271_v52 = vadd.f32 %v5890_v38, %v2765_v36 }
 0x43e   : > { %v4637_v63 = vpop.eup %4636  ;;  %4656 = vrcp.f32 %v3463_v56  ;;  %v3652_v9 = vmul.f32 %v4635_v8, %v4619_v29  ;;  %v5912_v17 = vpop.f32.mrb[13].mxu1  ;;  %v4273_v29 = vmul.f32 -1.442695, %v3267_v2  ;;  %v4245_v51 = vmul.f32 -1.442695, %v3280_v30  ;;  %v3623_v2 = vld [vmem:[#allocation4 + $0x18] sm:$0xff] }
 0x43f   : > { %v4639_v13 = vpop.eup %4638  ;;  %4658 = vrcp.f32 %v3573_v59  ;;  %v3636_v0 = vmul.f32 %v4637_v63, %v3620_v6  ;;  %v5916_v21 = vpop.f32.mrb[14].mxu1  ;;  %v3270_v38 = vadd.f32 %v5887_v34, %v2764_v49  ;;  %v2768_v59 = vld [vmem:[%s5863_s22 + $0xb0] sm:$0xff]  ;;  %v2778_v63 = vld [vmem:[%s5863_s22 + $0x100] sm:$0xff]  ;;  %v2779_v30 = vld [vmem:[%s5863_s22 + $0x108] sm:$0xff] }
 0x440   : > { %v4641_v18 = vpop.eup %4640  ;;  %4660 = vpow2.f32 %v4259_v57  ;;  %v3653_v16 = vmul.f32 %v4639_v13, %v4623_v35  ;;  %v5922_v26 = vpop.f32.mrb[15].mxu1  ;;  %v3281_v35 = vadd.f32 %v3096_v5, %v2775_v20  ;;  %v3622_v5 = vld [vmem:[#allocation4 + $0x10] sm:$0xff]  ;;  %v3275_v13 = vadd.f32 %v5896_v45, %v2769_v58 }
 0x441   : > { %v4643_v22 = vpop.eup %4642  ;;  %4662 = vtanh.f32 %v3262_v60  ;;  %v5918_v11 = vadd.f32 %v3652_v9, %v3636_v0  ;;  %v5920_v24 = vpop.f32.mrb[16].mxu0  ;;  %v3637_v25 = vmul.f32 %v4641_v18, %v3621_v10  ;;  %v3274_v18 = vadd.f32 %v5894_v42, %v2768_v59 }
 0x442   : > { %v4645_v28 = vpop.eup %4644  ;;  %v3368_v7 = vadd.f32 1.0, %v4643_v22  ;;  %4664 = vpow2.f32 %v4272_v1  ;;  %v5924_v31 = vpop.f32.mrb[17].mxu0  ;;  %v4261_v57 = vmul.f32 -1.442695, %v3281_v35 }
 0x443   : > { %v5926_v32 = vpop.eup %4646  ;;  %v3464_v33 = vadd.f32 1.0, %v4645_v28  ;;  %4666 = vtanh.f32 %v3266_v14  ;;  %v3844_v37 = vsel %vm3780_vm0, %v5918_v11, %v3620_v6  ;;  %v5932_v40 = vpop.f32.mrb[18].mxu0  ;;  %v5934_v43 = vadd.f32 %v3653_v16, %v3637_v25 }
 0x444   : > { %v4649_v41 = vpop.eup %4648  ;;  %4668 = vrcp.f32 %v3368_v7  ;;  %3860 = vst [vmem:[#allocation4] sm:$0xff] %v3844_v37  ;;  %v5936_v44 = vpop.f32.mrb[19].mxu0  ;;  %v3284_v16 = vadd.f32 %v5920_v24, %v2778_v63  ;;  %v2782_v37 = vld [vmem:[%s5863_s22 + $0x120] sm:$0xff] }
 0x445   : > { %v4651_v46 = vpop.eup %4650  ;;  %4670 = vrcp.f32 %v3464_v33  ;;  %v3369_v47 = vadd.f32 1.0, %v4649_v41  ;;  %v3845_v53 = vsel %vm3781_vm1, %v5934_v43, %v3621_v10  ;;  %v5943_v54 = vpop.permute.xlu1 %3739  ;;  %v4274_v10 = vmul.f32 -1.442695, %v3271_v52 }
 0x446   : > { %v4653_v50 = vpop.eup %4652  ;;  %4672 = vpow2.f32 %v4273_v29  ;;  %v5945_v55 = vpop.f32.mrb[16].mxu1  ;;  %3861 = vst [vmem:[#allocation4 + $0x8] sm:$0xff] %v3845_v53  ;;  %vm3782_vm2 = vcmp.eq.s32.totalorder %v5943_v54, 1  ;;  %v4275_v29 = vmul.f32 -1.442695, %v3275_v13  ;;  %v3285_v52 = vadd.f32 %v5924_v31, %v2779_v30  ;;  %v2783_v53 = vld [vmem:[%s5863_s22 + $0x128] sm:$0xff] }
 0x447   : > { %v4655_v56 = vpop.eup %4654  ;;  %4674 = vrcp.f32 %v3369_v47  ;;  %v5948_v6 = vpop.f32.mrb[17].mxu1  ;;  %v3638_v14 = vmul.f32 %v4653_v50, %v3622_v5  ;;  %v3289_v13 = vadd.f32 %v5936_v44, %v2783_v53 }
 0x448   : > { %v4657_v8 = vpop.eup %4656  ;;  %4676 = vpow2.f32 %v4244_v3  ;;  %v5952_v60 = vpop.f32.mrb[18].mxu1 }
 0x449   : > { %v5954_v61 = vpop.eup %4658  ;;  %4678 = vpow2.f32 %v4260_v48  ;;  %v5957_v1 = vpop.f32.mrb[20].mxu0  ;;  %v3639_v23 = vmul.f32 %v4657_v8, %v3623_v2 }
 0x44a   : > { %v5959_v4 = vpop.f32.mrb[19].mxu1  ;;  %v4661_v9 = vpop.eup %4660  ;;  %4680 = vpow2.f32 %v4245_v51 }
 0x44b   : > { %v5962_v15 = vpop.f32.mrb[21].mxu0  ;;  %v4663_v34 = vpop.eup %4662  ;;  %v3465_v0 = vadd.f32 1.0, %v4661_v9  ;;  %4682 = vpow2.f32 %v4261_v57 }
 0x44c   : > { %v5965_v19 = vpop.f32.mrb[22].mxu0  ;;  %v4665_v20 = vpop.eup %4664  ;;  %4684 = vtanh.f32 %v3270_v38  ;;  %v3654_v22 = vmul.f32 %v4663_v34, %v4651_v46  ;;  %v4246_v46 = vmul.f32 -1.442695, %v3284_v16  ;;  %v3624_v38 = vld [vmem:[#allocation4 + $0x20] sm:$0xff]  ;;  %v4262_v34 = vmul.f32 -1.442695, %v3285_v52 }
 0x44d   : > { %v5968_v25 = vpop.permute.xlu1 %3742  ;;  %v5970_v45 = vpop.f32.mrb[23].mxu0  ;;  %4686 = vrcp.f32 %v3465_v0  ;;  %v3574_v7 = vadd.f32 1.0, %v4665_v20  ;;  %v2773_v0 = vld [vmem:[%s5863_s22 + $0xd8] sm:$0xff] }
 0x44e   : > { %v4667_v28 = vpop.eup %4666  ;;  %4688 = vpow2.f32 %v4274_v10  ;;  %v5974_v33 = vadd.f32 %v3654_v22, %v3638_v14  ;;  %v5976_v24 = vpop.f32.mrb[20].mxu1  ;;  %vm3783_vm3 = vcmp.eq.s32.totalorder %v5968_v25, 1 }
 0x44f   : > { %v4669_v42 = vpop.eup %4668  ;;  %v3655_v35 = vmul.f32 %v4667_v28, %v4655_v56  ;;  %4690 = vrcp.f32 %v3574_v7  ;;  %v5980_v41 = vpop.f32.mrb[21].mxu1  ;;  %v3625_v28 = vld [vmem:[#allocation4 + $0x28] sm:$0xff] }
 0x450   : > { %v4671_v36 = vpop.eup %4670  ;;  %4692 = vtanh.f32 %v3274_v18  ;;  %v3846_v47 = vsel %vm3782_vm2, %v5974_v33, %v3622_v5  ;;  %v5987_v49 = vpop.f32.mrb[22].mxu1  ;;  %v3288_v5 = vadd.f32 %v5932_v40, %v2782_v37 }
 0x451   : > { %v4673_v3 = vpop.eup %4672  ;;  %v5985_v48 = vadd.f32 %v3655_v35, %v3639_v23  ;;  %4694 = vtanh.f32 %v5918_v11  ;;  %3862 = vst [vmem:[#allocation4 + $0x10] sm:$0xff] %v3846_v47  ;;  %v5994_v56 = vpop.f32.mrb[24].mxu0  ;;  %v3640_v18 = vmul.f32 %v4671_v36, %v3624_v38  ;;  %v3279_v36 = vadd.f32 %v5912_v17, %v2773_v0 }
 0x452   : > { %v5989_v50 = vpop.eup %4674  ;;  %v3575_v51 = vadd.f32 1.0, %v4673_v3  ;;  %v5996_v57 = vpop.f32.mrb[23].mxu1  ;;  %4696 = vpow2.f32 %v4275_v29  ;;  %v4247_v23 = vmul.f32 -1.442695, %v3288_v5  ;;  %v2772_v29 = vld [vmem:[%s5863_s22 + $0xd0] sm:$0xff] }
 0x453   : > { %v4677_v58 = vpop.eup %4676  ;;  %v3847_v8 = vsel %vm3783_vm3, %v5985_v48, %v3623_v2  ;;  %v6002_v59 = vpop.f32.mrb[25].mxu0  ;;  %v4263_v3 = vmul.f32 -1.442695, %v3289_v13  ;;  %v2776_v13 = vld [vmem:[%s5863_s22 + $0xf0] sm:$0xff] }
 0x454   : > { %v4679_v11 = vpop.eup %4678  ;;  %4698 = vrcp.f32 %v3575_v51  ;;  %v3370_v31 = vadd.f32 1.0, %v4677_v58  ;;  %3863 = vst [vmem:[#allocation4 + $0x18] sm:$0xff] %v3847_v8  ;;  %v6004_v63 = vpop.f32.mrb[26].mxu0 }
 0x455   : > { %v4681_v9 = vpop.eup %4680  ;;  %v3466_v10 = vadd.f32 1.0, %v4679_v11  ;;  %4700 = vpow2.f32 %v4246_v46  ;;  %v6007_v40 = vpop.f32.mrb[27].mxu0  ;;  %v3278_v11 = vadd.f32 %v5907_v12, %v2772_v29 }
 0x456   : > { %v4683_v14 = vpop.eup %4682  ;;  %4702 = vrcp.f32 %v3370_v31  ;;  %v3371_v2 = vadd.f32 1.0, %v4681_v9  ;;  %v6010_v20 = vpop.permute.xlu0 %3745  ;;  %v2786_v31 = vld [vmem:[%s5863_s22 + $0x140] sm:$0xff] }
 0x457   : > { %v4685_v16 = vpop.eup %4684  ;;  %4704 = vrcp.f32 %v3466_v10  ;;  %v3467_v22 = vadd.f32 1.0, %v4683_v14  ;;  %v6012_v7 = vpop.f32.mrb[24].mxu1  ;;  %vm3784_vm4 = vcmp.eq.s32.totalorder %v6010_v20, 1 }
 0x458   : > { %v4687_v44 = vpop.eup %4686  ;;  %4706 = vrcp.f32 %v3371_v2  ;;  %v3656_v30 = vmul.f32 %v4685_v16, %v4669_v42  ;;  %v6015_v35 = vpop.f32.mrb[25].mxu1  ;;  %v2777_v42 = vld [vmem:[%s5863_s22 + $0xf8] sm:$0xff] }
 0x459   : > { %v4689_v37 = vpop.eup %4688  ;;  %4708 = vrcp.f32 %v3467_v22  ;;  %v6019_v46 = vpop.permute.xlu1 %3748  ;;  %v3641_v58 = vmul.f32 %v4687_v44, %v3625_v28  ;;  %v3283_v16 = vadd.f32 %v5922_v26, %v2777_v42  ;;  %v2787_v44 = vld [vmem:[%s5863_s22 + $0x148] sm:$0xff]  ;;  %v3282_v26 = vadd.f32 %v5916_v21, %v2776_v13 }
 0x45a   : > { %v6021_v47 = vpop.f32.mrb[26].mxu1  ;;  %v6023_v51 = vpop.eup %4690  ;;  %v3576_v52 = vadd.f32 1.0, %v4689_v37  ;;  %4710 = vpow2.f32 %v4262_v34  ;;  %v6026_v53 = vadd.f32 %v3656_v30, %v3640_v18  ;;  %vm3785_vm5 = vcmp.eq.s32.totalorder %v6019_v46, 1 }
 0x45b   : > { %v6028_v5 = vpop.f32.mrb[28].mxu0  ;;  %v6030_v8 = vpop.f32.mrb[27].mxu1  ;;  %4712 = vpow2.f32 %v4247_v23  ;;  %v4276_v18 = vmul.f32 -1.442695, %v3279_v36  ;;  %v3293_v39 = vadd.f32 %v5962_v15, %v2787_v44 }
 0x45c   : > { %v4693_v17 = vpop.eup %4692  ;;  %v6034_v9 = vpop.f32.mrb[29].mxu0  ;;  %4714 = vrcp.f32 %v3576_v52  ;;  %v3848_v14 = vsel %vm3784_vm4, %v6026_v53, %v3624_v38 }
 0x45d   : > { %v4695_v10 = vpop.eup %4694  ;;  %v3657_v2 = vmul.f32 %v4693_v17, %v5989_v50  ;;  %v6042_v34 = vpop.f32.mrb[30].mxu0  ;;  %4716 = vtanh.f32 %v5934_v43  ;;  %3864 = vst [vmem:[#allocation4 + $0x20] sm:$0xff] %v3848_v14  ;;  %v3292_v50 = vadd.f32 %v5957_v1, %v2786_v31  ;;  %v2790_v43 = vld [vmem:[%s5863_s22 + $0x160] sm:$0xff]  ;;  %v2791_v31 = vld [vmem:[%s5863_s22 + $0x168] sm:$0xff]  ;;  %v2781_v14 = vld [vmem:[%s5863_s22 + $0x118] sm:$0xff] }
 0x45e   : > { %v4697_v0 = vpop.eup %4696  ;;  %v3700_v12 = vmul.f32 %v4695_v10, %v5926_v32  ;;  %v6047_v22 = vpop.f32.mrb[31].mxu0  ;;  %4718 = vpow2.f32 %v4263_v3  ;;  %v3287_v44 = vadd.f32 %v5948_v6, %v2781_v14 }
 0x45f   : > { %v6049_v23 = vpop.eup %4698  ;;  %v3577_v38 = vadd.f32 1.0, %v4697_v0  ;;  %v6053_v29 = vadd.f32 %v3657_v2, %v3641_v58  ;;  %4720 = vtanh.f32 %v3278_v11  ;;  %v6060_v37 = vpop.f32.mrb[28].mxu1  ;;  %v4248_v17 = vmul.f32 -1.442695, %v3292_v50 }
 0x460   : > { %v4701_v30 = vpop.eup %4700  ;;  %v3796_v32 = vsel %vm3780_vm0, %v3700_v12, %v5765_v27  ;;  %v6065_v52 = vpop.f32.mrb[29].mxu1  ;;  %v4277_v27 = vmul.f32 -1.442695, %v3283_v16  ;;  %v3296_v11 = vadd.f32 %v5965_v19, %v2790_v43  ;;  %v4264_v0 = vmul.f32 -1.442695, %v3293_v39  ;;  %v3627_v39 = vld [vmem:[#allocation4 + $0x38] sm:$0xff] }
 0x461   : > { %v4703_v36 = vpop.eup %4702  ;;  %3812 = vst [vmem:[#allocation3] sm:$0xff] %v3796_v32  ;;  %4722 = vrcp.f32 %v3577_v38  ;;  %v3372_v3 = vadd.f32 1.0, %v4701_v30  ;;  %v3849_v1 = vsel %vm3785_vm5, %v6053_v29, %v3625_v28  ;;  %v6068_v21 = vpop.f32.mrb[30].mxu1  ;;  %v3297_v12 = vadd.f32 %v5970_v45, %v2791_v31  ;;  %v2785_v45 = vld [vmem:[%s5863_s22 + $0x138] sm:$0xff]  ;;  %v2784_v31 = vld [vmem:[%s5863_s22 + $0x130] sm:$0xff] }
 0x462   : > { %v4705_v42 = vpop.eup %4704  ;;  %4724 = vpow2.f32 %v4276_v18  ;;  %3865 = vst [vmem:[#allocation4 + $0x28] sm:$0xff] %v3849_v1  ;;  %v6074_v10 = vpop.f32.mrb[31].mxu1  ;;  %v3626_v18 = vld [vmem:[#allocation4 + $0x30] sm:$0xff]  ;;  %v4249_v38 = vmul.f32 -1.442695, %v3296_v11  ;;  %v4866_v11 = vld [vmem:[#allocation3 + $0x8] sm:$0xff] }
 0x463   : > { %v6070_v58 = vpop.eup %4706  ;;  %4726 = vrcp.f32 %v3372_v3  ;;  %v3642_v43 = vmul.f32 %v4705_v42, %v3626_v18 }
 0x464   : > { %v4709_v28 = vpop.eup %4708  ;;  %4728 = vtanh.f32 %v3282_v26  ;;  %v2780_v26 = vld [vmem:[%s5863_s22 + $0x110] sm:$0xff] }
 0x465   : > { %v4711_v13 = vpop.eup %4710  ;;  %4730 = vtanh.f32 %v5974_v33  ;;  %v6082_v33 = vpop.permute.xlu0 %3751  ;;  %v3286_v42 = vadd.f32 %v5945_v55, %v2780_v26  ;;  %v2795_v55 = vld [vmem:[%s5863_s22 + $0x188] sm:$0xff] }
 0x466   : > { %v4713_v2 = vpop.eup %4712  ;;  %v3468_v15 = vadd.f32 1.0, %v4711_v13  ;;  %4732 = vpow2.f32 %v4277_v27  ;;  %v4265_v27 = vmul.f32 -1.442695, %v3297_v12  ;;  %v2794_v13 = vld [vmem:[%s5863_s22 + $0x180] sm:$0xff]  ;;  %vm3786_vm6 = vcmp.eq.s32.totalorder %v6082_v33, 1 }
 0x467   : > { %v6079_v16 = vpop.eup %4714  ;;  %v3373_v19 = vadd.f32 1.0, %v4713_v2  ;;  %4734 = vpow2.f32 %v4248_v17  ;;  %v4278_v2 = vmul.f32 -1.442695, %v3287_v44 }
 0x468   : > { %v4717_v50 = vpop.eup %4716  ;;  %4736 = vrcp.f32 %v3468_v15  ;;  %v3291_v15 = vadd.f32 %v5959_v4, %v2785_v45  ;;  %v3301_v45 = vadd.f32 %v6002_v59, %v2795_v55  ;;  %v3629_v55 = vld [vmem:[#allocation4 + $0x48] sm:$0xff] }
 0x469   : > { %v4719_v30 = vpop.eup %4718  ;;  %4738 = vrcp.f32 %v3373_v19  ;;  %v3701_v32 = vmul.f32 %v4717_v50, %v5954_v61  ;;  %v3643_v19 = vmul.f32 %v4709_v28, %v3627_v39  ;;  %v3290_v50 = vadd.f32 %v5952_v60, %v2784_v31 }
 0x46a   : > { %v4721_v3 = vpop.eup %4720  ;;  %v3469_v1 = vadd.f32 1.0, %v4719_v30  ;;  %4740 = vpow2.f32 %v4264_v0  ;;  %v3300_v30 = vadd.f32 %v5994_v56, %v2794_v13  ;;  %v4279_v26 = vmul.f32 -1.442695, %v3291_v15  ;;  %v2799_v13 = vld [vmem:[%s5863_s22 + $0x1a8] sm:$0xff]  ;;  %v2789_v15 = vld [vmem:[%s5863_s22 + $0x158] sm:$0xff] }
 0x46b   : > { %v6087_v17 = vpop.eup %4722  ;;  %v3797_v6 = vsel %vm3781_vm1, %v3701_v32, %v4866_v11  ;;  %4742 = vpow2.f32 %v4249_v38  ;;  %v3658_v14 = vmul.f32 %v4721_v3, %v4703_v36  ;;  %v6101_v36 = vpop.permute.xlu1 %3754 }
 0x46c   : > { %v4725_v61 = vpop.eup %4724  ;;  %3813 = vst [vmem:[#allocation3 + $0x8] sm:$0xff] %v3797_v6  ;;  %4744 = vrcp.f32 %v3469_v1  ;;  %vm3787_vm7 = vcmp.eq.s32.totalorder %v6101_v36, 1  ;;  %v4867_v1 = vld [vmem:[#allocation3 + $0x10] sm:$0xff] }
 0x46d   : > { %v6096_v0 = vpop.eup %4726  ;;  %v3578_v12 = vadd.f32 1.0, %v4725_v61  ;;  %4746 = vtanh.f32 %v5985_v48  ;;  %v6099_v62 = vadd.f32 %v3658_v14, %v3642_v43  ;;  %v2798_v43 = vld [vmem:[%s5863_s22 + $0x1a0] sm:$0xff] }
 0x46e   : > { %v4729_v38 = vpop.eup %4728  ;;  %4748 = vpow2.f32 %v4265_v27  ;;  %v4250_v27 = vmul.f32 -1.442695, %v3300_v30  ;;  %v3304_v31 = vadd.f32 %v6004_v63, %v2798_v43  ;;  %v2802_v43 = vld [vmem:[%s5863_s22 + $0x1c0] sm:$0xff] }
 0x46f   : > { %v4731_v44 = vpop.eup %4730  ;;  %4750 = vrcp.f32 %v3578_v12  ;;  %v3850_v4 = vsel %vm3786_vm6, %v6099_v62, %v3626_v18  ;;  %v3659_v48 = vmul.f32 %v4729_v38, %v6070_v58  ;;  %v3628_v12 = vld [vmem:[#allocation4 + $0x40] sm:$0xff]  ;;  %v6125_v38 = vpop.permute.xlu0 %3757 }
 0x470   : > { %v4733_v32 = vpop.eup %4732  ;;  %v3702_v28 = vmul.f32 %v4731_v44, %v6023_v51  ;;  %4752 = vtanh.f32 %v3286_v42  ;;  %3866 = vst [vmem:[#allocation4 + $0x30] sm:$0xff] %v3850_v4  ;;  %v4251_v30 = vmul.f32 -1.442695, %v3304_v31  ;;  %vm3788_vm8 = vcmp.eq.s32.totalorder %v6125_v38, 1  ;;  %v6145_v31 = vpop.permute.xlu1 %3760 }
 0x471   : > { %v4735_v60 = vpop.eup %4734  ;;  %v3579_v56 = vadd.f32 1.0, %v4733_v32  ;;  %4754 = vpow2.f32 %v4278_v2  ;;  %v6114_v3 = vadd.f32 %v3659_v48, %v3643_v19  ;;  %v4266_v2 = vmul.f32 -1.442695, %v3301_v45  ;;  %v2788_v48 = vld [vmem:[%s5863_s22 + $0x150] sm:$0xff] }
 0x472   : > { %v4737_v18 = vpop.eup %4736  ;;  %v3798_v58 = vsel %vm3782_vm2, %v3702_v28, %v4867_v1  ;;  %v3374_v51 = vadd.f32 1.0, %v4735_v60  ;;  %4756 = vtanh.f32 %v3290_v50  ;;  %v3295_v32 = vadd.f32 %v5980_v41, %v2789_v15  ;;  %v2793_v28 = vld [vmem:[%s5863_s22 + $0x178] sm:$0xff] }
 0x473   : > { %v4739_v11 = vpop.eup %4738  ;;  %3814 = vst [vmem:[#allocation3 + $0x10] sm:$0xff] %v3798_v58  ;;  %4758 = vrcp.f32 %v3579_v56  ;;  %v3851_v59 = vsel %vm3787_vm7, %v6114_v3, %v3627_v39  ;;  %v3305_v39 = vadd.f32 %v6007_v40, %v2799_v13  ;;  %v4868_v60 = vld [vmem:[#allocation3 + $0x18] sm:$0xff]  ;;  %v3299_v25 = vadd.f32 %v5996_v57, %v2793_v28  ;;  %v2803_v57 = vld [vmem:[%s5863_s22 + $0x1c8] sm:$0xff] }
 0x474   : > { %v4741_v6 = vpop.eup %4740  ;;  %4760 = vrcp.f32 %v3374_v51  ;;  %3867 = vst [vmem:[#allocation4 + $0x38] sm:$0xff] %v3851_v59  ;;  %v2792_v59 = vld [vmem:[%s5863_s22 + $0x170] sm:$0xff]  ;;  %vm3789_vm9 = vcmp.eq.s32.totalorder %v6145_v31, 1 }
 0x475   : > { %v4743_v14 = vpop.eup %4742  ;;  %v3470_v54 = vadd.f32 1.0, %v4741_v6  ;;  %4762 = vpow2.f32 %v4279_v26  ;;  %v3644_v26 = vmul.f32 %v4737_v18, %v3628_v12  ;;  %v4267_v45 = vmul.f32 -1.442695, %v3305_v39 }
 0x476   : > { %v4745_v61 = vpop.eup %4744  ;;  %v3375_v42 = vadd.f32 1.0, %v4743_v14  ;;  %4764 = vpow2.f32 %v4250_v27  ;;  %v3294_v18 = vadd.f32 %v5976_v24, %v2788_v48  ;;  %v4280_v27 = vmul.f32 -1.442695, %v3295_v32  ;;  %v2807_v32 = vld [vmem:[%s5863_s22 + $0x1e8] sm:$0xff] }
 0x477   : > { %v4747_v19 = vpop.eup %4746  ;;  %4766 = vrcp.f32 %v3470_v54  ;;  %v3308_v14 = vadd.f32 %v6028_v5, %v2802_v43  ;;  %v3313_v43 = vadd.f32 %v6047_v22, %v2807_v32  ;;  %v2801_v22 = vld [vmem:[%s5863_s22 + $0x1b8] sm:$0xff] }
 0x478   : > { %v4749_v63 = vpop.eup %4748  ;;  %4768 = vrcp.f32 %v3375_v42  ;;  %v3703_v50 = vmul.f32 %v4747_v19, %v6049_v23  ;;  %v3298_v42 = vadd.f32 %v5987_v49, %v2792_v59  ;;  %v4281_v19 = vmul.f32 -1.442695, %v3299_v25 }
 0x479   : > { %v6128_v44 = vpop.eup %4750  ;;  %v3471_v4 = vadd.f32 1.0, %v4749_v63  ;;  %4770 = vtanh.f32 %v6026_v53  ;;  %v3645_v53 = vmul.f32 %v4745_v61, %v3629_v55 }
 0x47a   : > { %v4753_v40 = vpop.eup %4752  ;;  %v3799_v56 = vsel %vm3783_vm3, %v3703_v50, %v4868_v60  ;;  %4772 = vpow2.f32 %v4266_v2  ;;  %v2806_v2 = vld [vmem:[%s5863_s22 + $0x1e0] sm:$0xff]  ;;  %v3309_v50 = vadd.f32 %v6034_v9, %v2803_v57 }
 0x47b   : > { %v4755_v23 = vpop.eup %4754  ;;  %3815 = vst [vmem:[#allocation3 + $0x18] sm:$0xff] %v3799_v56  ;;  %4774 = vrcp.f32 %v3471_v4  ;;  %v3660_v1 = vmul.f32 %v4753_v40, %v6096_v0  ;;  %v4869_v60 = vld [vmem:[#allocation3 + $0x20] sm:$0xff] }
 0x47c   : > { %v4757_v41 = vpop.eup %4756  ;;  %v3580_v58 = vadd.f32 1.0, %v4755_v23  ;;  %4776 = vpow2.f32 %v4251_v30  ;;  %v3312_v30 = vadd.f32 %v6042_v34, %v2806_v2  ;;  %v4268_v9 = vmul.f32 -1.442695, %v3309_v50  ;;  %v3630_v23 = vld [vmem:[#allocation4 + $0x50] sm:$0xff] }
 0x47d   : > { %v6141_v51 = vpop.eup %4758  ;;  %4778 = vtanh.f32 %v6053_v29  ;;  %v3661_v6 = vmul.f32 %v4757_v41, %v4739_v11  ;;  %v6147_v13 = vadd.f32 %v3660_v1, %v3644_v26  ;;  %v3307_v2 = vadd.f32 %v6030_v8, %v2801_v22  ;;  %v3633_v22 = vld [vmem:[#allocation4 + $0x68] sm:$0xff] }
 0x47e   : > { %v6149_v0 = vpop.eup %4760  ;;  %4780 = vrcp.f32 %v3580_v58  ;;  %v2796_v58 = vld [vmem:[%s5863_s22 + $0x190] sm:$0xff] }
 0x47f   : > { %v4763_v24 = vpop.eup %4762  ;;  %4782 = vpow2.f32 %v4267_v45  ;;  %v6154_v54 = vadd.f32 %v3661_v6, %v3645_v53  ;;  %v3852_v29 = vsel %vm3788_vm8, %v6147_v13, %v3628_v12  ;;  %v4252_v12 = vmul.f32 -1.442695, %v3308_v14  ;;  %v3631_v14 = vld [vmem:[#allocation4 + $0x58] sm:$0xff] }
 0x480   : > { %v4765_v11 = vpop.eup %4764  ;;  %v3581_v61 = vadd.f32 1.0, %v4763_v24  ;;  %4784 = vtanh.f32 %v3294_v18  ;;  %3868 = vst [vmem:[#allocation4 + $0x40] sm:$0xff] %v3852_v29  ;;  %v6183_v24 = vpop.permute.xlu0 %3763  ;;  %v3302_v29 = vadd.f32 %v6012_v7, %v2796_v58 }
 0x481   : > { %v4767_v15 = vpop.eup %4766  ;;  %v3376_v5 = vadd.f32 1.0, %v4765_v11  ;;  %4786 = vpow2.f32 %v4280_v27  ;;  %v3853_v39 = vsel %vm3789_vm9, %v6154_v54, %v3629_v55  ;;  %v2797_v55 = vld [vmem:[%s5863_s22 + $0x198] sm:$0xff]  ;;  %v4870_v27 = vld [vmem:[#allocation3 + $0x28] sm:$0xff]  ;;  %vm3790_vm10 = vcmp.eq.s32.totalorder %v6183_v24, 1 }
 0x482   : > { %v6164_v63 = vpop.eup %4768  ;;  %4788 = vrcp.f32 %v3581_v61  ;;  %3869 = vst [vmem:[#allocation4 + $0x48] sm:$0xff] %v3853_v39  ;;  %v3303_v20 = vadd.f32 %v6015_v35, %v2797_v55  ;;  %v3646_v18 = vmul.f32 %v4767_v15, %v3630_v23  ;;  %v4269_v35 = vmul.f32 -1.442695, %v3313_v43  ;;  %v2805_v55 = vld [vmem:[%s5863_s22 + $0x1d8] sm:$0xff] }
 0x483   : > { %v4771_v49 = vpop.eup %4770  ;;  %4790 = vrcp.f32 %v3376_v5 }
 0x484   : > { %v4773_v4 = vpop.eup %4772  ;;  %v3704_v48 = vmul.f32 %v4771_v49, %v6079_v16  ;;  %4792 = vtanh.f32 %v3298_v42  ;;  %v4253_v16 = vmul.f32 -1.442695, %v3312_v30  ;;  %v4282_v11 = vmul.f32 -1.442695, %v3303_v20  ;;  %v2800_v42 = vld [vmem:[%s5863_s22 + $0x1b0] sm:$0xff] }
 0x485   : > { %v4775_v28 = vpop.eup %4774  ;;  %v3472_v26 = vadd.f32 1.0, %v4773_v4  ;;  %4794 = vpow2.f32 %v4281_v19  ;;  %v4283_v4 = vmul.f32 -1.442695, %v3307_v2 }
 0x486   : > { %v4777_v40 = vpop.eup %4776  ;;  %v3800_v56 = vsel %vm3784_vm4, %v3704_v48, %v4869_v60  ;;  %4796 = vpow2.f32 %v4252_v12  ;;  %v3647_v15 = vmul.f32 %v4775_v28, %v3631_v14  ;;  %v6196_v12 = vpop.permute.xlu1 %3766  ;;  %v4871_v60 = vld [vmem:[#allocation3 + $0x30] sm:$0xff] }
 0x487   : > { %v4779_v45 = vpop.eup %4778  ;;  %3816 = vst [vmem:[#allocation3 + $0x20] sm:$0xff] %v3800_v56  ;;  %4798 = vrcp.f32 %v3472_v26  ;;  %v3377_v34 = vadd.f32 1.0, %v4777_v40  ;;  %vm3791_vm11 = vcmp.eq.s32.totalorder %v6196_v12, 1 }
 0x488   : > { %v6174_v53 = vpop.eup %4780  ;;  %v3705_v1 = vmul.f32 %v4779_v45, %v6087_v17  ;;  %4800 = vtanh.f32 %v6099_v62 }
 0x489   : > { %v4783_v41 = vpop.eup %4782  ;;  %4802 = vrcp.f32 %v3377_v34  ;;  %v2809_v34 = vld [vmem:[%s5863_s22 + $0x1f8] sm:$0xff] }
 0x48a   : > { %v4785_v25 = vpop.eup %4784  ;;  %v3801_v59 = vsel %vm3785_vm5, %v3705_v1, %v4870_v27  ;;  %v3473_v6 = vadd.f32 1.0, %v4783_v41  ;;  %4804 = vpow2.f32 %v4268_v9  ;;  %v3311_v1 = vadd.f32 %v6065_v52, %v2805_v55 }
 0x48b   : > { %v4787_v17 = vpop.eup %4786  ;;  %3817 = vst [vmem:[#allocation3 + $0x28] sm:$0xff] %v3801_v59  ;;  %4806 = vpow2.f32 %v4253_v16  ;;  %v3662_v62 = vmul.f32 %v4785_v25, %v6149_v0  ;;  %v3632_v16 = vld [vmem:[#allocation4 + $0x60] sm:$0xff]  ;;  %v4872_v59 = vld [vmem:[#allocation3 + $0x38] sm:$0xff] }
 0x48c   : > { %v6187_v57 = vpop.eup %4788  ;;  %4808 = vrcp.f32 %v3473_v6  ;;  %v3582_v46 = vadd.f32 1.0, %v4787_v17 }
 0x48d   : > { %v6190_v61 = vpop.eup %4790  ;;  %4810 = vtanh.f32 %v6114_v3  ;;  %v3678_v5 = vadd.f32 %v3662_v62, %v3646_v18  ;;  %v3306_v3 = vadd.f32 %v6021_v47, %v2800_v42  ;;  %v2808_v18 = vld [vmem:[%s5863_s22 + $0x1f0] sm:$0xff] }
 0x48e   : > { %v4793_v19 = vpop.eup %4792  ;;  %4812 = vrcp.f32 %v3582_v46 }
 0x48f   : > { %v4795_v0 = vpop.eup %4794  ;;  %4814 = vpow2.f32 %v4269_v35  ;;  %v3663_v39 = vmul.f32 %v4793_v19, %v6164_v63  ;;  %v3854_v7 = vsel %vm3790_vm10, %v3678_v5, %v3630_v23 }
 0x490   : > { %v4797_v50 = vpop.eup %4796  ;;  %v3583_v49 = vadd.f32 1.0, %v4795_v0  ;;  %4816 = vtanh.f32 %v3302_v29  ;;  %3870 = vst [vmem:[#allocation4 + $0x50] sm:$0xff] %v3854_v7  ;;  %v6223_v29 = vpop.permute.xlu0 %3769 }
 0x491   : > { %v4799_v8 = vpop.eup %4798  ;;  %v3378_v30 = vadd.f32 1.0, %v4797_v50  ;;  %4818 = vpow2.f32 %v4282_v11  ;;  %v3679_v48 = vadd.f32 %v3663_v39, %v3647_v15  ;;  %vm3792_vm12 = vcmp.eq.s32.totalorder %v6223_v29, 1  ;;  %v3773_v39 = vpop.permute.xlu1 %3772 }
 0x492   : > { %v4801_v63 = vpop.eup %4800  ;;  %4820 = vrcp.f32 %v3583_v49  ;;  %v3648_v25 = vmul.f32 %v4799_v8, %v3632_v16  ;;  %vm3793_vm13 = vcmp.eq.s32.totalorder %v3773_v39, 1  ;;  %v4873_v49 = vld [vmem:[#allocation3 + $0x48] sm:$0xff] }
 0x493   : > { %v4803_v32 = vpop.eup %4802  ;;  %4822 = vrcp.f32 %v3378_v30  ;;  %v3706_v28 = vmul.f32 %v4801_v63, %v6128_v44  ;;  %v3855_v47 = vsel %vm3791_vm11, %v3679_v48, %v3631_v14  ;;  %v2804_v44 = vld [vmem:[%s5863_s22 + $0x1d0] sm:$0xff] }
 0x494   : > { %v4805_v26 = vpop.eup %4804  ;;  %4824 = vtanh.f32 %v3306_v3  ;;  %3871 = vst [vmem:[#allocation4 + $0x58] sm:$0xff] %v3855_v47  ;;  %v3310_v58 = vadd.f32 %v6060_v37, %v2804_v44  ;;  %v3634_v30 = vld [vmem:[#allocation4 + $0x70] sm:$0xff]  ;;  %v3776_v44 = vpop.permute.xlu0 %3775 }
 0x495   : > { %v4807_v40 = vpop.eup %4806  ;;  %v3802_v56 = vsel %vm3786_vm6, %v3706_v28, %v4871_v60  ;;  %v3474_v9 = vadd.f32 1.0, %v4805_v26  ;;  %4826 = vpow2.f32 %v4283_v4  ;;  %v4874_v28 = vld [vmem:[#allocation3 + $0x40] sm:$0xff]  ;;  %v3635_v26 = vld [vmem:[#allocation4 + $0x78] sm:$0xff]  ;;  %vm3794_vm14 = vcmp.eq.s32.totalorder %v3776_v44, 1 }
 0x496   : > { %v4809_v23 = vpop.eup %4808  ;;  %3818 = vst [vmem:[#allocation3 + $0x30] sm:$0xff] %v3802_v56  ;;  %v3379_v45 = vadd.f32 1.0, %v4807_v40  ;;  %4828 = vtanh.f32 %v6154_v54  ;;  %v3315_v54 = vadd.f32 %v6074_v10, %v2809_v34  ;;  %v3314_v10 = vadd.f32 %v6068_v21, %v2808_v18  ;;  %v4875_v60 = vld [vmem:[#allocation3 + $0x58] sm:$0xff] }
 0x497   : > { %v4811_v43 = vpop.eup %4810  ;;  %4830 = vrcp.f32 %v3474_v9  ;;  %v3649_v46 = vmul.f32 %v4809_v23, %v3633_v22  ;;  %v4876_v9 = vld [vmem:[#allocation3 + $0x50] sm:$0xff] }
 0x498   : > { %v6212_v20 = vpop.eup %4812  ;;  %4832 = vrcp.f32 %v3379_v45  ;;  %v3707_v33 = vmul.f32 %v4811_v43, %v6141_v51  ;;  %v4284_v51 = vmul.f32 -1.442695, %v3311_v1  ;;  %v4285_v62 = vmul.f32 -1.442695, %v3315_v54 }
 0x499   : > { %v4815_v41 = vpop.eup %4814  ;;  %4834 = vtanh.f32 %v6147_v13 }
 0x49a   : > { %v4817_v27 = vpop.eup %4816  ;;  %v3803_v6 = vsel %vm3787_vm7, %v3707_v33, %v4872_v59  ;;  %v3475_v52 = vadd.f32 1.0, %v4815_v41  ;;  %4836 = vtanh.f32 %v3679_v48  ;;  %v3779_v41 = vpop.permute.xlu1 %3778 }
 0x49b   : > { %v4819_v14 = vpop.eup %4818  ;;  %3819 = vst [vmem:[#allocation3 + $0x38] sm:$0xff] %v3803_v6  ;;  %4838 = vtanh.f32 %v3678_v5  ;;  %v3664_v13 = vmul.f32 %v4817_v27, %v6190_v61  ;;  %vm3795_vm15 = vcmp.eq.s32.totalorder %v3779_v41, 1 }
 0x49c   : > { %v4821_v17 = vpop.eup %4820  ;;  %4840 = vrcp.f32 %v3475_v52  ;;  %v3584_v37 = vadd.f32 1.0, %v4819_v14  ;;  %v4877_v52 = vld [vmem:[#allocation3 + $0x68] sm:$0xff]  ;;  %v4878_v14 = vld [vmem:[#allocation3 + $0x60] sm:$0xff] }
 0x49d   : > { %v4823_v35 = vpop.eup %4822  ;;  %4842 = vtanh.f32 %v3310_v58  ;;  %v3680_v36 = vadd.f32 %v3664_v13, %v3648_v25 }
 0x49e   : > { %v4825_v11 = vpop.eup %4824  ;;  %4844 = vrcp.f32 %v3584_v37 }
 0x49f   : > { %v4827_v42 = vpop.eup %4826  ;;  %4846 = vpow2.f32 %v4284_v51  ;;  %v3665_v2 = vmul.f32 %v4825_v11, %v4803_v32  ;;  %v3856_v61 = vsel %vm3792_vm12, %v3680_v36, %v3632_v16  ;;  %v4880_v11 = vld [vmem:[#allocation3 + $0x78] sm:$0xff] }
 0x4a0   : > { %v4829_v15 = vpop.eup %4828  ;;  %v3585_v5 = vadd.f32 1.0, %v4827_v42  ;;  %4848 = vtanh.f32 %v3314_v10  ;;  %3872 = vst [vmem:[#allocation4 + $0x60] sm:$0xff] %v3856_v61 }
 0x4a1   : > { %v4831_v21 = vpop.eup %4830  ;;  %v3709_v19 = vmul.f32 %v4829_v15, %v6187_v57  ;;  %4850 = vpow2.f32 %v4285_v62  ;;  %v3681_v0 = vadd.f32 %v3665_v2, %v3649_v46  ;;  %v4879_v46 = vld [vmem:[#allocation3 + $0x70] sm:$0xff] }
 0x4a2   : > { %v4833_v7 = vpop.eup %4832  ;;  %4852 = vrcp.f32 %v3585_v5  ;;  %v3650_v55 = vmul.f32 %v4831_v21, %v3634_v30 }
 0x4a3   : > { %v4835_v50 = vpop.eup %4834  ;;  %v3805_v3 = vsel %vm3789_vm9, %v3709_v19, %v4873_v49  ;;  %4854 = vtanh.f32 %v3681_v0  ;;  %v3857_v8 = vsel %vm3793_vm13, %v3681_v0, %v3633_v22 }
 0x4a4   : > { %v4837_v4 = vpop.eup %4836  ;;  %3821 = vst [vmem:[#allocation3 + $0x48] sm:$0xff] %v3805_v3  ;;  %v3708_v48 = vmul.f32 %v4835_v50, %v6174_v53  ;;  %3873 = vst [vmem:[#allocation4 + $0x68] sm:$0xff] %v3857_v8  ;;  %4856 = vtanh.f32 %v3680_v36 }
 0x4a5   : > { %v4839_v57 = vpop.eup %4838  ;;  %v3711_v63 = vmul.f32 %v4837_v4, %v4821_v17 }
 0x4a6   : > { %v4841_v32 = vpop.eup %4840  ;;  %v3804_v47 = vsel %vm3788_vm8, %v3708_v48, %v4874_v28  ;;  %v3710_v31 = vmul.f32 %v4839_v57, %v6212_v20 }
 0x4a7   : > { %v4843_v40 = vpop.eup %4842  ;;  %3820 = vst [vmem:[#allocation3 + $0x40] sm:$0xff] %v3804_v47  ;;  %v3807_v56 = vsel %vm3791_vm11, %v3711_v63, %v4875_v60  ;;  %v3651_v34 = vmul.f32 %v4841_v32, %v3635_v26 }
 0x4a8   : > { %v4845_v53 = vpop.eup %4844  ;;  %3823 = vst [vmem:[#allocation3 + $0x58] sm:$0xff] %v3807_v56  ;;  %v3806_v23 = vsel %vm3790_vm10, %v3710_v31, %v4876_v9  ;;  %v3666_v45 = vmul.f32 %v4843_v40, %v4823_v35 }
 0x4a9   : > { %v4847_v38 = vpop.eup %4846  ;;  %3822 = vst [vmem:[#allocation3 + $0x50] sm:$0xff] %v3806_v23 }
 0x4aa   : > { %v4849_v16 = vpop.eup %4848  ;;  %v3586_v43 = vadd.f32 1.0, %v4847_v38  ;;  %v3682_v1 = vadd.f32 %v3666_v45, %v3650_v55 }
 0x4ab   : > { %v4851_v20 = vpop.eup %4850  ;;  %v3667_v33 = vmul.f32 %v4849_v16, %v4833_v7 }
 0x4ac   : > { %v4853_v12 = vpop.eup %4852  ;;  %4858 = vrcp.f32 %v3586_v43  ;;  %v3587_v58 = vadd.f32 1.0, %v4851_v20  ;;  %v3858_v18 = vsel %vm3794_vm14, %v3682_v1, %v3634_v30 }
 0x4ad   : > { %v4855_v54 = vpop.eup %4854  ;;  %v3683_v24 = vadd.f32 %v3667_v33, %v3651_v34  ;;  %4860 = vtanh.f32 %v3682_v1  ;;  %3874 = vst [vmem:[#allocation4 + $0x70] sm:$0xff] %v3858_v18 }
 0x4ae   : > { %v4857_v25 = vpop.eup %4856  ;;  %4862 = vrcp.f32 %v3587_v58  ;;  %v3713_v27 = vmul.f32 %v4855_v54, %v4853_v12 }
 0x4af   : > { %v3712_v59 = vmul.f32 %v4857_v25, %v4845_v53  ;;  %4864 = vtanh.f32 %v3683_v24  ;;  %v3859_v6 = vsel %vm3795_vm15, %v3683_v24, %v3635_v26 }
 0x4b0   : > { %v3809_v22 = vsel %vm3793_vm13, %v3713_v27, %v4877_v52  ;;  %3875 = vst [vmem:[#allocation4 + $0x78] sm:$0xff] %v3859_v6 }
 0x4b1   : > { %3825 = vst [vmem:[#allocation3 + $0x68] sm:$0xff] %v3809_v22  ;;  %v3808_v51 = vsel %vm3792_vm12, %v3712_v59, %v4878_v14 }
 0x4b2   : > { %3824 = vst [vmem:[#allocation3 + $0x60] sm:$0xff] %v3808_v51 }
 0x4b6   : > { %v4859_v13 = vpop.eup %4858 }
 0x4b7   : > { %v4861_v17 = vpop.eup %4860  ;;  %2705 = sbr.rel (!%p2702_p12) target bundleno = 812 (0x32c), region = 80 }
 0x4b8   : > { %v4863_v37 = vpop.eup %4862  ;;  %v3714_v10 = vmul.f32 %v4861_v17, %v4859_v13 }
 0x4b9   : > { %v4865_v35 = vpop.eup %4864 }
 0x4ba   : > { %v3715_v62 = vmul.f32 %v4865_v35, %v4863_v37  ;;  %v3810_v36 = vsel %vm3794_vm14, %v3714_v10, %v4879_v46 }
 0x4bb   : > { %3826 = vst [vmem:[#allocation3 + $0x70] sm:$0xff] %v3810_v36 }
 0x4bc   : > { %v3811_v42 = vsel %vm3795_vm15, %v3715_v62, %v4880_v11 }
 0x4bd   : > { %3827 = vst [vmem:[#allocation3 + $0x78] sm:$0xff] %v3811_v42 }
 0x4be PF:  { %v3895_v29 = vld [vmem:[%s6320_s6] sm:$0xff]  ;;  %v3896_v2 = vld [vmem:[%s6320_s6 + $0x8] sm:$0xff]  ;;  %v3897_v61 = vld [vmem:[%s6320_s6 + $0x10] sm:$0xff] }
 0x4bf   :  { %v4379_v15 = vpack.c.bf16 %v3896_v2, %v3895_v29  ;;  %v3898_v5 = vld [vmem:[%s6320_s6 + $0x18] sm:$0xff]  ;;  %v3899_v19 = vld [vmem:[%s6320_s6 + $0x20] sm:$0xff]  ;;  %v3900_v0 = vld [vmem:[%s6320_s6 + $0x28] sm:$0xff] }
 0x4c0   :  { %v4383_v21 = vpack.c.bf16 %v3898_v5, %v3897_v61  ;;  %v4387_v39 = vpack.c.bf16 %v3900_v0, %v3899_v19  ;;  %v3879_v7 = vld [vmem:[#allocation3] sm:$0xff]  ;;  %v3901_v49 = vld [vmem:[%s6320_s6 + $0x30] sm:$0xff]  ;;  %v3902_v3 = vld [vmem:[%s6320_s6 + $0x38] sm:$0xff] }
 0x4c1   :  { %4380 = vmatprep.subr.bf16.mxu0 %v4379_v15  ;;  %4411 = vmatprep.subr.bf16.mxu1 %v4379_v15  ;;  %v3887_v50 = vld [vmem:[#allocation3 + $0x40] sm:$0xff]  ;;  %v4391_v8 = vpack.c.bf16 %v3902_v3, %v3901_v49  ;;  %v3904_v4 = vld [vmem:[%s6320_s6 + $0x48] sm:$0xff]  ;;  %v3905_v57 = vld [vmem:[%s6320_s6 + $0x50] sm:$0xff] }
 0x4c2   :  { %4382 = vmatpush3.bf16.msra.mxu0 %v4379_v15  ;;  %4419 = vmatpush3.bf16.msra.mxu1 %v4379_v15  ;;  %v3903_v30 = vld [vmem:[%s6320_s6 + $0x40] sm:$0xff]  ;;  %v3906_v63 = vld [vmem:[%s6320_s6 + $0x58] sm:$0xff]  ;;  %v3908_v47 = vld [vmem:[%s6320_s6 + $0x68] sm:$0xff] }
 0x4c3   :  { %4384 = vmatprep.subr.bf16.mxu0 %v4383_v21  ;;  %4412 = vmatprep.subr.bf16.mxu1 %v4383_v21  ;;  %v4395_v48 = vpack.c.bf16 %v3904_v4, %v3903_v30  ;;  %v4399_v32 = vpack.c.bf16 %v3906_v63, %v3905_v57  ;;  %v3907_v28 = vld [vmem:[%s6320_s6 + $0x60] sm:$0xff]  ;;  %v3909_v26 = vld [vmem:[%s6320_s6 + $0x70] sm:$0xff]  ;;  %v3910_v55 = vld [vmem:[%s6320_s6 + $0x78] sm:$0xff] }
 0x4c4   :  { %4355 = vmatprep.mubr.f32.mxu0 %v3879_v7  ;;  %4367 = vmatprep.mubr.f32.mxu1 %v3887_v50  ;;  %v4403_v31 = vpack.c.bf16 %v3908_v47, %v3907_v28  ;;  %v4407_v40 = vpack.c.bf16 %v3910_v55, %v3909_v26  ;;  %v3880_v60 = vld [vmem:[#allocation3 + $0x8] sm:$0xff]  ;;  %v3881_v53 = vld [vmem:[#allocation3 + $0x10] sm:$0xff]  ;;  %v3882_v23 = vld [vmem:[#allocation3 + $0x18] sm:$0xff] }
 0x4c5   :  { %v3888_v56 = vld [vmem:[#allocation3 + $0x48] sm:$0xff]  ;;  %v3889_v9 = vld [vmem:[#allocation3 + $0x50] sm:$0xff]  ;;  %v3890_v45 = vld [vmem:[#allocation3 + $0x58] sm:$0xff] }
 0x4c6   :  { %4386 = vmatpush3.bf16.msra.mxu0 %v4383_v21  ;;  %4420 = vmatpush3.bf16.msra.mxu1 %v4383_v21  ;;  %v3883_v44 = vld [vmem:[#allocation3 + $0x20] sm:$0xff]  ;;  %v3884_v34 = vld [vmem:[#allocation3 + $0x28] sm:$0xff]  ;;  %v3885_v43 = vld [vmem:[#allocation3 + $0x30] sm:$0xff] }
 0x4c7   :  { %4388 = vmatprep.subr.bf16.mxu0 %v4387_v39  ;;  %4413 = vmatprep.subr.bf16.mxu1 %v4387_v39  ;;  %v3891_v38 = vld [vmem:[#allocation3 + $0x60] sm:$0xff]  ;;  %v3892_v16 = vld [vmem:[#allocation3 + $0x68] sm:$0xff]  ;;  %v3893_v1 = vld [vmem:[#allocation3 + $0x70] sm:$0xff] }
 0x4c8   :  { %v3886_v20 = vld [vmem:[#allocation3 + $0x38] sm:$0xff]  ;;  %v4286_v41 = vld [vmem:[%s6321_s7] ss:$0 sm:$0xff]  ;;  %s4993_s7 = smov [#allocation13]  }
 0x4c9   :  { %v3894_v33 = vld [vmem:[#allocation3 + $0x78] sm:$0xff]  ;;  %s4084_s23 = sshll.u32 %s4993_s7, 4  ;;  %s4085_s23 = int_to_ptr.vmem [resolvable:$true] %s4084_s23 }
 0x4ca   :  { %4390 = vmatpush3.bf16.msra.mxu0 %v4387_v39  ;;  %4421 = vmatpush3.bf16.msra.mxu1 %v4387_v39  ;;  %s4947_s24 = scalar_lea.vmem %s4085_s23, 2048  ;;  %p4952_p0 = scmp.lt.s32.totalorder %s4085_s23, %s4085_s23 }
 0x4cb   :  { %4392 = vmatprep.subr.bf16.mxu0 %v4391_v8  ;;  %4414 = vmatprep.subr.bf16.mxu1 %v4391_v8  ;;  %p4948_p13 = scmp.ne.s32.totalorder %s4085_s23, %s4947_s24  ;;  %p4953_p1 = scmp.lt.s32.totalorder %s4947_s24, %s4947_s24 }
 0x4cd   :  { %p4954_p2 = por %p4953_p1, %p4952_p0 }
 0x4ce   :  { %4394 = vmatpush3.bf16.msra.mxu0 %v4391_v8  ;;  %4422 = vmatpush3.bf16.msra.mxu1 %v4391_v8 }
 0x4cf   :  { %4396 = vmatprep.subr.bf16.mxu0 %v4395_v48  ;;  %4415 = vmatprep.subr.bf16.mxu1 %v4395_v48  ;;  %p4955_p3 = pnand %p4954_p2, %p4948_p13 }
 0x4d2   :  { %4398 = vmatpush3.bf16.msra.mxu0 %v4395_v48  ;;  %4423 = vmatpush3.bf16.msra.mxu1 %v4395_v48 }
 0x4d3   :  { %4400 = vmatprep.subr.bf16.mxu0 %v4399_v32  ;;  %4416 = vmatprep.subr.bf16.mxu1 %v4399_v32 }
 0x4d6   :  { %4402 = vmatpush3.bf16.msra.mxu0 %v4399_v32  ;;  %4424 = vmatpush3.bf16.msra.mxu1 %v4399_v32 }
 0x4d7   :  { %4404 = vmatprep.subr.bf16.mxu0 %v4403_v31  ;;  %4417 = vmatprep.subr.bf16.mxu1 %v4403_v31 }
 0x4da   :  { %4406 = vmatpush3.bf16.msra.mxu0 %v4403_v31  ;;  %4425 = vmatpush3.bf16.msra.mxu1 %v4403_v31 }
 0x4db   :  { %4408 = vmatprep.subr.bf16.mxu0 %v4407_v40  ;;  %4418 = vmatprep.subr.bf16.mxu1 %v4407_v40 }
 0x4de   :  { %4410 = vmatpush3.bf16.msra.mxu0 %v4407_v40  ;;  %4426 = vmatpush3.bf16.msra.mxu1 %v4407_v40 }
 0x4e1   :  { %4356 = vmatmul.mubr.f32.vlgmr.msra.gmra.mrb[0].mxu0 %v3880_v60  ;;  %4368 = vmatmul.mubr.f32.vlgmr.msra.gmra.mrb[0].mxu1 %v3888_v56 }
 0x4e2   :  { %4358 = vmatprep.mubr.f32.mxu0 %v3881_v53  ;;  %4370 = vmatprep.mubr.f32.mxu1 %v3889_v9 }
 0x4e5   :  { %4359 = vmatmul.mubr.f32.gmra.mrb[2].mxu0 %v3882_v23  ;;  %4371 = vmatmul.mubr.f32.gmra.mrb[2].mxu1 %v3890_v45 }
 0x4e6   :  { %4361 = vmatprep.mubr.f32.mxu0 %v3883_v44  ;;  %4373 = vmatprep.mubr.f32.mxu1 %v3891_v38 }
 0x4e9   :  { %4362 = vmatmul.mubr.f32.gmra.mrb[4].mxu0 %v3884_v34  ;;  %4374 = vmatmul.mubr.f32.gmra.mrb[4].mxu1 %v3892_v16 }
 0x4ea   :  { %4364 = vmatprep.mubr.f32.mxu0 %v3885_v43  ;;  %4376 = vmatprep.mubr.f32.mxu1 %v3893_v1 }
 0x4ed   :  { %4365 = vmatmul.mubr.f32.gmra.mrb[6].mxu0 %v3886_v20  ;;  %4377 = vmatmul.mubr.f32.gmra.mrb[6].mxu1 %v3894_v33 }
 0x5b4   :  { %v4357_v12 = vpop.f32.mrb[0].mxu0  ;;  %v4369_v58 = vpop.f32.mrb[0].mxu1 }
 0x5b5   :  { %v3990_v18 = vadd.f32 %v4357_v12, %v4286_v41  ;;  %v4030_v54 = vadd.f32 %v4369_v58, %v4286_v41  ;;  %v3984_v24 = vpop.f32.mrb[1].mxu0  ;;  %v4024_v25 = vpop.f32.mrb[1].mxu1 }
 0x5b6   :  { %v3985_v27 = vadd.f32 %v4286_v41, %v3984_v24  ;;  %v4025_v59 = vadd.f32 %v4286_v41, %v4024_v25 }
 0x5b7   :  { %4064 = vst [vmem:[#allocation13 + $0x8] sm:$0xff] %v3990_v18  ;;  %4072 = vst [vmem:[#allocation13 + $0x48] sm:$0xff] %v4030_v54 }
 0x5b8   :  { %4063 = vst [vmem:[#allocation13] sm:$0xff] %v3985_v27  ;;  %4071 = vst [vmem:[#allocation13 + $0x40] sm:$0xff] %v4025_v59  ;;  %v4360_v6 = vpop.f32.mrb[2].mxu0  ;;  %v4372_v52 = vpop.f32.mrb[2].mxu1 }
 0x5b9   :  { %v4000_v22 = vadd.f32 %v4360_v6, %v4286_v41  ;;  %v4040_v14 = vadd.f32 %v4372_v52, %v4286_v41  ;;  %v3994_v51 = vpop.f32.mrb[3].mxu0  ;;  %v4034_v13 = vpop.f32.mrb[3].mxu1 }
 0x5ba   :  { %v3995_v17 = vadd.f32 %v4286_v41, %v3994_v51  ;;  %v4035_v37 = vadd.f32 %v4286_v41, %v4034_v13 }
 0x5bb   :  { %4066 = vst [vmem:[#allocation13 + $0x18] sm:$0xff] %v4000_v22  ;;  %4074 = vst [vmem:[#allocation13 + $0x58] sm:$0xff] %v4040_v14 }
 0x5bc   :  { %4065 = vst [vmem:[#allocation13 + $0x10] sm:$0xff] %v3995_v17  ;;  %4073 = vst [vmem:[#allocation13 + $0x50] sm:$0xff] %v4035_v37  ;;  %v4363_v10 = vpop.f32.mrb[4].mxu0  ;;  %v4375_v35 = vpop.f32.mrb[4].mxu1 }
 0x5bd   :  { %v4010_v62 = vadd.f32 %v4363_v10, %v4286_v41  ;;  %v4050_v46 = vadd.f32 %v4375_v35, %v4286_v41  ;;  %v4004_v36 = vpop.f32.mrb[5].mxu0  ;;  %v4044_v11 = vpop.f32.mrb[5].mxu1 }
 0x5be   :  { %v4005_v42 = vadd.f32 %v4286_v41, %v4004_v36  ;;  %v4045_v29 = vadd.f32 %v4286_v41, %v4044_v11 }
 0x5bf   :  { %4068 = vst [vmem:[#allocation13 + $0x28] sm:$0xff] %v4010_v62  ;;  %4076 = vst [vmem:[#allocation13 + $0x68] sm:$0xff] %v4050_v46 }
 0x5c0   :  { %4067 = vst [vmem:[#allocation13 + $0x20] sm:$0xff] %v4005_v42  ;;  %4075 = vst [vmem:[#allocation13 + $0x60] sm:$0xff] %v4045_v29  ;;  %v4366_v2 = vpop.f32.mrb[6].mxu0  ;;  %v4378_v61 = vpop.f32.mrb[6].mxu1 }
 0x5c1   :  { %v4020_v15 = vadd.f32 %v4366_v2, %v4286_v41  ;;  %v4060_v5 = vadd.f32 %v4378_v61, %v4286_v41  ;;  %v4014_v21 = vpop.f32.mrb[7].mxu0  ;;  %v4054_v19 = vpop.f32.mrb[7].mxu1 }
 0x5c2   :  { %v4015_v0 = vadd.f32 %v4286_v41, %v4014_v21  ;;  %v4055_v39 = vadd.f32 %v4286_v41, %v4054_v19 }
 0x5c3   :  { %4070 = vst [vmem:[#allocation13 + $0x38] sm:$0xff] %v4020_v15  ;;  %4078 = vst [vmem:[#allocation13 + $0x78] sm:$0xff] %v4060_v5 }
 0x5c4   :  { %4069 = vst [vmem:[#allocation13 + $0x30] sm:$0xff] %v4015_v0  ;;  %4077 = vst [vmem:[#allocation13 + $0x70] sm:$0xff] %v4055_v39 }
 0x5c5   :  { %4958 = shalt.err (!%p4955_p3)
}
 0x5c6   :  { %s4959_s3 = scalar_lea.hbm %s6322_s8, 2048 }
 0x5c7   :  { %p4960_p4 = scmp.ne.s32.totalorder %s6322_s8, %s4959_s3  ;;  %p4963_p5 = scmp.lt.u32.totalorder %s4959_s3, %s6322_s8 }
 0x5c9   :  { %p4965_p6 = pnand %p4963_p5, %p4960_p4 }
 0x5cb   :  { %4968 = shalt.err (!%p4965_p6)
}
 0x5cc   :  { %s4994_s29 = smov 128   ;;  %s4995_s28 = smov 8  }
 0x5cd   :  { %4090 = dma.vmem_to_hbm [thread:$0]  %s4085_s23, 2048, %s6322_s8, [#allocation9], %s4994_s29, %s4994_s29, %s4995_s28  }
 0x5ce   :  { %4977 = dma.done.wait [#allocation9], 2048  }
 0x5cf   :  { %4978 = vsyncadd [#allocation9], 4294965248 }
 0x5d0   :  { %4094 = vsyncpa [#allocation8], 1 }
 0x5d1   :  { %4095 = vsyncpa [#allocation11], 1 }
 0x5d2   :  { %4096 = vsyncpa [#allocation9], 1 }

</bundles_post_ra>
